<compile_context>
chip_gen: v6e
topology: v6e:2x2x1
jax: 0.10.0
libtpu: 0.0.40
codegen_flags: <defaults>
</compile_context>

<pallas_src>
import functools
import math

import jax
import jax.numpy as jnp
from jax import lax
from jax.experimental import pallas as pl
from jax.experimental.pallas import tpu as pltpu


# -----------------------------------------------------------------------------
# Fused per-batch kernel: LayerNorm + ESSAttn + concat + conv chain + residual
# -----------------------------------------------------------------------------
def _convup_kernel(x_ref, g_ref, bta_ref, wqkv_ref, bqkv_ref, wo_ref, bo_ref,
                   w1_ref, b1_ref, w2_ref, b2_ref, w3_ref, b3_ref, m_ref,
                   o_ref, *, C, W, HW):
    # Everything stays in channels-on-sublanes (C, HW) layout end-to-end.
    def mm(w, act):  # MXU matmul; act cast to the weight dtype (f32 or bf16)
        return jnp.dot(w, act.astype(w.dtype), preferred_element_type=jnp.float32)

    s = x_ref[...].astype(jnp.float32)                        # (C, HW) shortcut

    # ---- LayerNorm over channels (sublane reduction), eps = 1e-5 -----------
    mu = jnp.mean(s, axis=0, keepdims=True)
    xc = s - mu
    var = jnp.mean(xc * xc, axis=0, keepdims=True)
    xn = xc * lax.rsqrt(var + 1e-5) * g_ref[...] + bta_ref[...]

    # ---- ESSAttn: single stacked q/k/v projection ---------------------------
    qkv = mm(wqkv_ref[...], xn) + bqkv_ref[...]               # (3C, HW)
    q = qkv[0 * C:1 * C]
    k = qkv[1 * C:2 * C]
    v = qkv[2 * C:3 * C]

    q = q - jnp.mean(q, axis=0, keepdims=True)
    k = k - jnp.mean(k, axis=0, keepdims=True)
    q2 = q * q
    k2 = k * k
    q2 = q2 / (jnp.sum(q2, axis=0, keepdims=True) + 1e-7)
    k2 = k2 / (jnp.sum(k2, axis=0, keepdims=True) + 1e-7)
    # F.normalize (L2, eps=1e-12): k2 over the sequence axis (lanes),
    # q2 over the channel axis (sublanes).
    k2 = k2 / jnp.maximum(jnp.sqrt(jnp.sum(k2 * k2, axis=1, keepdims=True)), 1e-12)
    q2 = q2 / jnp.maximum(jnp.sqrt(jnp.sum(q2 * q2, axis=0, keepdims=True)), 1e-12)

    # kv = k2 @ v^T contracted over HW; fold the 1/sqrt(N) into the tiny (C, C)
    kv = lax.dot_general(k2, v, (((1,), (1,)), ((), ())),
                         preferred_element_type=jnp.float32)  # (C, C)
    kv = kv * (1.0 / math.sqrt(HW))
    t2 = jnp.dot(kv.T, q2, preferred_element_type=jnp.float32)  # (C, HW)
    attn = v + t2
    a = mm(wo_ref[...], attn) + bo_ref[...]                   # (C, HW)

    # ---- convu: concat -> 1x1 -> LReLU -> 3x3 -> LReLU -> 1x1 -> +shortcut --
    y0 = jnp.concatenate([a, s], axis=0)                      # (2C, HW) in-VMEM
    y1 = mm(w1_ref[...], y0) + b1_ref[...]
    y1 = jnp.maximum(y1, 0.2 * y1)                            # LeakyReLU(0.2)

    # 3x3 conv (pad 1) as a single stacked-K matmul: K = 9 * 2C.
    taps = []
    for tap in range(9):
        dy, dx = tap // 3 - 1, tap % 3 - 1
        shift = dy * W + dx
        if shift == 0:
            shifted = y1
        else:
            shifted = pltpu.roll(y1, (-shift) % HW, axis=1)   # XLU lane rotate
        taps.append(shifted * m_ref[tap])                     # zero padding
    stacked = jnp.concatenate(taps, axis=0)                   # (9*2C, HW)
    y2 = mm(w2_ref[...], stacked) + b2_ref[...]
    y2 = jnp.maximum(y2, 0.2 * y2)                            # LeakyReLU(0.2)

    y3 = mm(w3_ref[...], y2) + b3_ref[...] + s                # conv3 + residual
    o_ref[...] = y3.astype(o_ref.dtype)                       # lane-dense vst


# -----------------------------------------------------------------------------
# Wrapper
# -----------------------------------------------------------------------------
def _full_spec(shape):
    zeros = (0,) * len(shape)
    return pl.BlockSpec(shape, lambda b: zeros)


def _batch_spec(c, hw):
    return pl.BlockSpec((pl.Squeezed(), c, hw), lambda b: (b, 0, 0))


def convup_forward(x, params, *, use_bf16_mxu=False):
    """x: (B, C, H, W) float32. params: torch-layout weights. Returns (B, C, H, W).

    use_bf16_mxu=True feeds the large matmuls with bf16 operands (recommended
    on v6e/v7x; elementwise / normalization math stays f32).
    """
    B, C, H, W = x.shape
    HW = H * W
    isz = x.dtype.itemsize
    wdt = jnp.bfloat16 if use_bf16_mxu else jnp.float32
    x_flat = x.reshape(B, C, HW)                      # metadata-only NCHW view

    # ---- kernel-layout parameters (trace-time reshapes / casts only) -------
    g = params["gamma"].reshape(C, 1)
    bta = params["beta"].reshape(C, 1)
    wqkv = params["wqkv"].astype(wdt)                 # (3C, C): q/k/v stacked
    bqkv = params["bqkv"].reshape(3 * C, 1)
    wo = params["wln"].astype(wdt)                    # (C, C)
    bo = params["bln"].reshape(C, 1)

    w1 = params["w1"].reshape(2 * C, 2 * C).astype(wdt)
    b1 = params["b1"].reshape(2 * C, 1)
    # (O, I, 3, 3) -> (O, 9*I), tap-major columns matching the in-kernel stack.
    w2s = jnp.transpose(params["w2"], (0, 2, 3, 1)).reshape(2 * C, 18 * C).astype(wdt)
    b2 = params["b2"].reshape(2 * C, 1)
    w3 = params["w3"].reshape(C, 2 * C).astype(wdt)
    b3 = params["b3"].reshape(C, 1)

    # Static zero-padding masks for the 9 taps of the 3x3 conv.
    hh = jnp.arange(H)[:, None]
    ww = jnp.arange(W)[None, :]
    masks = []
    for tap in range(9):
        dy, dx = tap // 3 - 1, tap % 3 - 1
        valid = (hh + dy >= 0) & (hh + dy < H) & (ww + dx >= 0) & (ww + dx < W)
        masks.append(valid.reshape(1, HW))
    masks = jnp.stack(masks).astype(jnp.float32)      # (9, 1, HW)

    flops = 96 * B * C * C * HW
    wbytes = (46 * C * C) * jnp.dtype(wdt).itemsize

    out_flat = pl.pallas_call(
        functools.partial(_convup_kernel, C=C, W=W, HW=HW),
        out_shape=jax.ShapeDtypeStruct((B, C, HW), x.dtype),
        grid_spec=pltpu.PrefetchScalarGridSpec(
            num_scalar_prefetch=0,
            grid=(B,),
            in_specs=[
                _batch_spec(C, HW),              # x (C, HW) per batch
                _full_spec((C, 1)),              # gamma
                _full_spec((C, 1)),              # beta
                _full_spec((3 * C, C)),          # Wqkv (stacked q/k/v)
                _full_spec((3 * C, 1)),          # bqkv
                _full_spec((C, C)),              # Wln
                _full_spec((C, 1)),              # bln
                _full_spec((2 * C, 2 * C)),      # W1 (concat fused via y0 stack)
                _full_spec((2 * C, 1)),          # b1
                _full_spec((2 * C, 18 * C)),     # W2 taps stacked along K
                _full_spec((2 * C, 1)),          # b2
                _full_spec((C, 2 * C)),          # W3
                _full_spec((C, 1)),              # b3
                _full_spec((9, 1, HW)),          # zero-pad masks
            ],
            out_specs=_batch_spec(C, HW),
        ),
        compiler_params=pltpu.CompilerParams(dimension_semantics=("parallel",)),
        cost_estimate=pl.CostEstimate(
            flops=int(flops),
            transcendentals=int(4 * B * HW),
            bytes_accessed=int(2 * B * C * HW * isz + wbytes + 9 * HW * 4),
        ),
    )(x_flat, g, bta, wqkv, bqkv, wo, bo, w1, b1, w2s, b2, w3, b3, masks)

    return out_flat.reshape(B, C, H, W)       # metadata-only, like torch .view


# -----------------------------------------------------------------------------
# Pure-JAX reference (mirrors the PyTorch module in eval mode)
# -----------------------------------------------------------------------------
def _leaky(x):
    return jnp.where(x >= 0, x, 0.2 * x)


def reference_convup(x, p):
    B, C, H, W = x.shape
    N = H * W
    hi = lax.Precision.HIGHEST
    xe = jnp.transpose(x.reshape(B, C, N), (0, 2, 1))          # (B, N, C)
    mu = jnp.mean(xe, -1, keepdims=True)
    var = jnp.mean((xe - mu) ** 2, -1, keepdims=True)
    xn = (xe - mu) / jnp.sqrt(var + 1e-5) * p["gamma"] + p["beta"]
    qkv = jnp.dot(xn, p["wqkv"].T, precision=hi) + p["bqkv"]
    q, k, v = qkv[..., :C], qkv[..., C:2 * C], qkv[..., 2 * C:]
    q = q - jnp.mean(q, -1, keepdims=True)
    k = k - jnp.mean(k, -1, keepdims=True)
    q2, k2 = q * q, k * k
    q2 = q2 / (jnp.sum(q2, -1, keepdims=True) + 1e-7)
    k2 = k2 / (jnp.sum(k2, -1, keepdims=True) + 1e-7)
    k2 = k2 / jnp.maximum(jnp.sqrt(jnp.sum(k2 * k2, -2, keepdims=True)), 1e-12)
    q2 = q2 / jnp.maximum(jnp.sqrt(jnp.sum(q2 * q2, -1, keepdims=True)), 1e-12)
    kv = jnp.einsum("bnc,bnd->bcd", k2, v, precision=hi)
    t2 = jnp.einsum("bnc,bcd->bnd", q2, kv, precision=hi) / math.sqrt(N)
    attn = v + t2
    attn = jnp.dot(attn, p["wln"].T, precision=hi) + p["bln"]
    xa = jnp.transpose(attn, (0, 2, 1)).reshape(B, C, H, W)
    xc = jnp.concatenate([xa, x], axis=1)
    dn = ("NCHW", "OIHW", "NCHW")
    y = lax.conv_general_dilated(xc, p["w1"], (1, 1), [(0, 0), (0, 0)],
                                 dimension_numbers=dn, precision=hi)
    y = _leaky(y + p["b1"][None, :, None, None])
    y = lax.conv_general_dilated(y, p["w2"], (1, 1), [(1, 1), (1, 1)],
                                 dimension_numbers=dn, precision=hi)
    y = _leaky(y + p["b2"][None, :, None, None])
    y = lax.conv_general_dilated(y, p["w3"], (1, 1), [(0, 0), (0, 0)],
                                 dimension_numbers=dn, precision=hi)
    y = y + p["b3"][None, :, None, None]
    return y + x


if __name__ == "__main__":
    key = jax.random.PRNGKey(0)
    B, C, H, W = 2, 32, 16, 16                # dim=32, HW=256 (lane-dense, 2x128)
    ks = jax.random.split(key, 13)

    def nrm(k, shape, scale):
        return scale * jax.random.normal(k, shape, jnp.float32)

    params = {
        "gamma": 1.0 + 0.1 * jax.random.normal(ks[0], (C,), jnp.float32),
        "beta": 0.1 * jax.random.normal(ks[1], (C,), jnp.float32),
        "wqkv": nrm(ks[2], (3 * C, C), 1.0 / math.sqrt(C)),
        "bqkv": nrm(ks[3], (3 * C,), 0.02),
        "wln": nrm(ks[4], (C, C), 1.0 / math.sqrt(C)),
        "bln": nrm(ks[5], (C,), 0.02),
        "w1": nrm(ks[6], (2 * C, 2 * C, 1, 1), 1.0 / math.sqrt(2 * C)),
        "b1": nrm(ks[7], (2 * C,), 0.02),
        "w2": nrm(ks[8], (2 * C, 2 * C, 3, 3), 1.0 / math.sqrt(2 * C * 9)),
        "b2": nrm(ks[9], (2 * C,), 0.02),
        "w3": nrm(ks[10], (C, 2 * C, 1, 1), 1.0 / math.sqrt(2 * C)),
        "b3": nrm(ks[11], (C,), 0.02),
    }
    x = jax.random.normal(ks[12], (B, C, H, W), jnp.float32)

    y_ref = reference_convup(x, params)

    # f32 MXU feed (all generations): strict check vs. reference.
    y = convup_forward(x, params, use_bf16_mxu=False)
    y = jax.block_until_ready(y)
    assert y.shape == (B, C, H, W)
    assert jnp.allclose(y, y_ref, atol=3e-3, rtol=3e-3), "f32 mismatch vs reference"

    # bf16 MXU operand feed (recommended for v6e / v7x): looser tolerance.
    y_bf16 = convup_forward(x, params, use_bf16_mxu=True)
    y_bf16 = jax.block_until_ready(y_bf16)
    assert jnp.allclose(y_bf16, y_ref, atol=8e-2, rtol=8e-2), "bf16 mismatch vs reference"

    print("KERNEL_OK")
</pallas_src>

<mosaic_0001>
module attributes {stable_mosaic.version = 11 : i64} {
  func.func @_convup_kernel(%arg0: i32, %arg1: memref<1x32x256xf32, #tpu.memory_space<vmem>>, %arg2: memref<32x1xf32, #tpu.memory_space<vmem>>, %arg3: memref<32x1xf32, #tpu.memory_space<vmem>>, %arg4: memref<96x32xf32, #tpu.memory_space<vmem>>, %arg5: memref<96x1xf32, #tpu.memory_space<vmem>>, %arg6: memref<32x32xf32, #tpu.memory_space<vmem>>, %arg7: memref<32x1xf32, #tpu.memory_space<vmem>>, %arg8: memref<64x64xf32, #tpu.memory_space<vmem>>, %arg9: memref<64x1xf32, #tpu.memory_space<vmem>>, %arg10: memref<64x576xf32, #tpu.memory_space<vmem>>, %arg11: memref<64x1xf32, #tpu.memory_space<vmem>>, %arg12: memref<32x64xf32, #tpu.memory_space<vmem>>, %arg13: memref<32x1xf32, #tpu.memory_space<vmem>>, %arg14: memref<9x1x256xf32, #tpu.memory_space<vmem>>, %arg15: memref<1x32x256xf32, #tpu.memory_space<vmem>>) attributes {dimension_semantics = [#tpu.dimension_semantics<parallel>], iteration_bounds = array<i64: 2>, scalar_prefetch = 0 : i64, scratch_operands = 0 : i64, tpu.core_type = #tpu.core_type<tc>, window_params = [{transform_indices = @transform_0, window_bounds = array<i64: 1, 32, 256>}, {pipeline_mode = #tpu.pipeline_mode<synchronous>, transform_indices = @transform_1, window_bounds = array<i64: 32, 1>}, {pipeline_mode = #tpu.pipeline_mode<synchronous>, transform_indices = @transform_2, window_bounds = array<i64: 32, 1>}, {pipeline_mode = #tpu.pipeline_mode<synchronous>, transform_indices = @transform_3, window_bounds = array<i64: 96, 32>}, {pipeline_mode = #tpu.pipeline_mode<synchronous>, transform_indices = @transform_4, window_bounds = array<i64: 96, 1>}, {pipeline_mode = #tpu.pipeline_mode<synchronous>, transform_indices = @transform_5, window_bounds = array<i64: 32, 32>}, {pipeline_mode = #tpu.pipeline_mode<synchronous>, transform_indices = @transform_6, window_bounds = array<i64: 32, 1>}, {pipeline_mode = #tpu.pipeline_mode<synchronous>, transform_indices = @transform_7, window_bounds = array<i64: 64, 64>}, {pipeline_mode = #tpu.pipeline_mode<synchronous>, transform_indices = @transform_8, window_bounds = array<i64: 64, 1>}, {pipeline_mode = #tpu.pipeline_mode<synchronous>, transform_indices = @transform_9, window_bounds = array<i64: 64, 576>}, {pipeline_mode = #tpu.pipeline_mode<synchronous>, transform_indices = @transform_10, window_bounds = array<i64: 64, 1>}, {pipeline_mode = #tpu.pipeline_mode<synchronous>, transform_indices = @transform_11, window_bounds = array<i64: 32, 64>}, {pipeline_mode = #tpu.pipeline_mode<synchronous>, transform_indices = @transform_12, window_bounds = array<i64: 32, 1>}, {pipeline_mode = #tpu.pipeline_mode<synchronous>, transform_indices = @transform_13, window_bounds = array<i64: 9, 1, 256>}, {transform_indices = @transform_14, window_bounds = array<i64: 1, 32, 256>}]} {
    %c0 = arith.constant 0 : index
    %c0_0 = arith.constant 0 : index
    %c0_1 = arith.constant 0 : index
    %0 = vector.load %arg1[%c0, %c0_0, %c0_1] : memref<1x32x256xf32, #tpu.memory_space<vmem>>, vector<1x32x256xf32>
    %1 = vector.shape_cast %0 : vector<1x32x256xf32> to vector<32x256xf32>
    %cst = arith.constant dense<0.000000e+00> : vector<256xf32>
    %2 = vector.multi_reduction <add>, %1, %cst [0] : vector<32x256xf32> to vector<256xf32>
    %3 = vector.shape_cast %2 : vector<256xf32> to vector<1x256xf32>
    %cst_2 = arith.constant 3.200000e+01 : f32
    %4 = vector.broadcast %cst_2 : f32 to vector<1x256xf32>
    %5 = arith.divf %3, %4 : vector<1x256xf32>
    %6 = vector.broadcast %5 : vector<1x256xf32> to vector<32x256xf32>
    %7 = arith.subf %1, %6 : vector<32x256xf32>
    %8 = arith.mulf %7, %7 : vector<32x256xf32>
    %cst_3 = arith.constant dense<0.000000e+00> : vector<256xf32>
    %9 = vector.multi_reduction <add>, %8, %cst_3 [0] : vector<32x256xf32> to vector<256xf32>
    %10 = vector.shape_cast %9 : vector<256xf32> to vector<1x256xf32>
    %cst_4 = arith.constant 3.200000e+01 : f32
    %11 = vector.broadcast %cst_4 : f32 to vector<1x256xf32>
    %12 = arith.divf %10, %11 : vector<1x256xf32>
    %cst_5 = arith.constant 9.99999974E-6 : f32
    %13 = vector.broadcast %cst_5 : f32 to vector<1x256xf32>
    %14 = arith.addf %12, %13 : vector<1x256xf32>
    %15 = math.rsqrt %14 : vector<1x256xf32>
    %16 = vector.broadcast %15 : vector<1x256xf32> to vector<32x256xf32>
    %17 = arith.mulf %7, %16 : vector<32x256xf32>
    %c0_6 = arith.constant 0 : index
    %c0_7 = arith.constant 0 : index
    %18 = vector.load %arg2[%c0_6, %c0_7] : memref<32x1xf32, #tpu.memory_space<vmem>>, vector<32x1xf32>
    %19 = vector.broadcast %18 : vector<32x1xf32> to vector<32x256xf32>
    %20 = arith.mulf %17, %19 : vector<32x256xf32>
    %c0_8 = arith.constant 0 : index
    %c0_9 = arith.constant 0 : index
    %21 = vector.load %arg3[%c0_8, %c0_9] : memref<32x1xf32, #tpu.memory_space<vmem>>, vector<32x1xf32>
    %22 = vector.broadcast %21 : vector<32x1xf32> to vector<32x256xf32>
    %23 = arith.addf %20, %22 : vector<32x256xf32>
    %c0_10 = arith.constant 0 : index
    %c0_11 = arith.constant 0 : index
    %24 = vector.load %arg4[%c0_10, %c0_11] : memref<96x32xf32, #tpu.memory_space<vmem>>, vector<96x32xf32>
    %cst_12 = arith.constant dense<0.000000e+00> : vector<96x256xf32>
    %25 = tpu.matmul %24, %23, %cst_12 {dimension_numbers = #tpu.dot_dimension_numbers<[1], [0], [0], [1], [0, 0, 1, 1], [], []>} : vector<96x32xf32>, vector<32x256xf32>, vector<96x256xf32> -> vector<96x256xf32>
    %c0_13 = arith.constant 0 : index
    %c0_14 = arith.constant 0 : index
    %26 = vector.load %arg5[%c0_13, %c0_14] : memref<96x1xf32, #tpu.memory_space<vmem>>, vector<96x1xf32>
    %27 = vector.broadcast %26 : vector<96x1xf32> to vector<96x256xf32>
    %28 = arith.addf %25, %27 : vector<96x256xf32>
    %29 = vector.extract_strided_slice %28 {offsets = [0, 0], sizes = [32, 256], strides = [1, 1]} : vector<96x256xf32> to vector<32x256xf32>
    %30 = vector.extract_strided_slice %28 {offsets = [32, 0], sizes = [32, 256], strides = [1, 1]} : vector<96x256xf32> to vector<32x256xf32>
    %31 = vector.extract_strided_slice %28 {offsets = [64, 0], sizes = [32, 256], strides = [1, 1]} : vector<96x256xf32> to vector<32x256xf32>
    %cst_15 = arith.constant dense<0.000000e+00> : vector<256xf32>
    %32 = vector.multi_reduction <add>, %29, %cst_15 [0] : vector<32x256xf32> to vector<256xf32>
    %33 = vector.shape_cast %32 : vector<256xf32> to vector<1x256xf32>
    %cst_16 = arith.constant 3.200000e+01 : f32
    %34 = vector.broadcast %cst_16 : f32 to vector<1x256xf32>
    %35 = arith.divf %33, %34 : vector<1x256xf32>
    %36 = vector.broadcast %35 : vector<1x256xf32> to vector<32x256xf32>
    %37 = arith.subf %29, %36 : vector<32x256xf32>
    %cst_17 = arith.constant dense<0.000000e+00> : vector<256xf32>
    %38 = vector.multi_reduction <add>, %30, %cst_17 [0] : vector<32x256xf32> to vector<256xf32>
    %39 = vector.shape_cast %38 : vector<256xf32> to vector<1x256xf32>
    %cst_18 = arith.constant 3.200000e+01 : f32
    %40 = vector.broadcast %cst_18 : f32 to vector<1x256xf32>
    %41 = arith.divf %39, %40 : vector<1x256xf32>
    %42 = vector.broadcast %41 : vector<1x256xf32> to vector<32x256xf32>
    %43 = arith.subf %30, %42 : vector<32x256xf32>
    %44 = arith.mulf %37, %37 : vector<32x256xf32>
    %45 = arith.mulf %43, %43 : vector<32x256xf32>
    %cst_19 = arith.constant dense<0.000000e+00> : vector<256xf32>
    %46 = vector.multi_reduction <add>, %44, %cst_19 [0] : vector<32x256xf32> to vector<256xf32>
    %47 = vector.shape_cast %46 : vector<256xf32> to vector<1x256xf32>
    %cst_20 = arith.constant 1.000000e-07 : f32
    %48 = vector.broadcast %cst_20 : f32 to vector<1x256xf32>
    %49 = arith.addf %47, %48 : vector<1x256xf32>
    %50 = vector.broadcast %49 : vector<1x256xf32> to vector<32x256xf32>
    %51 = arith.divf %44, %50 : vector<32x256xf32>
    %cst_21 = arith.constant dense<0.000000e+00> : vector<256xf32>
    %52 = vector.multi_reduction <add>, %45, %cst_21 [0] : vector<32x256xf32> to vector<256xf32>
    %53 = vector.shape_cast %52 : vector<256xf32> to vector<1x256xf32>
    %cst_22 = arith.constant 1.000000e-07 : f32
    %54 = vector.broadcast %cst_22 : f32 to vector<1x256xf32>
    %55 = arith.addf %53, %54 : vector<1x256xf32>
    %56 = vector.broadcast %55 : vector<1x256xf32> to vector<32x256xf32>
    %57 = arith.divf %45, %56 : vector<32x256xf32>
    %58 = arith.mulf %57, %57 : vector<32x256xf32>
    %cst_23 = arith.constant dense<0.000000e+00> : vector<32xf32>
    %59 = vector.multi_reduction <add>, %58, %cst_23 [1] : vector<32x256xf32> to vector<32xf32>
    %60 = vector.shape_cast %59 : vector<32xf32> to vector<32x1xf32>
    %61 = math.sqrt %60 : vector<32x1xf32>
    %cst_24 = arith.constant 9.99999996E-13 : f32
    %62 = vector.broadcast %cst_24 : f32 to vector<32x1xf32>
    %63 = arith.maximumf %61, %62 : vector<32x1xf32>
    %64 = vector.broadcast %63 : vector<32x1xf32> to vector<32x256xf32>
    %65 = arith.divf %57, %64 : vector<32x256xf32>
    %66 = arith.mulf %51, %51 : vector<32x256xf32>
    %cst_25 = arith.constant dense<0.000000e+00> : vector<256xf32>
    %67 = vector.multi_reduction <add>, %66, %cst_25 [0] : vector<32x256xf32> to vector<256xf32>
    %68 = vector.shape_cast %67 : vector<256xf32> to vector<1x256xf32>
    %69 = math.sqrt %68 : vector<1x256xf32>
    %cst_26 = arith.constant 9.99999996E-13 : f32
    %70 = vector.broadcast %cst_26 : f32 to vector<1x256xf32>
    %71 = arith.maximumf %69, %70 : vector<1x256xf32>
    %72 = vector.broadcast %71 : vector<1x256xf32> to vector<32x256xf32>
    %73 = arith.divf %51, %72 : vector<32x256xf32>
    %cst_27 = arith.constant dense<0.000000e+00> : vector<32x32xf32>
    %74 = tpu.matmul %65, %31, %cst_27 {dimension_numbers = #tpu.dot_dimension_numbers<[1], [1], [0], [0], [0, 0, 1, 0], [], []>} : vector<32x256xf32>, vector<32x256xf32>, vector<32x32xf32> -> vector<32x32xf32>
    %cst_28 = arith.constant 6.250000e-02 : f32
    %75 = vector.broadcast %cst_28 : f32 to vector<32x32xf32>
    %76 = arith.mulf %74, %75 : vector<32x32xf32>
    %77 = tpu.transpose %76, [1, 0] : vector<32x32xf32> -> vector<32x32xf32>
    %cst_29 = arith.constant dense<0.000000e+00> : vector<32x256xf32>
    %78 = tpu.matmul %77, %73, %cst_29 {dimension_numbers = #tpu.dot_dimension_numbers<[1], [0], [0], [1], [0, 0, 1, 1], [], []>} : vector<32x32xf32>, vector<32x256xf32>, vector<32x256xf32> -> vector<32x256xf32>
    %79 = arith.addf %31, %78 : vector<32x256xf32>
    %c0_30 = arith.constant 0 : index
    %c0_31 = arith.constant 0 : index
    %80 = vector.load %arg6[%c0_30, %c0_31] : memref<32x32xf32, #tpu.memory_space<vmem>>, vector<32x32xf32>
    %cst_32 = arith.constant dense<0.000000e+00> : vector<32x256xf32>
    %81 = tpu.matmul %80, %79, %cst_32 {dimension_numbers = #tpu.dot_dimension_numbers<[1], [0], [0], [1], [0, 0, 1, 1], [], []>} : vector<32x32xf32>, vector<32x256xf32>, vector<32x256xf32> -> vector<32x256xf32>
    %c0_33 = arith.constant 0 : index
    %c0_34 = arith.constant 0 : index
    %82 = vector.load %arg7[%c0_33, %c0_34] : memref<32x1xf32, #tpu.memory_space<vmem>>, vector<32x1xf32>
    %83 = vector.broadcast %82 : vector<32x1xf32> to vector<32x256xf32>
    %84 = arith.addf %81, %83 : vector<32x256xf32>
    %85 = tpu.concatenate %84, %1 in 0 : vector<32x256xf32>, vector<32x256xf32> -> vector<64x256xf32>
    %c0_35 = arith.constant 0 : index
    %c0_36 = arith.constant 0 : index
    %86 = vector.load %arg8[%c0_35, %c0_36] : memref<64x64xf32, #tpu.memory_space<vmem>>, vector<64x64xf32>
    %cst_37 = arith.constant dense<0.000000e+00> : vector<64x256xf32>
    %87 = tpu.matmul %86, %85, %cst_37 {dimension_numbers = #tpu.dot_dimension_numbers<[1], [0], [0], [1], [0, 0, 1, 1], [], []>} : vector<64x64xf32>, vector<64x256xf32>, vector<64x256xf32> -> vector<64x256xf32>
    %c0_38 = arith.constant 0 : index
    %c0_39 = arith.constant 0 : index
    %88 = vector.load %arg9[%c0_38, %c0_39] : memref<64x1xf32, #tpu.memory_space<vmem>>, vector<64x1xf32>
    %89 = vector.broadcast %88 : vector<64x1xf32> to vector<64x256xf32>
    %90 = arith.addf %87, %89 : vector<64x256xf32>
    %cst_40 = arith.constant 2.000000e-01 : f32
    %91 = vector.broadcast %cst_40 : f32 to vector<64x256xf32>
    %92 = arith.mulf %91, %90 : vector<64x256xf32>
    %93 = arith.maximumf %90, %92 : vector<64x256xf32>
    %c17_i32 = arith.constant 17 : i32
    %94 = tpu.dynamic_rotate %93 by %c17_i32 dim 1 : vector<64x256xf32>, i32 -> vector<64x256xf32>
    %c0_41 = arith.constant 0 : index
    %c0_42 = arith.constant 0 : index
    %c0_43 = arith.constant 0 : index
    %95 = vector.load %arg14[%c0_41, %c0_42, %c0_43] : memref<9x1x256xf32, #tpu.memory_space<vmem>>, vector<1x1x256xf32>
    %96 = vector.shape_cast %95 : vector<1x1x256xf32> to vector<1x256xf32>
    %97 = vector.broadcast %96 : vector<1x256xf32> to vector<64x256xf32>
    %98 = arith.mulf %94, %97 : vector<64x256xf32>
    %c16_i32 = arith.constant 16 : i32
    %99 = tpu.dynamic_rotate %93 by %c16_i32 dim 1 : vector<64x256xf32>, i32 -> vector<64x256xf32>
    %c1 = arith.constant 1 : index
    %c0_44 = arith.constant 0 : index
    %c0_45 = arith.constant 0 : index
    %100 = vector.load %arg14[%c1, %c0_44, %c0_45] : memref<9x1x256xf32, #tpu.memory_space<vmem>>, vector<1x1x256xf32>
    %101 = vector.shape_cast %100 : vector<1x1x256xf32> to vector<1x256xf32>
    %102 = vector.broadcast %101 : vector<1x256xf32> to vector<64x256xf32>
    %103 = arith.mulf %99, %102 : vector<64x256xf32>
    %c15_i32 = arith.constant 15 : i32
    %104 = tpu.dynamic_rotate %93 by %c15_i32 dim 1 : vector<64x256xf32>, i32 -> vector<64x256xf32>
    %c2 = arith.constant 2 : index
    %c0_46 = arith.constant 0 : index
    %c0_47 = arith.constant 0 : index
    %105 = vector.load %arg14[%c2, %c0_46, %c0_47] : memref<9x1x256xf32, #tpu.memory_space<vmem>>, vector<1x1x256xf32>
    %106 = vector.shape_cast %105 : vector<1x1x256xf32> to vector<1x256xf32>
    %107 = vector.broadcast %106 : vector<1x256xf32> to vector<64x256xf32>
    %108 = arith.mulf %104, %107 : vector<64x256xf32>
    %c1_i32 = arith.constant 1 : i32
    %109 = tpu.dynamic_rotate %93 by %c1_i32 dim 1 : vector<64x256xf32>, i32 -> vector<64x256xf32>
    %c3 = arith.constant 3 : index
    %c0_48 = arith.constant 0 : index
    %c0_49 = arith.constant 0 : index
    %110 = vector.load %arg14[%c3, %c0_48, %c0_49] : memref<9x1x256xf32, #tpu.memory_space<vmem>>, vector<1x1x256xf32>
    %111 = vector.shape_cast %110 : vector<1x1x256xf32> to vector<1x256xf32>
    %112 = vector.broadcast %111 : vector<1x256xf32> to vector<64x256xf32>
    %113 = arith.mulf %109, %112 : vector<64x256xf32>
    %c4 = arith.constant 4 : index
    %c0_50 = arith.constant 0 : index
    %c0_51 = arith.constant 0 : index
    %114 = vector.load %arg14[%c4, %c0_50, %c0_51] : memref<9x1x256xf32, #tpu.memory_space<vmem>>, vector<1x1x256xf32>
    %115 = vector.shape_cast %114 : vector<1x1x256xf32> to vector<1x256xf32>
    %116 = vector.broadcast %115 : vector<1x256xf32> to vector<64x256xf32>
    %117 = arith.mulf %93, %116 : vector<64x256xf32>
    %c255_i32 = arith.constant 255 : i32
    %118 = tpu.dynamic_rotate %93 by %c255_i32 dim 1 : vector<64x256xf32>, i32 -> vector<64x256xf32>
    %c5 = arith.constant 5 : index
    %c0_52 = arith.constant 0 : index
    %c0_53 = arith.constant 0 : index
    %119 = vector.load %arg14[%c5, %c0_52, %c0_53] : memref<9x1x256xf32, #tpu.memory_space<vmem>>, vector<1x1x256xf32>
    %120 = vector.shape_cast %119 : vector<1x1x256xf32> to vector<1x256xf32>
    %121 = vector.broadcast %120 : vector<1x256xf32> to vector<64x256xf32>
    %122 = arith.mulf %118, %121 : vector<64x256xf32>
    %c241_i32 = arith.constant 241 : i32
    %123 = tpu.dynamic_rotate %93 by %c241_i32 dim 1 : vector<64x256xf32>, i32 -> vector<64x256xf32>
    %c6 = arith.constant 6 : index
    %c0_54 = arith.constant 0 : index
    %c0_55 = arith.constant 0 : index
    %124 = vector.load %arg14[%c6, %c0_54, %c0_55] : memref<9x1x256xf32, #tpu.memory_space<vmem>>, vector<1x1x256xf32>
    %125 = vector.shape_cast %124 : vector<1x1x256xf32> to vector<1x256xf32>
    %126 = vector.broadcast %125 : vector<1x256xf32> to vector<64x256xf32>
    %127 = arith.mulf %123, %126 : vector<64x256xf32>
    %c240_i32 = arith.constant 240 : i32
    %128 = tpu.dynamic_rotate %93 by %c240_i32 dim 1 : vector<64x256xf32>, i32 -> vector<64x256xf32>
    %c7 = arith.constant 7 : index
    %c0_56 = arith.constant 0 : index
    %c0_57 = arith.constant 0 : index
    %129 = vector.load %arg14[%c7, %c0_56, %c0_57] : memref<9x1x256xf32, #tpu.memory_space<vmem>>, vector<1x1x256xf32>
    %130 = vector.shape_cast %129 : vector<1x1x256xf32> to vector<1x256xf32>
    %131 = vector.broadcast %130 : vector<1x256xf32> to vector<64x256xf32>
    %132 = arith.mulf %128, %131 : vector<64x256xf32>
    %c239_i32 = arith.constant 239 : i32
    %133 = tpu.dynamic_rotate %93 by %c239_i32 dim 1 : vector<64x256xf32>, i32 -> vector<64x256xf32>
    %c8 = arith.constant 8 : index
    %c0_58 = arith.constant 0 : index
    %c0_59 = arith.constant 0 : index
    %134 = vector.load %arg14[%c8, %c0_58, %c0_59] : memref<9x1x256xf32, #tpu.memory_space<vmem>>, vector<1x1x256xf32>
    %135 = vector.shape_cast %134 : vector<1x1x256xf32> to vector<1x256xf32>
    %136 = vector.broadcast %135 : vector<1x256xf32> to vector<64x256xf32>
    %137 = arith.mulf %133, %136 : vector<64x256xf32>
    %138 = tpu.concatenate %98, %103, %108, %113, %117, %122, %127, %132, %137 in 0 : vector<64x256xf32>, vector<64x256xf32>, vector<64x256xf32>, vector<64x256xf32>, vector<64x256xf32>, vector<64x256xf32>, vector<64x256xf32>, vector<64x256xf32>, vector<64x256xf32> -> vector<576x256xf32>
    %c0_60 = arith.constant 0 : index
    %c0_61 = arith.constant 0 : index
    %139 = vector.load %arg10[%c0_60, %c0_61] : memref<64x576xf32, #tpu.memory_space<vmem>>, vector<64x576xf32>
    %cst_62 = arith.constant dense<0.000000e+00> : vector<64x256xf32>
    %140 = tpu.matmul %139, %138, %cst_62 {dimension_numbers = #tpu.dot_dimension_numbers<[1], [0], [0], [1], [0, 0, 1, 1], [], []>} : vector<64x576xf32>, vector<576x256xf32>, vector<64x256xf32> -> vector<64x256xf32>
    %c0_63 = arith.constant 0 : index
    %c0_64 = arith.constant 0 : index
    %141 = vector.load %arg11[%c0_63, %c0_64] : memref<64x1xf32, #tpu.memory_space<vmem>>, vector<64x1xf32>
    %142 = vector.broadcast %141 : vector<64x1xf32> to vector<64x256xf32>
    %143 = arith.addf %140, %142 : vector<64x256xf32>
    %cst_65 = arith.constant 2.000000e-01 : f32
    %144 = vector.broadcast %cst_65 : f32 to vector<64x256xf32>
    %145 = arith.mulf %144, %143 : vector<64x256xf32>
    %146 = arith.maximumf %143, %145 : vector<64x256xf32>
    %c0_66 = arith.constant 0 : index
    %c0_67 = arith.constant 0 : index
    %147 = vector.load %arg12[%c0_66, %c0_67] : memref<32x64xf32, #tpu.memory_space<vmem>>, vector<32x64xf32>
    %cst_68 = arith.constant dense<0.000000e+00> : vector<32x256xf32>
    %148 = tpu.matmul %147, %146, %cst_68 {dimension_numbers = #tpu.dot_dimension_numbers<[1], [0], [0], [1], [0, 0, 1, 1], [], []>} : vector<32x64xf32>, vector<64x256xf32>, vector<32x256xf32> -> vector<32x256xf32>
    %c0_69 = arith.constant 0 : index
    %c0_70 = arith.constant 0 : index
    %149 = vector.load %arg13[%c0_69, %c0_70] : memref<32x1xf32, #tpu.memory_space<vmem>>, vector<32x1xf32>
    %150 = vector.broadcast %149 : vector<32x1xf32> to vector<32x256xf32>
    %151 = arith.addf %148, %150 : vector<32x256xf32>
    %152 = arith.addf %151, %1 : vector<32x256xf32>
    %c0_71 = arith.constant 0 : index
    %c0_72 = arith.constant 0 : index
    %c0_73 = arith.constant 0 : index
    %153 = vector.load %arg15[%c0_71, %c0_72, %c0_73] : memref<1x32x256xf32, #tpu.memory_space<vmem>>, vector<1x32x256xf32>
    %154 = vector.shape_cast %153 : vector<1x32x256xf32> to vector<32x256xf32>
    %155 = vector.shape_cast %152 : vector<32x256xf32> to vector<1x32x256xf32>
    tpu.vector_store %arg15[%c0_71, %c0_72, %c0_73], %155 {strides = array<i32>} : memref<1x32x256xf32, #tpu.memory_space<vmem>>, vector<1x32x256xf32>,
    return
  }
  func.func @transform_0(%arg0: i32) -> (i32, i32, i32) {
    %c0_i32 = arith.constant 0 : i32
    %c0_i32_0 = arith.constant 0 : i32
    %c0_i32_1 = arith.constant 0 : i32
    return %arg0, %c0_i32, %c0_i32_0 : i32, i32, i32
  }
  func.func @transform_1(%arg0: i32) -> (i32, i32) {
    %c0_i32 = arith.constant 0 : i32
    %c0_i32_0 = arith.constant 0 : i32
    %c0_i32_1 = arith.constant 0 : i32
    return %c0_i32, %c0_i32_0 : i32, i32
  }
  func.func @transform_2(%arg0: i32) -> (i32, i32) {
    %c0_i32 = arith.constant 0 : i32
    %c0_i32_0 = arith.constant 0 : i32
    %c0_i32_1 = arith.constant 0 : i32
    return %c0_i32, %c0_i32_0 : i32, i32
  }
  func.func @transform_3(%arg0: i32) -> (i32, i32) {
    %c0_i32 = arith.constant 0 : i32
    %c0_i32_0 = arith.constant 0 : i32
    %c0_i32_1 = arith.constant 0 : i32
    return %c0_i32, %c0_i32_0 : i32, i32
  }
  func.func @transform_4(%arg0: i32) -> (i32, i32) {
    %c0_i32 = arith.constant 0 : i32
    %c0_i32_0 = arith.constant 0 : i32
    %c0_i32_1 = arith.constant 0 : i32
    return %c0_i32, %c0_i32_0 : i32, i32
  }
  func.func @transform_5(%arg0: i32) -> (i32, i32) {
    %c0_i32 = arith.constant 0 : i32
    %c0_i32_0 = arith.constant 0 : i32
    %c0_i32_1 = arith.constant 0 : i32
    return %c0_i32, %c0_i32_0 : i32, i32
  }
  func.func @transform_6(%arg0: i32) -> (i32, i32) {
    %c0_i32 = arith.constant 0 : i32
    %c0_i32_0 = arith.constant 0 : i32
    %c0_i32_1 = arith.constant 0 : i32
    return %c0_i32, %c0_i32_0 : i32, i32
  }
  func.func @transform_7(%arg0: i32) -> (i32, i32) {
    %c0_i32 = arith.constant 0 : i32
    %c0_i32_0 = arith.constant 0 : i32
    %c0_i32_1 = arith.constant 0 : i32
    return %c0_i32, %c0_i32_0 : i32, i32
  }
  func.func @transform_8(%arg0: i32) -> (i32, i32) {
    %c0_i32 = arith.constant 0 : i32
    %c0_i32_0 = arith.constant 0 : i32
    %c0_i32_1 = arith.constant 0 : i32
    return %c0_i32, %c0_i32_0 : i32, i32
  }
  func.func @transform_9(%arg0: i32) -> (i32, i32) {
    %c0_i32 = arith.constant 0 : i32
    %c0_i32_0 = arith.constant 0 : i32
    %c0_i32_1 = arith.constant 0 : i32
    return %c0_i32, %c0_i32_0 : i32, i32
  }
  func.func @transform_10(%arg0: i32) -> (i32, i32) {
    %c0_i32 = arith.constant 0 : i32
    %c0_i32_0 = arith.constant 0 : i32
    %c0_i32_1 = arith.constant 0 : i32
    return %c0_i32, %c0_i32_0 : i32, i32
  }
  func.func @transform_11(%arg0: i32) -> (i32, i32) {
    %c0_i32 = arith.constant 0 : i32
    %c0_i32_0 = arith.constant 0 : i32
    %c0_i32_1 = arith.constant 0 : i32
    return %c0_i32, %c0_i32_0 : i32, i32
  }
  func.func @transform_12(%arg0: i32) -> (i32, i32) {
    %c0_i32 = arith.constant 0 : i32
    %c0_i32_0 = arith.constant 0 : i32
    %c0_i32_1 = arith.constant 0 : i32
    return %c0_i32, %c0_i32_0 : i32, i32
  }
  func.func @transform_13(%arg0: i32) -> (i32, i32, i32) {
    %c0_i32 = arith.constant 0 : i32
    %c0_i32_0 = arith.constant 0 : i32
    %c0_i32_1 = arith.constant 0 : i32
    %c0_i32_2 = arith.constant 0 : i32
    return %c0_i32, %c0_i32_0, %c0_i32_1 : i32, i32, i32
  }
  func.func @transform_14(%arg0: i32) -> (i32, i32, i32) {
    %c0_i32 = arith.constant 0 : i32
    %c0_i32_0 = arith.constant 0 : i32
    %c0_i32_1 = arith.constant 0 : i32
    return %arg0, %c0_i32, %c0_i32_0 : i32, i32, i32
  }
}

</mosaic_0001>

<bundles_post_ra>
// kernel: tpu_custom_call.1
= control target key start
LH: loop header
LB: loop body
LE: loop exit
PB: predicated region body
PF: predicated region fallthrough
CT: control target
= control target key end

     0   :  { %s5546_s0 = inlined_call_operand.vmem [shape: f32[2,32,256], index: 0, kind: input, shape index: {}]   ;;  %s5547_s1 = inlined_call_operand.vmem [shape: f32[32,1], index: 1, kind: input, shape index: {}]   ;;  %s5548_s2 = inlined_call_operand.vmem [shape: f32[32,1], index: 2, kind: input, shape index: {}]   ;;  %s5549_s3 = inlined_call_operand.vmem [shape: f32[96,32], index: 3, kind: input, shape index: {}]   ;;  %s5550_s4 = inlined_call_operand.vmem [shape: f32[96,1], index: 4, kind: input, shape index: {}]   ;;  %s5551_s5 = inlined_call_operand.vmem [shape: f32[32,32], index: 5, kind: input, shape index: {}]   ;;  %s5552_s6 = inlined_call_operand.vmem [shape: f32[32,1], index: 6, kind: input, shape index: {}]   ;;  %s5553_s7 = inlined_call_operand.hbm [shape: f32[64,64], index: 7, kind: input, shape index: {}]   ;;  %s5554_s8 = inlined_call_operand.vmem [shape: f32[64,1], index: 8, kind: input, shape index: {}]   ;;  %s5555_s9 = inlined_call_operand.vmem [shape: f32[64,576], index: 9, kind: input, shape index: {}]   ;;  %s5556_s10 = inlined_call_operand.vmem [shape: f32[64,1], index: 10, kind: input, shape index: {}]   ;;  %s5557_s11 = inlined_call_operand.hbm [shape: f32[32,64], index: 11, kind: input, shape index: {}]   ;;  %s5558_s12 = inlined_call_operand.vmem [shape: f32[32,1], index: 12, kind: input, shape index: {}]   ;;  %s5559_s13 = inlined_call_operand.vmem [shape: f32[9,1,256], index: 13, kind: input, shape index: {}]   ;;  %s5560_s14 = inlined_call_operand.hbm [shape: f32[2,32,256], index: 14, kind: output, shape index: {}]  }
   0x1   :  { %5616 = sst [smem:[#allocation70_spill]] %s5553_s7 }
   0x2   :  { %19 = vsyncpa [#allocation3], 0 }
   0x3   :  { %20 = vsyncpa [#allocation6], 0 }
   0x4   :  { %21 = vsyncpa [#allocation4], 0 }
   0x5   :  { %23 = vsyncpa [#allocation4 + $0x1], 0  ;;  %s3506_s29 = smov 0   ;;  %s3508_s30 = smov 0  }
   0x6   :  { %s3510_s15 = smov 0   ;;  %s3512_s16 = smov 0  }
   0x7 LB: > { %5617 = sst [smem:[#allocation11_spill]] %s3409_s15  ;;  %s3527_s17 = sadd.s32 4294967295, %s3413_s16   ;;  %s3413_s16 = sphi %s3512_s16, %s5754_s16   ;;  %s3409_s15 = sphi %s3510_s15, %s5756_s15   ;;  %s3405_s30 = sphi %s3508_s30, %s5758_s30   ;;  %s3401_s29 = sphi %s3506_s29, %s5757_s29  }
   0x8   : > { %s3108_s18 = sadd.s32 4294967294, %s3413_s16   ;;  %s3531_s19 = sadd.s32 1, %s3413_s16  }
   0x9   : > { %5618 = sst [smem:[#allocation12_spill]] %s3531_s19  ;;  %s335_s20 = sadd.s32 1, %s3409_s15 }
   0xa   : > { %s332_s21 = ssub.s32 %s3413_s16, %s3531_s19  ;;  %p345_p0 = scmp.ne.s32.totalorder %s3409_s15, %s3405_s30 }
   0xb   : > { %p333_p1 = scmp.eq.s32.totalorder %s332_s21, 0  ;;  %p346_p2 = scmp.eq.s32.totalorder %s3527_s17, 1 }
   0xc   : > { %p351_p3 = scmp.ne.s32.totalorder %s3405_s30, %s3401_s29  ;;  %p352_p4 = scmp.eq.s32.totalorder %s3108_s18, 1 }
   0xd   : > { %s3542_s22 = scalar_select %p333_p1, %s3409_s15, %s335_s20  }
   0xe   : > { %p3544_p5 = por %p346_p2, %p345_p0  ;;  %p3548_p6 = por %p352_p4, %p351_p3 }
   0xf   : > { %5619 = sst [smem:[#allocation13_spill]] %s3542_s22  ;;  %p3109_p7 = scmp.ge.s32.totalorder %s3413_s16, 1 }
  0x10   : > { %s5621_s24 = scalar_select %p3548_p6, 1, 0 }
  0x11   : > { %p359_p8 = scmp.lt.s32.totalorder %s3413_s16, 3  ;;  %p5564_p9 = scmp.eq.s32.totalorder %s3527_s17, 0 }
  0x12   : > { %5622 = sst [smem:[#allocation14_spill]] %s5621_s24  ;;  %s3415_s26 = smov [#allocation2]  }
  0x13   : > { %p3555_p10 = pnand %p3109_p7, %p359_p8  ;;  %s389_s27 = sshll.u32 %s3415_s26, 4  ;;  %s390_s27 = int_to_ptr.vmem [resolvable:$true] %s389_s27 }
  0x14   : > { %s3416_s18 = smov [#allocation5]   ;;  %s3304_s21 = scalar_lea.vmem %s390_s27, 1024 }
  0x15   : > { %p3184_p11 = pneg %p3555_p10  ;;  %s411_s20 = sshll.u32 %s3416_s18, 4  ;;  %s412_s20 = int_to_ptr.vmem [resolvable:$true] %s411_s20 }
  0x16   : > { %p3305_p0 = scmp.ne.s32.totalorder %s390_s27, %s3304_s21  ;;  %p3312_p3 = scmp.lt.s32.totalorder %s390_s27, %s390_s27 }
  0x17   : > { %p3563_p12 = pnand %p5564_p9, %p3184_p11  ;;  %p3313_p4 = scmp.lt.s32.totalorder %s3304_s21, %s3304_s21 }
  0x19   : > { %p3295_p13 = pneg %p3563_p12  ;;  %p3314_p7 = por %p3313_p4, %p3312_p3 }
  0x1b   : > { %p3307_p1 = pnand %p3305_p0, %p3295_p13 }
  0x1d   : > { %p3308_p2 = pneg %p3307_p1 }
  0x1f   : > { %p3315_p8 = pnand %p3314_p7, %p3308_p2 }
  0x21   : > { %3318 = shalt.err (!%p3315_p8)
}
  0x22   : > { %s3417_s26 = smov 128   ;;  %s3418_s22 = smov 8  }
  0x23   : > { %s5625_s7 = sld [smem:[#allocation70_spill]]  ;;  %s3330_s19 = scalar_lea.vmem %s412_s20, 512 }
  0x24   : > { %p3331_p11 = scmp.ne.s32.totalorder %s412_s20, %s3330_s19  ;;  %p3338_p9 = scmp.lt.s32.totalorder %s412_s20, %s412_s20 }
  0x25   : > { %p3339_p6 = scmp.lt.s32.totalorder %s3330_s19, %s3330_s19 }
  0x26   : > { %p3333_p0 = pnand %p3331_p11, %p3295_p13 }
  0x27   : > { %p3340_p3 = por %p3339_p6, %p3338_p9 }
  0x28   : > { %p3334_p1 = pneg %p3333_p0 }
  0x29   : > { %3187 = dma.hbm_to_vmem [thread:$0]  (!%p3563_p12), %s5625_s7, 1024, %s390_s27, [#allocation3], %s3417_s26, %s3417_s26, %s3418_s22  }
  0x2a   : > { %p3341_p2 = pnand %p3340_p3, %p3334_p1 }
  0x2c   : > { %3344 = shalt.err (!%p3341_p2)
}
  0x2d   : > { %3190 = dma.hbm_to_vmem [thread:$0]  (!%p3563_p12), %s5557_s11, 512, %s412_s20, [#allocation6], %s3417_s26, %s3417_s26, %s3418_s22  }
  0x2e   : > { %441 = sbr.rel (%p3555_p10) target bundleno = 2482 (0x9b2), region = 76 }
  0x33   : > { %p5626_p4 = scmp.eq.s32.totalorder %s3527_s17, 0 }
  0x35   : > { %3388 = dma.done.wait (%p5626_p4), [#allocation3], 1024   ;;  %p5627_p13 = pmov %p5626_p4 }
  0x36   : > { %p5628_p7 = pmov %p5626_p4 }
  0x37   : > { %3390 = vsyncadd (%p5627_p13), [#allocation3], 4294966272 }
  0x38   : > { %3392 = dma.done.wait (%p5628_p7), [#allocation6], 512   ;;  %p5629_p6 = pmov %p5626_p4 }
  0x39   : > { %v3419_v0 = vmov 0   ;;  %p491_p9 = scmp.lt.s32.totalorder %s3527_s17, 1  ;;  %v608_v1 = vld [vmem:[%s5548_s2 + $0x18] sm:$0xff]  ;;  %v575_v3 = vld [vmem:[%s5547_s1 + $0x10] sm:$0xff]  ;;  %v574_v4 = vld [vmem:[%s5547_s1 + $0x8] sm:$0xff]  ;;  %v5566_v19 = vmov 0.0  }
  0x3a   : > { %3394 = vsyncadd (%p5629_p6), [#allocation6], 4294966784  ;;  %3248 = vset.pattern.permute.xlu1 %v3419_v0  ;;  %3247 = vset.pattern.permute.xlu0 %v3419_v0  ;;  %v576_v2 = vld [vmem:[%s5547_s1 + $0x18] sm:$0xff]  ;;  %v607_v5 = vld [vmem:[%s5548_s2 + $0x10] sm:$0xff]  ;;  %vm721_vm0 = vcmask 261120   ;;  %vm1558_vm13 = vcmask 523264  }
  0x3b   : > { %s492_s15 = scalar_select %p491_p9, %s3527_s17, 1  ;;  %626 = vperm.xlu1 %3248, %v608_v1   ;;  %594 = vperm.xlu0 %3247, %v576_v2   ;;  %v573_v6 = vld [vmem:[%s5547_s1] sm:$0xff]  ;;  %v606_v7 = vld [vmem:[%s5548_s2 + $0x8] sm:$0xff]  ;;  %v655_v23 = vld [vmem:[%s5550_s4 + $0x30] sm:$0xff] }
  0x3c   : > { %v605_v10 = vld [vmem:[%s5548_s2] sm:$0xff]  ;;  %v654_v17 = vld [vmem:[%s5550_s4 + $0x28] sm:$0xff]  ;;  %822 = vmatprep.mubr.f32.mxu0 %v5566_v19  ;;  %v656_v24 = vld [vmem:[%s5550_s4 + $0x38] sm:$0xff]  ;;  %s5615_s19 = smov 16   ;;  %s3422_s22 = smov 17  }
  0x3d   : > { %s3172_s18 = sshll.u32 %s492_s15, 6  ;;  %v653_v16 = vld [vmem:[%s5550_s4 + $0x20] sm:$0xff]  ;;  %v660_v28 = vld [vmem:[%s5550_s4 + $0x58] sm:$0xff]  ;;  %s3423_s24 = smov 127  }
  0x3e   : > { %s3618_s27 = scalar_lea.vmem %s5546_s0, %s3172_s18  ;;  %s3424_s25 = smov 1  }
  0x3f   : > { %589 = vperm.xlu0 %3247, %v575_v3   ;;  %584 = vperm.xlu1 %3248, %v574_v4   ;;  %v3624_v8 = vld [vmem:[%s3618_s27] sm:$0xff]  ;;  %v3627_v9 = vld [vmem:[%s3618_s27 + $0x10] sm:$0xff]  ;;  %v3633_v11 = vld [vmem:[%s3618_s27 + $0x8] sm:$0xff]  ;;  %s3425_s15 = smov 15   ;;  %s3426_s28 = smov 112  }
  0x40   : > { %v3636_v12 = vld [vmem:[%s3618_s27 + $0x18] sm:$0xff]  ;;  %v504_v13 = vadd.f32 %v3627_v9, %v3624_v8  ;;  %v3641_v14 = vld [vmem:[%s3618_s27 + $0x20] sm:$0xff]  ;;  %v3652_v18 = vld [vmem:[%s3618_s27 + $0x28] sm:$0xff]  ;;  %s3427_s20 = smov 113   ;;  %s3428_s7 = smov 111  }
  0x41   : > { %v513_v15 = vadd.f32 %v3636_v12, %v3633_v11  ;;  %v3657_v21 = vld [vmem:[%s3618_s27 + $0x30] sm:$0xff]  ;;  %v3667_v25 = vld [vmem:[%s3618_s27 + $0x38] sm:$0xff] }
  0x42   : > { %v505_v20 = vadd.f32 %v504_v13, %v3641_v14 }
  0x43   : > { %621 = vperm.xlu0 %3247, %v607_v5   ;;  %579 = vperm.xlu1 %3248, %v573_v6   ;;  %v514_v22 = vadd.f32 %v513_v15, %v3652_v18 }
  0x44   : > { %v506_v26 = vadd.f32 %v505_v20, %v3657_v21 }
  0x45   : > { %v515_v27 = vadd.f32 %v514_v22, %v3667_v25 }
  0x46   : > { %v507_v29 = vrot.slane %v506_v26, 4 }
  0x47   : > { %616 = vperm.xlu0 %3247, %v606_v7   ;;  %611 = vperm.xlu1 %3248, %v605_v10   ;;  %v516_v30 = vrot.slane %v515_v27, 4 }
  0x48   : > { %v508_v31 = vadd.f32 %v507_v29, %v506_v26 }
  0x49   : > { %v517_v32 = vadd.f32 %v516_v30, %v515_v27 }
  0x4a   : > { %v509_v33 = vrot.slane %v508_v31, 2 }
  0x4b   : > { %683 = vperm.xlu0 %3247, %v653_v16   ;;  %688 = vperm.xlu1 %3248, %v654_v17   ;;  %v518_v34 = vrot.slane %v517_v32, 2 }
  0x4c   : > { %v510_v35 = vadd.f32 %v509_v33, %v508_v31 }
  0x4d   : > { %v519_v36 = vadd.f32 %v518_v34, %v517_v32 }
  0x4e   : > { %v511_v37 = vrot.slane %v510_v35, 1 }
  0x4f   : > { %693 = vperm.xlu0 %3247, %v655_v23   ;;  %698 = vperm.xlu1 %3248, %v656_v24   ;;  %v520_v38 = vrot.slane %v519_v36, 1 }
  0x50   : > { %v512_v39 = vadd.f32 %v511_v37, %v510_v35 }
  0x51   : > { %v521_v40 = vadd.f32 %v520_v38, %v519_v36 }
  0x52   : > { %v523_v41 = vmul.f32 0.03125, %v512_v39 }
  0x53   : > { %718 = vperm.xlu1 %3248, %v660_v28   ;;  %v524_v42 = vmul.f32 0.03125, %v521_v40 }
  0x54   : > { %v3675_v43 = vsub.f32 %v3624_v8, %v523_v41  ;;  %v527_v44 = vsub.f32 %v3627_v9, %v523_v41  ;;  %v529_v47 = vsub.f32 %v3641_v14, %v523_v41  ;;  %v531_v53 = vsub.f32 %v3657_v21, %v523_v41 }
  0x55   : > { %v526_v45 = vsub.f32 %v3633_v11, %v524_v42  ;;  %v528_v46 = vsub.f32 %v3636_v12, %v524_v42  ;;  %v530_v50 = vsub.f32 %v3652_v18, %v524_v42  ;;  %v532_v56 = vsub.f32 %v3667_v25, %v524_v42 }
  0x56   : > { %v533_v48 = vmul.f32 %v3675_v43, %v3675_v43  ;;  %v535_v49 = vmul.f32 %v527_v44, %v527_v44  ;;  %v537_v54 = vmul.f32 %v529_v47, %v529_v47  ;;  %v539_v59 = vmul.f32 %v531_v53, %v531_v53 }
  0x57   : > { %v534_v51 = vmul.f32 %v526_v45, %v526_v45  ;;  %v536_v52 = vmul.f32 %v528_v46, %v528_v46  ;;  %v538_v57 = vmul.f32 %v530_v50, %v530_v50  ;;  %v540_v61 = vmul.f32 %v532_v56, %v532_v56 }
  0x58   : > { %v541_v55 = vadd.f32 %v535_v49, %v533_v48 }
  0x59   : > { %v550_v58 = vadd.f32 %v536_v52, %v534_v51 }
  0x5a   : > { %v542_v60 = vadd.f32 %v541_v55, %v537_v54 }
  0x5b   : > { %v551_v62 = vadd.f32 %v550_v58, %v538_v57 }
  0x5c   : > { %v543_v63 = vadd.f32 %v542_v60, %v539_v59 }
  0x5d   : > { %v552_v0 = vadd.f32 %v551_v62, %v540_v61 }
  0x5e   : > { %v544_v1 = vrot.slane %v543_v63, 4 }
  0x5f   : > { %v553_v2 = vrot.slane %v552_v0, 4 }
  0x60   : > { %v545_v3 = vadd.f32 %v544_v1, %v543_v63  ;;  %v648_v63 = vld [vmem:[%s5549_s3 + $0x58] sm:$0xff] }
  0x61   : > { %v554_v4 = vadd.f32 %v553_v2, %v552_v0 }
  0x62   : > { %v546_v5 = vrot.slane %v545_v3, 2 }
  0x63   : > { %v555_v6 = vrot.slane %v554_v4, 2 }
  0x64   : > { %v547_v7 = vadd.f32 %v546_v5, %v545_v3 }
  0x65   : > { %v556_v10 = vadd.f32 %v555_v6, %v554_v4 }
  0x66   : > { %v548_v13 = vrot.slane %v547_v7, 1 }
  0x67   : > { %v557_v15 = vrot.slane %v556_v10, 1 }
  0x68   : > { %v549_v16 = vadd.f32 %v548_v13, %v547_v7 }
  0x69   : > { %v558_v17 = vadd.f32 %v557_v15, %v556_v10 }
  0x6a   : > { %v559_v20 = vmul.f32 0.03125, %v549_v16 }
  0x6b   : > { %v560_v22 = vmul.f32 0.03125, %v558_v17 }
  0x6c   : > { %v561_v23 = vadd.f32 1e-05, %v559_v20 }
  0x6d   : > { %v562_v24 = vadd.f32 1e-05, %v560_v22 }
  0x6e   : > { %3249 = vrsqrt.f32 %v561_v23 }
  0x6f   : > { %3251 = vrsqrt.f32 %v562_v24 }
  0x7b   : > { %v3250_v26 = vpop.eup %3249 }
  0x7c   : > { %v3252_v27 = vpop.eup %3251  ;;  %v571_v29 = vmul.f32 %v3250_v26, %v531_v53  ;;  %v569_v34 = vmul.f32 %v3250_v26, %v529_v47  ;;  %v567_v42 = vmul.f32 %v3250_v26, %v527_v44  ;;  %v565_v55 = vmul.f32 %v3250_v26, %v3675_v43  ;;  %v638_v43 = vld [vmem:[%s5549_s3 + $0x8] sm:$0xff] }
  0x7d   : > { %v572_v28 = vmul.f32 %v3252_v27, %v532_v56  ;;  %v570_v35 = vmul.f32 %v3252_v27, %v530_v50  ;;  %v568_v48 = vmul.f32 %v3252_v27, %v528_v46  ;;  %v566_v54 = vmul.f32 %v3252_v27, %v526_v45  ;;  %v637_v45 = vld [vmem:[%s5549_s3] sm:$0xff]  ;;  %v647_v46 = vld [vmem:[%s5549_s3 + $0x50] sm:$0xff] }
  0xb6   : > { %v627_v30 = vpop.permute.xlu1 %626  ;;  %v595_v31 = vpop.permute.xlu0 %594 }
  0xb7   : > { %v604_v32 = vmul.f32 %v595_v31, %v572_v28  ;;  %v603_v33 = vmul.f32 %v595_v31, %v571_v29 }
  0xb9   : > { %v636_v36 = vadd.f32 %v627_v30, %v604_v32  ;;  %v635_v37 = vadd.f32 %v627_v30, %v603_v33 }
  0xba   : > { %v590_v38 = vpop.permute.xlu0 %589  ;;  %v585_v39 = vpop.permute.xlu1 %584 }
  0xbb   : > { %782 = vmatprep.subr.mxu0 %v636_v36  ;;  %v601_v40 = vmul.f32 %v590_v38, %v569_v34  ;;  %v602_v41 = vmul.f32 %v590_v38, %v570_v35  ;;  %v599_v56 = vmul.f32 %v585_v39, %v567_v42  ;;  %v600_v47 = vmul.f32 %v585_v39, %v568_v48 }
  0xbc   : > { %783 = vmatpush1.msra.mxu0 %v635_v37 }
  0xbe   : > { %v622_v49 = vpop.permute.xlu0 %621  ;;  %v580_v51 = vpop.permute.xlu1 %579 }
  0xbf   : > { %v633_v52 = vadd.f32 %v622_v49, %v601_v40  ;;  %v634_v53 = vadd.f32 %v622_v49, %v602_v41  ;;  %v598_v58 = vmul.f32 %v580_v51, %v566_v54  ;;  %v597_v61 = vmul.f32 %v580_v51, %v565_v55 }
  0xc1   : > { %784 = vmatprep.subr.mxu0 %v634_v53 }
  0xc2   : > { %v617_v50 = vpop.permute.xlu0 %616  ;;  %v612_v57 = vpop.permute.xlu1 %611  ;;  %785 = vmatpush1.msra.mxu0 %v633_v52 }
  0xc3   : > { %v631_v59 = vadd.f32 %v617_v50, %v599_v56  ;;  %v632_v60 = vadd.f32 %v617_v50, %v600_v47  ;;  %v630_v62 = vadd.f32 %v612_v57, %v598_v58  ;;  %v629_v44 = vadd.f32 %v612_v57, %v597_v61 }
  0xc5   : > { %786 = vmatprep.subr.mxu0 %v632_v60 }
  0xc6   : > { %787 = vmatpush1.msra.mxu0 %v631_v59  ;;  %v684_v13 = vpop.permute.xlu0 %683  ;;  %v689_v17 = vpop.permute.xlu1 %688 }
  0xc7   : > { %788 = vmatprep.subr.mxu0 %v630_v62 }
  0xc8   : > { %789 = vmatpush1.msra.mxu0 %v629_v44 }
  0xc9   : > { %3119 = vmatmul.mubr.msk.f32.vlgmr.msra.gmra.mxu0 %vm721_vm0, %v637_v45  ;;  %1599 = vmatprep.subr.mxu0 %v3667_v25  ;;  %v639_v25 = vld [vmem:[%s5549_s3 + $0x10] sm:$0xff] }
  0xca   : > { %828 = vmatprep.mubr.f32.mxu0 %v5566_v19  ;;  %1600 = vmatpush1.msra.mxu0 %v3657_v21  ;;  %v646_v21 = vld [vmem:[%s5549_s3 + $0x48] sm:$0xff]  ;;  %v694_v23 = vpop.permute.xlu0 %693  ;;  %v699_v33 = vpop.permute.xlu1 %698 }
  0xcb   : > { %1601 = vmatprep.subr.mxu0 %v3652_v18  ;;  %v645_v18 = vld [vmem:[%s5549_s3 + $0x40] sm:$0xff] }
  0xcc   : > { %1602 = vmatpush1.msra.mxu0 %v3641_v14  ;;  %v644_v14 = vld [vmem:[%s5549_s3 + $0x38] sm:$0xff] }
  0xcd   : > { %3120 = vmatmul.mubr.msk.f32.gmra.mxu0 %vm721_vm0, %v638_v43  ;;  %1603 = vmatprep.subr.mxu0 %v3636_v12  ;;  %v640_v12 = vld [vmem:[%s5549_s3 + $0x18] sm:$0xff] }
  0xce   : > { %834 = vmatprep.mubr.f32.mxu0 %v5566_v19  ;;  %1604 = vmatpush1.msra.mxu0 %v3627_v9  ;;  %v641_v9 = vld [vmem:[%s5549_s3 + $0x20] sm:$0xff] }
  0xcf   : > { %1605 = vmatprep.subr.mxu0 %v3633_v11  ;;  %v643_v11 = vld [vmem:[%s5549_s3 + $0x30] sm:$0xff] }
  0xd0   : > { %1606 = vmatpush1.msra.mxu0 %v3624_v8  ;;  %v642_v8 = vld [vmem:[%s5549_s3 + $0x28] sm:$0xff] }
  0xd1   : > { %3121 = vmatmul.mubr.msk.f32.gmra.mxu0 %vm721_vm0, %v639_v25 }
  0xd2   : > { %840 = vmatprep.mubr.f32.mxu0 %v5566_v19 }
  0xd5   : > { %3122 = vmatmul.mubr.msk.f32.gmra.mxu0 %vm721_vm0, %v640_v12 }
  0xd6   : > { %846 = vmatprep.mubr.f32.mxu0 %v5566_v19 }
  0xd9   : > { %3123 = vmatmul.mubr.msk.f32.gmra.mxu0 %vm721_vm0, %v641_v9  ;;  %v719_v9 = vpop.permute.xlu1 %718 }
  0xda   : > { %852 = vmatprep.mubr.f32.mxu0 %v5566_v19 }
  0xdd   : > { %3124 = vmatmul.mubr.msk.f32.gmra.mxu0 %vm721_vm0, %v642_v8 }
  0xde   : > { %858 = vmatprep.mubr.f32.mxu0 %v5566_v19 }
  0xe1   : > { %3125 = vmatmul.mubr.msk.f32.gmra.mxu0 %vm721_vm0, %v643_v11 }
  0xe2   : > { %864 = vmatprep.mubr.f32.mxu0 %v5566_v19 }
  0xe5   : > { %3126 = vmatmul.mubr.msk.f32.gmra.mxu0 %vm721_vm0, %v644_v14 }
  0xe6   : > { %870 = vmatprep.mubr.f32.mxu0 %v5566_v19 }
  0xe9   : > { %3127 = vmatmul.mubr.msk.f32.gmra.mxu0 %vm721_vm0, %v645_v18 }
  0xea   : > { %876 = vmatprep.mubr.f32.mxu0 %v5566_v19 }
  0xed   : > { %3128 = vmatmul.mubr.msk.f32.gmra.mxu0 %vm721_vm0, %v646_v21 }
  0xee   : > { %882 = vmatprep.mubr.f32.mxu0 %v5566_v19 }
  0xf1   : > { %3129 = vmatmul.mubr.msk.f32.gmra.mxu0 %vm721_vm0, %v647_v46 }
  0xf2   : > { %888 = vmatprep.mubr.f32.mxu0 %v5566_v19 }
  0xf5   : > { %3130 = vmatmul.mubr.msk.f32.gmra.mxu0 %vm721_vm0, %v648_v63 }
  0xf6   : > { %1647 = vmatprep.mubr.f32.mxu0 %v5566_v19 }
 0x189   : > { %v3755_v0 = vpop.f32.mrf.mxu0 }
 0x18b   : > { %v3757_v1 = vpop.f32.mrf.mxu0 }
 0x18d   : > { %v3759_v2 = vpop.f32.mrf.mxu0 }
 0x18f   : > { %v3761_v3 = vpop.f32.mrf.mxu0 }
 0x191   : > { %v3763_v4 = vpop.f32.mrf.mxu0 }
 0x193   : > { %v3765_v5 = vpop.f32.mrf.mxu0 }
 0x195   : > { %v3767_v6 = vpop.f32.mrf.mxu0 }
 0x197   : > { %v3769_v7 = vpop.f32.mrf.mxu0 }
 0x199   : > { %v848_v10 = vpop.f32.mrf.mxu0 }
 0x19a   : > { %v849_v26 = vadd.f32 %v848_v10, %v684_v13 }
 0x19b   : > { %v850_v15 = vpop.f32.mrf.mxu0 }
 0x19c   : > { %v851_v30 = vadd.f32 %v850_v15, %v684_v13 }
 0x19d   : > { %v854_v16 = vpop.f32.mrf.mxu0 }
 0x19e   : > { %v855_v22 = vadd.f32 %v854_v16, %v689_v17 }
 0x19f   : > { %v856_v20 = vpop.f32.mrf.mxu0 }
 0x1a0   : > { %v857_v27 = vadd.f32 %v856_v20, %v689_v17  ;;  %v923_v31 = vadd.f32 %v855_v22, %v849_v26 }
 0x1a1   : > { %v860_v24 = vpop.f32.mrf.mxu0 }
 0x1a2   : > { %v861_v28 = vadd.f32 %v860_v24, %v694_v23  ;;  %v932_v35 = vadd.f32 %v857_v27, %v851_v30 }
 0x1a3   : > { %v862_v29 = vpop.f32.mrf.mxu0 }
 0x1a4   : > { %v863_v32 = vadd.f32 %v862_v29, %v694_v23  ;;  %v924_v36 = vadd.f32 %v923_v31, %v861_v28 }
 0x1a5   : > { %v866_v34 = vpop.f32.mrf.mxu0 }
 0x1a6   : > { %v867_v37 = vadd.f32 %v866_v34, %v699_v33  ;;  %v933_v39 = vadd.f32 %v932_v35, %v863_v32 }
 0x1a7   : > { %v868_v38 = vpop.f32.mrf.mxu0 }
 0x1a8   : > { %v925_v40 = vadd.f32 %v924_v36, %v867_v37  ;;  %v869_v41 = vadd.f32 %v868_v38, %v699_v33 }
 0x1a9   : > { %v3771_v42 = vpop.f32.mrf.mxu0 }
 0x1aa   : > { %v926_v48 = vrot.slane %v925_v40, 4  ;;  %v934_v49 = vadd.f32 %v933_v39, %v869_v41 }
 0x1ab   : > { %v3773_v51 = vpop.f32.mrf.mxu0 }
 0x1ac   : > { %v927_v52 = vadd.f32 %v926_v48, %v925_v40  ;;  %v935_v53 = vrot.slane %v934_v49, 4 }
 0x1ad   : > { %v3775_v54 = vpop.f32.mrf.mxu0 }
 0x1ae   : > { %v928_v55 = vrot.slane %v927_v52, 2  ;;  %v936_v56 = vadd.f32 %v935_v53, %v934_v49 }
 0x1af   : > { %v3777_v47 = vpop.f32.mrf.mxu0 }
 0x1b0   : > { %v929_v50 = vadd.f32 %v928_v55, %v927_v52  ;;  %v937_v57 = vrot.slane %v936_v56, 2 }
 0x1b1   : > { %v3779_v58 = vpop.f32.mrf.mxu0 }
 0x1b2   : > { %v930_v59 = vrot.slane %v929_v50, 1  ;;  %v938_v60 = vadd.f32 %v937_v57, %v936_v56 }
 0x1b3   : > { %v3781_v61 = vpop.f32.mrf.mxu0 }
 0x1b4   : > { %v931_v62 = vadd.f32 %v930_v59, %v929_v50  ;;  %v939_v44 = vrot.slane %v938_v60, 1 }
 0x1b5   : > { %v890_v45 = vpop.f32.mrf.mxu0 }
 0x1b6   : > { %v941_v43 = vmul.f32 0.03125, %v931_v62  ;;  %v940_v25 = vadd.f32 %v939_v44, %v938_v60  ;;  %v3785_v13 = vadd.f32 %v890_v45, %v719_v9 }
 0x1b7   : > { %v892_v12 = vpop.f32.mrf.mxu0 }
 0x1b8   : > { %v943_v8 = vsub.f32 %v849_v26, %v941_v43  ;;  %v945_v11 = vsub.f32 %v855_v22, %v941_v43  ;;  %v947_v14 = vsub.f32 %v861_v28, %v941_v43  ;;  %v942_v18 = vmul.f32 0.03125, %v940_v25 }
 0x1b9   : > { %v3783_v21 = vadd.f32 %v892_v12, %v719_v9  ;;  %v949_v46 = vsub.f32 %v867_v37, %v941_v43 }
 0x1ba   : > { %v959_v63 = vmul.f32 %v943_v8, %v943_v8  ;;  %v961_v10 = vmul.f32 %v945_v11, %v945_v11  ;;  %v944_v15 = vsub.f32 %v851_v30, %v942_v18  ;;  %v946_v16 = vsub.f32 %v857_v27, %v942_v18 }
 0x1bb   : > { %v948_v17 = vsub.f32 %v863_v32, %v942_v18  ;;  %1167 = vmatprep.subr.mxu1 %v3783_v21  ;;  %v963_v20 = vmul.f32 %v947_v14, %v947_v14  ;;  %v950_v24 = vsub.f32 %v869_v41, %v942_v18  ;;  %v965_v28 = vmul.f32 %v949_v46, %v949_v46 }
 0x1bc   : > { %v997_v23 = vadd.f32 %v961_v10, %v959_v63  ;;  %1168 = vmatpush1.xpose.msra.mxu1 %v3785_v13  ;;  %v960_v22 = vmul.f32 %v944_v15, %v944_v15  ;;  %v962_v26 = vmul.f32 %v946_v16, %v946_v16 }
 0x1bd   : > { %v964_v31 = vmul.f32 %v948_v17, %v948_v17  ;;  %v966_v35 = vmul.f32 %v950_v24, %v950_v24  ;;  %v658_v24 = vld [vmem:[%s5550_s4 + $0x48] sm:$0xff] }
 0x1be   : > { %v998_v29 = vadd.f32 %v997_v23, %v963_v20  ;;  %v1006_v33 = vadd.f32 %v962_v26, %v960_v22 }
 0x1c0   : > { %v999_v34 = vadd.f32 %v998_v29, %v965_v28  ;;  %v1007_v36 = vadd.f32 %v1006_v33, %v964_v31  ;;  %v659_v29 = vld [vmem:[%s5550_s4 + $0x50] sm:$0xff]  ;;  %v649_v33 = vld [vmem:[%s5550_s4] sm:$0xff] }
 0x1c2   : > { %v1000_v37 = vrot.slane %v999_v34, 4  ;;  %v1008_v30 = vadd.f32 %v1007_v36, %v966_v35  ;;  %v1378_v36 = vld [vmem:[%s5552_s6 + $0x8] sm:$0xff] }
 0x1c4   : > { %v1001_v27 = vadd.f32 %v1000_v37, %v999_v34  ;;  %v1009_v32 = vrot.slane %v1008_v30, 4  ;;  %v1379_v34 = vld [vmem:[%s5552_s6 + $0x10] sm:$0xff]  ;;  %v1377_v37 = vld [vmem:[%s5552_s6] sm:$0xff] }
 0x1c6   : > { %v1002_v38 = vrot.slane %v1001_v27, 2  ;;  %v1010_v39 = vadd.f32 %v1009_v32, %v1008_v30  ;;  %v1517_v30 = vld [vmem:[%s5554_s8 + $0x38] sm:$0xff]  ;;  %v1515_v32 = vld [vmem:[%s5554_s8 + $0x28] sm:$0xff] }
 0x1c8   : > { %v1003_v40 = vadd.f32 %v1002_v38, %v1001_v27  ;;  %v1011_v48 = vrot.slane %v1010_v39, 2  ;;  %v1516_v27 = vld [vmem:[%s5554_s8 + $0x30] sm:$0xff]  ;;  %v1514_v38 = vld [vmem:[%s5554_s8 + $0x20] sm:$0xff] }
 0x1ca   : > { %v1004_v49 = vrot.slane %v1003_v40, 1  ;;  %v1012_v52 = vadd.f32 %v1011_v48, %v1010_v39  ;;  %v1513_v39 = vld [vmem:[%s5554_s8 + $0x18] sm:$0xff]  ;;  %v1511_v48 = vld [vmem:[%s5554_s8 + $0x8] sm:$0xff] }
 0x1cc   : > { %v1005_v41 = vadd.f32 %v1004_v49, %v1003_v40  ;;  %v1013_v53 = vrot.slane %v1012_v52, 1  ;;  %v1512_v40 = vld [vmem:[%s5554_s8 + $0x10] sm:$0xff] }
 0x1ce   : > { %v1015_v55 = vadd.f32 1e-07, %v1005_v41  ;;  %v1014_v56 = vadd.f32 %v1013_v53, %v1012_v52 }
 0x1d0   : > { %3253 = vrcp.f32 %v1015_v55  ;;  %v1016_v50 = vadd.f32 1e-07, %v1014_v56 }
 0x1d2   : > { %3255 = vrcp.f32 %v1016_v50 }
 0x1dd   : > { %v3254_v57 = vpop.eup %3253 }
 0x1de   : > { %v3789_v59 = vmul.f32 %v3254_v57, %v961_v10  ;;  %v3791_v60 = vmul.f32 %v3254_v57, %v959_v63  ;;  %v3799_v25 = vmul.f32 %v3254_v57, %v963_v20  ;;  %v3813_v10 = vmul.f32 %v3254_v57, %v965_v28  ;;  %v652_v28 = vld [vmem:[%s5550_s4 + $0x18] sm:$0xff] }
 0x1df   : > { %v3256_v62 = vpop.eup %3255 }
 0x1e0   : > { %v3793_v44 = vmul.f32 %v3256_v62, %v962_v26  ;;  %v3795_v45 = vmul.f32 %v3256_v62, %v960_v22  ;;  %v3797_v43 = vmul.f32 %v3256_v62, %v964_v31  ;;  %v1029_v12 = vmul.f32 %v3789_v59, %v3789_v59  ;;  %v657_v22 = vld [vmem:[%s5550_s4 + $0x40] sm:$0xff]  ;;  %v650_v26 = vld [vmem:[%s5550_s4 + $0x8] sm:$0xff]  ;;  %v1380_v31 = vld [vmem:[%s5552_s6 + $0x18] sm:$0xff] }
 0x1e1   : > { %v1027_v8 = vmul.f32 %v3791_v60, %v3791_v60  ;;  %v3809_v14 = vmul.f32 %v3256_v62, %v966_v35  ;;  %v1031_v15 = vmul.f32 %v3799_v25, %v3799_v25  ;;  %v1033_v20 = vmul.f32 %v3813_v10, %v3813_v10  ;;  %v651_v35 = vld [vmem:[%s5550_s4 + $0x10] sm:$0xff] }
 0x1e2   : > { %v1030_v9 = vmul.f32 %v3793_v44, %v3793_v44  ;;  %v1028_v11 = vmul.f32 %v3795_v45, %v3795_v45  ;;  %v1032_v63 = vmul.f32 %v3797_v43, %v3797_v43 }
 0x1e3   : > { %v1034_v17 = vmul.f32 %v3809_v14, %v3809_v14 }
 0x1e4   : > { %v1038_v18 = vadd.f32 %v1030_v9, %v1029_v12  ;;  %v1035_v46 = vadd.f32 %v1028_v11, %v1027_v8  ;;  %v1041_v16 = vadd.f32 %v1032_v63, %v1031_v15 }
 0x1e5   : > { %v1044_v23 = vadd.f32 %v1034_v17, %v1033_v20 }
 0x1e6   : > { %1039 = vadd.xlane.f32.xlu1 %v1038_v18  ;;  %1036 = vadd.xlane.f32.xlu0 %v1035_v46 }
 0x1ea   : > { %1042 = vadd.xlane.f32.xlu0 %v1041_v16 }
 0x1ee   : > { %1045 = vadd.xlane.f32.xlu0 %v1044_v23 }
 0x1f7   : > { %708 = vperm.xlu1 %3248, %v658_v24  }
 0x1fb   : > { %703 = vperm.xlu1 %3248, %v657_v22  }
 0x1ff   : > { %668 = vperm.xlu1 %3248, %v650_v26  }
 0x203   : > { %678 = vperm.xlu1 %3248, %v652_v28  }
 0x204   : > { %713 = vperm.xlu0 %3247, %v659_v29  }
 0x207   : > { %1398 = vperm.xlu1 %3248, %v1380_v31  }
 0x208   : > { %663 = vperm.xlu0 %3247, %v649_v33  }
 0x20b   : > { %1393 = vperm.xlu1 %3248, %v1379_v34  }
 0x20c   : > { %673 = vperm.xlu0 %3247, %v651_v35  }
 0x20f   : > { %1388 = vperm.xlu1 %3248, %v1378_v36  }
 0x213   : > { %1383 = vperm.xlu1 %3248, %v1377_v37  }
 0x217   : > { %1555 = vperm.xlu1 %3248, %v1517_v30  }
 0x21b   : > { %1550 = vperm.xlu1 %3248, %v1516_v27  }
 0x21f   : > { %1545 = vperm.xlu1 %3248, %v1515_v32  }
 0x223   : > { %1540 = vperm.xlu1 %3248, %v1514_v38  }
 0x227   : > { %1535 = vperm.xlu1 %3248, %v1513_v39  }
 0x22b   : > { %1530 = vperm.xlu1 %3248, %v1512_v40  }
 0x22f   : > { %1525 = vperm.xlu1 %3248, %v1511_v48  }
 0x26f   : > { %v1040_v49 = vpop.xlane.xlu1 %1039  ;;  %v1037_v52 = vpop.xlane.xlu0 %1036 }
 0x270   : > { %3257 = vrsqrt.f32 %v1040_v49  ;;  %vm1056_vm1 = vcmp.eq.f32.partialorder %v1040_v49, inf  ;;  %vm1058_vm2 = vcmp.eq.f32.partialorder %v1040_v49, 0.0  ;;  %v1059_v12 = vand.u32 2147483648, %v1040_v49 }
 0x271   : > { %3259 = vrsqrt.f32 %v1037_v52  ;;  %vm1049_vm3 = vcmp.eq.f32.partialorder %v1037_v52, inf  ;;  %v1052_v18 = vand.u32 2147483648, %v1037_v52  ;;  %vm1051_vm4 = vcmp.eq.f32.partialorder %v1037_v52, 0.0 }
 0x273   : > { %v1043_v41 = vpop.xlane.xlu0 %1042  ;;  %v709_v53 = vpop.permute.xlu1 %708 }
 0x274   : > { %3261 = vrsqrt.f32 %v1043_v41  ;;  %v3882_v24 = vadd.f32 %v3777_v47, %v709_v53  ;;  %vm1063_vm5 = vcmp.eq.f32.partialorder %v1043_v41, inf  ;;  %vm1065_vm6 = vcmp.eq.f32.partialorder %v1043_v41, 0.0 }
 0x275   : > { %v1066_v28 = vand.u32 2147483648, %v1043_v41  ;;  %v3893_v34 = vadd.f32 %v3775_v54, %v709_v53 }
 0x277   : > { %v1046_v55 = vpop.xlane.xlu0 %1045  ;;  %v704_v56 = vpop.permute.xlu1 %703 }
 0x278   : > { %3263 = vrsqrt.f32 %v1046_v55  ;;  %v3900_v30 = vadd.f32 %v3773_v51, %v704_v56  ;;  %vm1070_vm7 = vcmp.eq.f32.partialorder %v1046_v55, inf  ;;  %vm1072_vm8 = vcmp.eq.f32.partialorder %v1046_v55, 0.0 }
 0x279   : > { %v1073_v32 = vand.u32 2147483648, %v1046_v55  ;;  %v3910_v48 = vadd.f32 %v3771_v42, %v704_v56 }
 0x27b   : > { %v669_v46 = vpop.permute.xlu1 %668 }
 0x27c   : > { %v3896_v36 = vadd.f32 %v3759_v2, %v669_v46 }
 0x27d   : > { %v3258_v50 = vpop.eup %3257 }
 0x27e   : > { %v3260_v57 = vpop.eup %3259  ;;  %v1055_v62 = vmul.f32 %v3258_v50, %v1040_v49 }
 0x27f   : > { %v1048_v9 = vmul.f32 %v3260_v57, %v1037_v52  ;;  %v714_v8 = vpop.permute.xlu0 %713  ;;  %v679_v27 = vpop.permute.xlu1 %678 }
 0x280   : > { %v1057_v11 = vsel %vm1056_vm1, %v1040_v49, %v1055_v62  ;;  %v3876_v63 = vadd.f32 %v3779_v58, %v714_v8  ;;  %v3879_v20 = vadd.f32 %v3781_v61, %v714_v8  ;;  %v843_v49 = vadd.f32 %v3767_v6, %v679_v27 }
 0x281   : > { %v3262_v15 = vpop.eup %3261  ;;  %v1060_v16 = vsel %vm1058_vm2, %v1059_v12, %v1057_v11  ;;  %v1050_v17 = vsel %vm1049_vm3, %v1037_v52, %v1048_v9 }
 0x282   : > { %v1076_v23 = vmax.f32 %v1060_v16, 1e-12  ;;  %v1062_v22 = vmul.f32 %v3262_v15, %v1043_v41  ;;  %v1053_v26 = vsel %vm1051_vm4, %v1052_v18, %v1050_v17  ;;  %1169 = vmatprep.subr.mxu1 %v3879_v20 }
 0x283   : > { %v664_v58 = vpop.permute.xlu0 %663  ;;  %v1075_v29 = vmax.f32 %v1053_v26, 1e-12  ;;  %1170 = vmatpush1.xpose.msra.mxu1 %v3876_v63 }
 0x284   : > { %v1064_v31 = vsel %vm1063_vm5, %v1043_v41, %v1062_v22  ;;  %v3887_v33 = vadd.f32 %v3755_v0, %v664_v58  ;;  %v3890_v61 = vadd.f32 %v3757_v1, %v664_v58  ;;  %3265 = vrcp.f32 %v1076_v23  ;;  %1171 = vmatprep.subr.mxu1 %v3882_v24 }
 0x285   : > { %v3264_v47 = vpop.eup %3263  ;;  %v1067_v35 = vsel %vm1065_vm6, %v1066_v28, %v1064_v31  ;;  %3267 = vrcp.f32 %v1075_v29  ;;  %v833_v1 = vadd.f32 %v3761_v3, %v669_v46  ;;  %v845_v41 = vadd.f32 %v3769_v7, %v679_v27 }
 0x286   : > { %v1077_v37 = vmax.f32 %v1067_v35, 1e-12  ;;  %v1069_v0 = vmul.f32 %v3264_v47, %v1046_v55  ;;  %v895_v54 = vadd.f32 %v3896_v36, %v3887_v33 }
 0x287   : > { %v674_v38 = vpop.permute.xlu0 %673  ;;  %v904_v39 = vadd.f32 %v833_v1, %v3890_v61  ;;  %1172 = vmatpush1.xpose.msra.mxu1 %v3893_v34 }
 0x288   : > { %v1071_v2 = vsel %vm1070_vm7, %v1046_v55, %v1069_v0  ;;  %v837_v40 = vadd.f32 %v3763_v4, %v674_v38  ;;  %v839_v51 = vadd.f32 %v3765_v5, %v674_v38  ;;  %1173 = vmatprep.subr.mxu1 %v3900_v30  ;;  %3269 = vrcp.f32 %v1077_v37 }
 0x289   : > { %v1074_v3 = vsel %vm1072_vm8, %v1073_v32, %v1071_v2 }
 0x28a   : > { %v1078_v52 = vmax.f32 %v1074_v3, 1e-12  ;;  %v896_v53 = vadd.f32 %v895_v54, %v837_v40  ;;  %v905_v55 = vadd.f32 %v904_v39, %v839_v51 }
 0x28b   : > { %1174 = vmatpush1.xpose.msra.mxu1 %v3910_v48 }
 0x28c   : > { %v897_v50 = vadd.f32 %v896_v53, %v843_v49  ;;  %v906_v57 = vadd.f32 %v905_v55, %v845_v41  ;;  %3271 = vrcp.f32 %v1078_v52 }
 0x28e   : > { %v898_v4 = vrot.slane %v897_v50, 4  ;;  %v907_v5 = vrot.slane %v906_v57, 4 }
 0x290   : > { %v899_v42 = vadd.f32 %v898_v4, %v897_v50  ;;  %v908_v56 = vadd.f32 %v907_v5, %v906_v57 }
 0x291   : > { %v3266_v62 = vpop.eup %3265 }
 0x292   : > { %v3268_v12 = vpop.eup %3267  ;;  %v900_v6 = vrot.slane %v899_v42, 2  ;;  %v909_v9 = vrot.slane %v908_v56, 2  ;;  %v1084_v46 = vmul.f32 %v3266_v62, %v3793_v44  ;;  %v1083_v26 = vmul.f32 %v3266_v62, %v3789_v59 }
 0x293   : > { %v1081_v8 = vmul.f32 %v3268_v12, %v3795_v45  ;;  %v1080_v11 = vmul.f32 %v3268_v12, %v3791_v60 }
 0x294   : > { %v901_v7 = vadd.f32 %v900_v6, %v899_v42  ;;  %v910_v18 = vadd.f32 %v909_v9, %v908_v56 }
 0x295   : > { %1207 = vmatprep.mubr.f32.mxu1 %v1081_v8  ;;  %v3270_v15 = vpop.eup %3269 }
 0x296   : > { %v902_v16 = vrot.slane %v901_v7, 1  ;;  %v911_v17 = vrot.slane %v910_v18, 1  ;;  %1208 = vmatmul.mubr.f32.vlgmr.msra.gmra.mxu1 %v1080_v11  ;;  %v1087_v58 = vmul.f32 %v3270_v15, %v3797_v43  ;;  %v1086_v60 = vmul.f32 %v3270_v15, %v3799_v25 }
 0x297   : > { %1212 = vmatprep.mubr.f32.mxu1 %v1084_v46 }
 0x298   : > { %v903_v23 = vadd.f32 %v902_v16, %v901_v7  ;;  %v912_v22 = vadd.f32 %v911_v17, %v910_v18 }
 0x299   : > { %v3272_v28 = vpop.eup %3271 }
 0x29a   : > { %v913_v45 = vmul.f32 0.03125, %v903_v23  ;;  %v914_v29 = vmul.f32 0.03125, %v912_v22  ;;  %1213 = vmatmul.mubr.f32.gmra.mxu1 %v1083_v26  ;;  %v1090_v44 = vmul.f32 %v3272_v28, %v3809_v14  ;;  %v1089_v25 = vmul.f32 %v3272_v28, %v3813_v10 }
 0x29b   : > { %1217 = vmatprep.mubr.f32.mxu1 %v1087_v58 }
 0x29c   : > { %v915_v31 = vsub.f32 %v3887_v33, %v913_v45  ;;  %v916_v47 = vsub.f32 %v3890_v61, %v914_v29  ;;  %v917_v35 = vsub.f32 %v3896_v36, %v913_v45  ;;  %v918_v37 = vsub.f32 %v833_v1, %v914_v29 }
 0x29d   : > { %v919_v0 = vsub.f32 %v837_v40, %v913_v45  ;;  %v920_v59 = vsub.f32 %v839_v51, %v914_v29  ;;  %v921_v27 = vsub.f32 %v843_v49, %v913_v45  ;;  %v922_v32 = vsub.f32 %v845_v41, %v914_v29 }
 0x29e   : > { %v951_v43 = vmul.f32 %v915_v31, %v915_v31  ;;  %v952_v54 = vmul.f32 %v916_v47, %v916_v47  ;;  %v953_v38 = vmul.f32 %v917_v35, %v917_v35  ;;  %v954_v2 = vmul.f32 %v918_v37, %v918_v37  ;;  %1218 = vmatmul.mubr.f32.gmra.mxu1 %v1086_v60 }
 0x29f   : > { %1222 = vmatprep.mubr.f32.mxu1 %v1090_v44  ;;  %v955_v14 = vmul.f32 %v919_v0, %v919_v0  ;;  %v956_v39 = vmul.f32 %v920_v59, %v920_v59  ;;  %v957_v61 = vmul.f32 %v921_v27, %v921_v27  ;;  %v958_v52 = vmul.f32 %v922_v32, %v922_v32 }
 0x2a0   : > { %v967_v33 = vadd.f32 %v953_v38, %v951_v43  ;;  %v976_v3 = vadd.f32 %v954_v2, %v952_v54 }
 0x2a2   : > { %v968_v36 = vadd.f32 %v967_v33, %v955_v14  ;;  %v977_v1 = vadd.f32 %v976_v3, %v956_v39  ;;  %1223 = vmatmul.mubr.f32.gmra.mxu1 %v1089_v25 }
 0x2a3   : > { %1340 = vmatprep.mubr.f32.mxu1 %v5566_v19 }
 0x2a4   : > { %v969_v40 = vadd.f32 %v968_v36, %v957_v61  ;;  %v978_v51 = vadd.f32 %v977_v1, %v958_v52 }
 0x2a6   : > { %v970_v49 = vrot.slane %v969_v40, 4  ;;  %v979_v41 = vrot.slane %v978_v51, 4 }
 0x2a8   : > { %v971_v53 = vadd.f32 %v970_v49, %v969_v40  ;;  %v980_v55 = vadd.f32 %v979_v41, %v978_v51 }
 0x2aa   : > { %v972_v50 = vrot.slane %v971_v53, 2  ;;  %v981_v57 = vrot.slane %v980_v55, 2 }
 0x2ac   : > { %v973_v10 = vadd.f32 %v972_v50, %v971_v53  ;;  %v982_v4 = vadd.f32 %v981_v57, %v980_v55 }
 0x2ae   : > { %v974_v5 = vrot.slane %v973_v10, 1  ;;  %v983_v42 = vrot.slane %v982_v4, 1 }
 0x2b0   : > { %v975_v56 = vadd.f32 %v974_v5, %v973_v10  ;;  %v984_v62 = vadd.f32 %v983_v42, %v982_v4 }
 0x2b2   : > { %v985_v12 = vadd.f32 1e-07, %v975_v56  ;;  %v986_v6 = vadd.f32 1e-07, %v984_v62 }
 0x2b4   : > { %3273 = vrcp.f32 %v985_v12 }
 0x2b5   : > { %3275 = vrcp.f32 %v986_v6 }
 0x2c1   : > { %v3274_v9 = vpop.eup %3273 }
 0x2c2   : > { %v3276_v8 = vpop.eup %3275  ;;  %v3928_v11 = vmul.f32 %v3274_v9, %v951_v43  ;;  %v3930_v7 = vmul.f32 %v3274_v9, %v953_v38  ;;  %v993_v18 = vmul.f32 %v3274_v9, %v955_v14  ;;  %v995_v22 = vmul.f32 %v3274_v9, %v957_v61 }
 0x2c3   : > { %v3932_v46 = vmul.f32 %v3276_v8, %v952_v54  ;;  %v992_v15 = vmul.f32 %v3276_v8, %v954_v2  ;;  %v994_v16 = vmul.f32 %v3276_v8, %v956_v39  ;;  %v996_v26 = vmul.f32 %v3276_v8, %v958_v52 }
 0x2c4   : > { %v1091_v17 = vmul.f32 %v3928_v11, %v3928_v11  ;;  %v1093_v23 = vmul.f32 %v3930_v7, %v3930_v7  ;;  %v1095_v45 = vmul.f32 %v993_v18, %v993_v18  ;;  %v1097_v47 = vmul.f32 %v995_v22, %v995_v22 }
 0x2c5   : > { %v1092_v28 = vmul.f32 %v3932_v46, %v3932_v46  ;;  %v1094_v58 = vmul.f32 %v992_v15, %v992_v15  ;;  %v1096_v60 = vmul.f32 %v994_v16, %v994_v16  ;;  %v1098_v35 = vmul.f32 %v996_v26, %v996_v26 }
 0x2c6   : > { %v1099_v29 = vadd.f32 %v1093_v23, %v1091_v17 }
 0x2c7   : > { %v1108_v44 = vadd.f32 %v1094_v58, %v1092_v28 }
 0x2c8   : > { %v1100_v31 = vadd.f32 %v1099_v29, %v1095_v45 }
 0x2c9   : > { %v1109_v37 = vadd.f32 %v1108_v44, %v1096_v60 }
 0x2ca   : > { %v1101_v0 = vadd.f32 %v1100_v31, %v1097_v47 }
 0x2cb   : > { %v1110_v59 = vadd.f32 %v1109_v37, %v1098_v35 }
 0x2cc   : > { %v1102_v27 = vrot.slane %v1101_v0, 4 }
 0x2cd   : > { %v1111_v32 = vrot.slane %v1110_v59, 4 }
 0x2ce   : > { %v1103_v43 = vadd.f32 %v1102_v27, %v1101_v0 }
 0x2cf   : > { %v1112_v54 = vadd.f32 %v1111_v32, %v1110_v59 }
 0x2d0   : > { %v1104_v38 = vrot.slane %v1103_v43, 2 }
 0x2d1   : > { %v1113_v2 = vrot.slane %v1112_v54, 2 }
 0x2d2   : > { %v1105_v25 = vadd.f32 %v1104_v38, %v1103_v43 }
 0x2d3   : > { %v1114_v14 = vadd.f32 %v1113_v2, %v1112_v54 }
 0x2d4   : > { %v1106_v39 = vrot.slane %v1105_v25, 1 }
 0x2d5   : > { %v1115_v33 = vrot.slane %v1114_v14, 1 }
 0x2d6   : > { %v1107_v3 = vadd.f32 %v1106_v39, %v1105_v25 }
 0x2d7   : > { %v1116_v61 = vadd.f32 %v1115_v33, %v1114_v14 }
 0x2d8   : > { %3277 = vrsqrt.f32 %v1107_v3  ;;  %vm1119_vm9 = vcmp.eq.f32.partialorder %v1107_v3, inf  ;;  %v1122_v51 = vand.u32 2147483648, %v1107_v3  ;;  %vm1121_vm11 = vcmp.eq.f32.partialorder %v1107_v3, 0.0 }
 0x2d9   : > { %3279 = vrsqrt.f32 %v1116_v61  ;;  %vm1126_vm10 = vcmp.eq.f32.partialorder %v1116_v61, inf  ;;  %v1129_v49 = vand.u32 2147483648, %v1116_v61  ;;  %vm1128_vm12 = vcmp.eq.f32.partialorder %v1116_v61, 0.0 }
 0x2e5   : > { %v3278_v52 = vpop.eup %3277 }
 0x2e6   : > { %v3280_v36 = vpop.eup %3279  ;;  %v1118_v1 = vmul.f32 %v3278_v52, %v1107_v3 }
 0x2e7   : > { %v1125_v40 = vmul.f32 %v3280_v36, %v1116_v61 }
 0x2e8   : > { %v1120_v41 = vsel %vm1119_vm9, %v1107_v3, %v1118_v1 }
 0x2e9   : > { %v1127_v53 = vsel %vm1126_vm10, %v1116_v61, %v1125_v40  ;;  %v1123_v55 = vsel %vm1121_vm11, %v1122_v51, %v1120_v41 }
 0x2ea   : > { %v1130_v50 = vsel %vm1128_vm12, %v1129_v49, %v1127_v53  ;;  %v1131_v57 = vmax.f32 %v1123_v55, 1e-12 }
 0x2eb   : > { %v1132_v10 = vmax.f32 %v1130_v50, 1e-12 }
 0x2ec   : > { %3281 = vrcp.f32 %v1131_v57 }
 0x2ed   : > { %3283 = vrcp.f32 %v1132_v10 }
 0x2f9   : > { %v3282_v4 = vpop.eup %3281 }
 0x2fa   : > { %v3284_v5 = vpop.eup %3283  ;;  %v1141_v42 = vmul.f32 %v3282_v4, %v995_v22  ;;  %v1139_v12 = vmul.f32 %v3282_v4, %v993_v18  ;;  %v1137_v9 = vmul.f32 %v3282_v4, %v3930_v7  ;;  %v1134_v17 = vmul.f32 %v3282_v4, %v3928_v11  ;;  %v1510_v11 = vld [vmem:[%s5554_s8] sm:$0xff] }
 0x2fb   : > { %v1142_v56 = vmul.f32 %v3284_v5, %v996_v26  ;;  %v1140_v62 = vmul.f32 %v3284_v5, %v994_v16  ;;  %v1138_v6 = vmul.f32 %v3284_v5, %v992_v15  ;;  %v1136_v8 = vmul.f32 %v3284_v5, %v3932_v46 }
 0x2fd   : > { %1300 = vmatprep.subr.mxu1 %v1142_v56 }
 0x2fe   : > { %1301 = vmatpush1.msra.mxu1 %v1141_v42 }
 0x2ff   : > { %1302 = vmatprep.subr.mxu1 %v1140_v62  ;;  %v1502_v62 = vld [vmem:[#allocation2] sm:$0xff] }
 0x300   : > { %1303 = vmatpush1.msra.mxu1 %v1139_v12  ;;  %v1503_v12 = vld [vmem:[#allocation2 + $0x8] sm:$0xff] }
 0x301   : > { %1304 = vmatprep.subr.mxu1 %v1138_v6  ;;  %v1504_v6 = vld [vmem:[#allocation2 + $0x10] sm:$0xff] }
 0x302   : > { %1305 = vmatpush1.msra.mxu1 %v1137_v9  ;;  %v1505_v9 = vld [vmem:[#allocation2 + $0x18] sm:$0xff] }
 0x303   : > { %1306 = vmatprep.subr.mxu1 %v1136_v8  ;;  %v1506_v8 = vld [vmem:[#allocation2 + $0x20] sm:$0xff] }
 0x304   : > { %1307 = vmatpush1.msra.mxu1 %v1134_v17  ;;  %v1507_v17 = vld [vmem:[#allocation2 + $0x28] sm:$0xff] }
 0x356   : > { %v1209_v23 = vpop.f32.mrf.mxu1 }
 0x357   : > { %v1228_v22 = vmul.f32 0.0625, %v1209_v23  ;;  %v1508_v23 = vld [vmem:[#allocation2 + $0x30] sm:$0xff] }
 0x358   : > { %v1211_v26 = vpop.f32.mrf.mxu1 }
 0x359   : > { %1232 = vxpose.xlu0.b32.start [1/4] (short) (narrow) %v1228_v22, 32  ;;  %v1509_v22 = vld [vmem:[#allocation2 + $0x38] sm:$0xff] }
 0x35a   : > { %v1214_v16 = vpop.f32.mrf.mxu1 }
 0x35b   : > { %v1229_v28 = vmul.f32 0.0625, %v1214_v16 }
 0x35c   : > { %v1216_v18 = vpop.f32.mrf.mxu1 }
 0x35d   : > { %1233 = vxpose.xlu0.b32.cont [2/4] (short) (narrow) %v1229_v28, 32 }
 0x35e   : > { %v1219_v15 = vpop.f32.mrf.mxu1 }
 0x35f   : > { %v1230_v58 = vmul.f32 0.0625, %v1219_v15 }
 0x360   : > { %v1221_v45 = vpop.f32.mrf.mxu1 }
 0x361   : > { %1234 = vxpose.xlu0.b32.cont [3/4] (short) (narrow) %v1230_v58, 32 }
 0x362   : > { %v1224_v7 = vpop.f32.mrf.mxu1 }
 0x363   : > { %v1231_v29 = vmul.f32 0.0625, %v1224_v7 }
 0x364   : > { %v1226_v46 = vpop.f32.mrf.mxu1 }
 0x365   : > { %1235 = vxpose.xlu0.b32.end [4/4] (short) (narrow) %v1231_v29, 32 }
 0x38e   : > { %1520 = vperm.xlu0 %3247, %v1510_v11  }
 0x3d5   : > { %v1248_v60 = vpop.trf.xlu0 }
 0x3d6   : > { %3131 = vmatmul.mubr.msk.f32.vlgmr.msra.gmra.mxu1 %vm721_vm0, %v1248_v60 }
 0x3d7   : > { %1346 = vmatprep.mubr.f32.mxu1 %v5566_v19 }
 0x3d9   : > { %v1249_v44 = vpop.trf.xlu0 }
 0x3da   : > { %3132 = vmatmul.mubr.msk.f32.gmra.mxu1 %vm721_vm0, %v1249_v44 }
 0x3db   : > { %1352 = vmatprep.mubr.f32.mxu1 %v5566_v19 }
 0x3dd   : > { %v1250_v31 = vpop.trf.xlu0 }
 0x3de   : > { %3133 = vmatmul.mubr.msk.f32.gmra.mxu1 %vm721_vm0, %v1250_v31 }
 0x3df   : > { %1358 = vmatprep.mubr.f32.mxu1 %v5566_v19 }
 0x3e1   : > { %v1251_v47 = vpop.trf.xlu0 }
 0x3e2   : > { %3134 = vmatmul.mubr.msk.f32.gmra.mxu1 %vm721_vm0, %v1251_v47 }
 0x3e3   : > { %1477 = vmatprep.mubr.f32.mxu1 %v5566_v19 }
 0x409   : > { %v1521_v15 = vpop.permute.xlu0 %1520 }
 0x496   : > { %v1342_v35 = vpop.f32.mrf.mxu1 }
 0x497   : > { %v1365_v61 = vadd.f32 %v1342_v35, %v3910_v48 }
 0x498   : > { %v1344_v37 = vpop.f32.mrf.mxu1 }
 0x499   : > { %v1366_v3 = vadd.f32 %v1344_v37, %v3900_v30 }
 0x49a   : > { %v1348_v0 = vpop.f32.mrf.mxu1 }
 0x49b   : > { %v1367_v33 = vadd.f32 %v1348_v0, %v3893_v34  ;;  %v1399_v34 = vpop.permute.xlu1 %1398 }
 0x49c   : > { %v1350_v59 = vpop.f32.mrf.mxu1 }
 0x49d   : > { %v1368_v39 = vadd.f32 %v1350_v59, %v3882_v24 }
 0x49e   : > { %v1354_v27 = vpop.f32.mrf.mxu1 }
 0x49f   : > { %v1369_v14 = vadd.f32 %v1354_v27, %v3876_v63  ;;  %v1375_v63 = vld [vmem:[%s5551_s5 + $0x10] sm:$0xff]  ;;  %v1394_v36 = vpop.permute.xlu1 %1393 }
 0x4a0   : > { %v1356_v32 = vpop.f32.mrf.mxu1 }
 0x4a1   : > { %v1370_v25 = vadd.f32 %v1356_v32, %v3879_v20  ;;  %v1376_v20 = vld [vmem:[%s5551_s5 + $0x18] sm:$0xff] }
 0x4a2   : > { %v1360_v43 = vpop.f32.mrf.mxu1 }
 0x4a3   : > { %v1371_v2 = vadd.f32 %v1360_v43, %v3785_v13  ;;  %v1374_v13 = vld [vmem:[%s5551_s5 + $0x8] sm:$0xff]  ;;  %v1389_v49 = vpop.permute.xlu1 %1388 }
 0x4a4   : > { %v1362_v54 = vpop.f32.mrf.mxu1 }
 0x4a5   : > { %v1372_v38 = vadd.f32 %v1362_v54, %v3783_v21  ;;  %v1373_v21 = vld [vmem:[%s5551_s5] sm:$0xff] }
 0x4a7   : > { %1437 = vmatprep.subr.mxu1 %v1372_v38  ;;  %v1384_v4 = vpop.permute.xlu1 %1383 }
 0x4a8   : > { %1438 = vmatpush1.msra.mxu1 %v1371_v2 }
 0x4a9   : > { %1439 = vmatprep.subr.mxu1 %v1370_v25 }
 0x4aa   : > { %1440 = vmatpush1.msra.mxu1 %v1369_v14 }
 0x4ab   : > { %1441 = vmatprep.subr.mxu1 %v1368_v39  ;;  %v3996_v26 = vpop.permute.xlu1 %1555 }
 0x4ac   : > { %1442 = vmatpush1.msra.mxu1 %v1367_v33 }
 0x4ad   : > { %1443 = vmatprep.subr.mxu1 %v1366_v3 }
 0x4ae   : > { %1444 = vmatpush1.msra.mxu1 %v1365_v61 }
 0x4af   : > { %3135 = vmatmul.mubr.msk.f32.vlgmr.msra.gmra.mxu1 %vm721_vm0, %v1373_v21  ;;  %v3998_v16 = vpop.permute.xlu1 %1550 }
 0x4b0   : > { %1483 = vmatprep.mubr.f32.mxu1 %v5566_v19 }
 0x4b3   : > { %3136 = vmatmul.mubr.msk.f32.gmra.mxu1 %vm721_vm0, %v1374_v13  ;;  %v4000_v28 = vpop.permute.xlu1 %1545 }
 0x4b4   : > { %1489 = vmatprep.mubr.f32.mxu1 %v5566_v19 }
 0x4b7   : > { %3137 = vmatmul.mubr.msk.f32.gmra.mxu1 %vm721_vm0, %v1375_v63  ;;  %v4002_v18 = vpop.permute.xlu1 %1540 }
 0x4b8   : > { %1495 = vmatprep.mubr.f32.mxu1 %v5566_v19 }
 0x4bb   : > { %3138 = vmatmul.mubr.msk.f32.gmra.mxu1 %vm721_vm0, %v1376_v20  ;;  %v1536_v11 = vpop.permute.xlu1 %1535 }
 0x4bf   : > { %v1531_v47 = vpop.permute.xlu1 %1530 }
 0x4c3   : > { %v1526_v37 = vpop.permute.xlu1 %1525 }
 0x56f   : > { %v1479_v24 = vpop.f32.mrf.mxu1 }
 0x570   : > { %v1480_v56 = vadd.f32 %v1479_v24, %v1384_v4 }
 0x571   : > { %v1481_v30 = vpop.f32.mrf.mxu1 }
 0x572   : > { %v1482_v42 = vadd.f32 %v1481_v30, %v1384_v4 }
 0x573   : > { %v1485_v48 = vpop.f32.mrf.mxu1 }
 0x574   : > { %v1486_v5 = vadd.f32 %v1485_v48, %v1389_v49 }
 0x575   : > { %v1487_v52 = vpop.f32.mrf.mxu1 }
 0x576   : > { %v1488_v10 = vadd.f32 %v1487_v52, %v1389_v49 }
 0x577   : > { %v1491_v1 = vpop.f32.mrf.mxu1 }
 0x578   : > { %v1492_v57 = vadd.f32 %v1491_v1, %v1394_v36 }
 0x579   : > { %v1493_v40 = vpop.f32.mrf.mxu1 }
 0x57a   : > { %v1494_v50 = vadd.f32 %v1493_v40, %v1394_v36 }
 0x57b   : > { %v1497_v51 = vpop.f32.mrf.mxu1 }
 0x57c   : > { %v1498_v55 = vadd.f32 %v1497_v51, %v1399_v34 }
 0x57d   : > { %v1499_v41 = vpop.f32.mrf.mxu1 }
 0x57e   : > { %v1500_v53 = vadd.f32 %v1499_v41, %v1399_v34 }
 0x580   : > { %1607 = vmatprep.subr.mxu0 %v1500_v53 }
 0x581   : > { %1608 = vmatpush1.msra.mxu0 %v1498_v55 }
 0x582   : > { %1609 = vmatprep.subr.mxu0 %v1494_v50 }
 0x583   : > { %1610 = vmatpush1.msra.mxu0 %v1492_v57 }
 0x584   : > { %1611 = vmatprep.subr.mxu0 %v1488_v10 }
 0x585   : > { %1612 = vmatpush1.msra.mxu0 %v1486_v5 }
 0x586   : > { %1613 = vmatprep.subr.mxu0 %v1482_v42 }
 0x587   : > { %1614 = vmatpush1.msra.mxu0 %v1480_v56 }
 0x588   : > { %3139 = vmatmul.mubr.msk.f32.vlgmr.msra.gmra.mxu0 %vm1558_vm13, %v1502_v62 }
 0x589   : > { %1653 = vmatprep.mubr.f32.mxu0 %v5566_v19 }
 0x58c   : > { %3140 = vmatmul.mubr.msk.f32.gmra.mxu0 %vm1558_vm13, %v1503_v12 }
 0x58d   : > { %1659 = vmatprep.mubr.f32.mxu0 %v5566_v19 }
 0x590   : > { %3141 = vmatmul.mubr.msk.f32.gmra.mxu0 %vm1558_vm13, %v1504_v6 }
 0x591   : > { %1665 = vmatprep.mubr.f32.mxu0 %v5566_v19 }
 0x594   : > { %3142 = vmatmul.mubr.msk.f32.gmra.mxu0 %vm1558_vm13, %v1505_v9 }
 0x595   : > { %1671 = vmatprep.mubr.f32.mxu0 %v5566_v19 }
 0x598   : > { %3143 = vmatmul.mubr.msk.f32.gmra.mxu0 %vm1558_vm13, %v1506_v8 }
 0x599   : > { %1677 = vmatprep.mubr.f32.mxu0 %v5566_v19 }
 0x59c   : > { %3144 = vmatmul.mubr.msk.f32.gmra.mxu0 %vm1558_vm13, %v1507_v17 }
 0x59d   : > { %1683 = vmatprep.mubr.f32.mxu0 %v5566_v19 }
 0x5a0   : > { %3145 = vmatmul.mubr.msk.f32.gmra.mxu0 %vm1558_vm13, %v1508_v23 }
 0x5a1   : > { %1689 = vmatprep.mubr.f32.mxu0 %v5566_v19 }
 0x5a4   : > { %3146 = vmatmul.mubr.msk.f32.gmra.mxu0 %vm1558_vm13, %v1509_v22 }
 0x648   : > { %v1649_v58 = vpop.f32.mrf.mxu0 }
 0x649   : > { %v1650_v45 = vadd.f32 %v1649_v58, %v1521_v15 }
 0x64a   : > { %v1651_v7 = vpop.f32.mrf.mxu0 }
 0x64b   : > { %v1696_v29 = vmul.f32 0.2, %v1650_v45  ;;  %v1652_v46 = vadd.f32 %v1651_v7, %v1521_v15 }
 0x64c   : > { %v1655_v35 = vpop.f32.mrf.mxu0 }
 0x64d   : > { %v4004_v60 = vmax.f32 %v1650_v45, %v1696_v29  ;;  %v1697_v44 = vmul.f32 0.2, %v1652_v46  ;;  %v1656_v59 = vadd.f32 %v1655_v35, %v1526_v37 }
 0x64e   : > { %v1657_v0 = vpop.f32.mrf.mxu0 }
 0x64f   : > { %5630 = vst [vmem:[#allocation15_spill] sm:$0xff] %v4004_v60  ;;  %v4006_v31 = vmax.f32 %v1652_v46, %v1697_v44  ;;  %1807 = vrot.lane.b32.xlu0 %v4004_v60, %s5615_s19  ;;  %v1658_v27 = vadd.f32 %v1657_v0, %v1526_v37  ;;  %v1698_v32 = vmul.f32 0.2, %v1656_v59 }
 0x650   : > { %v1661_v2 = vpop.f32.mrf.mxu0 }
 0x651   : > { %5631 = vst [vmem:[#allocation16_spill] sm:$0xff] %v4006_v31  ;;  %1823 = vrot.lane.b32.xlu1 %v4006_v31, %s5615_s19  ;;  %v1699_v43 = vmul.f32 0.2, %v1658_v27  ;;  %v4026_v54 = vmax.f32 %v1656_v59, %v1698_v32  ;;  %v1662_v14 = vadd.f32 %v1661_v2, %v1531_v47 }
 0x652   : > { %v1663_v25 = vpop.f32.mrf.mxu0 }
 0x653   : > { %1728 = vrot.lane.b32.xlu0 %v4004_v60, %s3422_s22  ;;  %5632 = vst [vmem:[#allocation17_spill] sm:$0xff] %v4026_v54  ;;  %v4030_v38 = vmax.f32 %v1658_v27, %v1699_v43  ;;  %v1664_v39 = vadd.f32 %v1663_v25, %v1531_v47  ;;  %v1700_v33 = vmul.f32 0.2, %v1662_v14 }
 0x654   : > { %v1667_v13 = vpop.f32.mrf.mxu0 }
 0x655   : > { %1744 = vrot.lane.b32.xlu1 %v4006_v31, %s3422_s22  ;;  %5633 = vst [vmem:[#allocation18_spill] sm:$0xff] %v4030_v38  ;;  %v1701_v3 = vmul.f32 0.2, %v1664_v39  ;;  %v4050_v61 = vmax.f32 %v1662_v14, %v1700_v33  ;;  %v1668_v63 = vadd.f32 %v1667_v13, %v1536_v11 }
 0x656   : > { %v1669_v20 = vpop.f32.mrf.mxu0 }
 0x657   : > { %2070 = vrot.lane.b32.xlu0 %v4004_v60, %s3423_s24  ;;  %5634 = vst [vmem:[#allocation19_spill] sm:$0xff] %v4050_v61  ;;  %v4054_v21 = vmax.f32 %v1664_v39, %v1701_v3  ;;  %v1702_v24 = vmul.f32 0.2, %v1668_v63  ;;  %v1670_v34 = vadd.f32 %v1669_v20, %v1536_v11 }
 0x658   : > { %v1673_v36 = vpop.f32.mrf.mxu0 }
 0x659   : > { %2086 = vrot.lane.b32.xlu1 %v4006_v31, %s3423_s24  ;;  %5635 = vst [vmem:[#allocation20_spill] sm:$0xff] %v4054_v21  ;;  %v4076_v30 = vmax.f32 %v1668_v63, %v1702_v24  ;;  %v1703_v48 = vmul.f32 0.2, %v1670_v34  ;;  %v1674_v1 = vadd.f32 %v1673_v36, %v4002_v18 }
 0x65a   : > { %v1675_v51 = vpop.f32.mrf.mxu0 }
 0x65b   : > { %1963 = vrot.lane.b32.xlu0 %v4004_v60, %s3424_s25  ;;  %5636 = vst [vmem:[#allocation21_spill] sm:$0xff] %v4076_v30  ;;  %v4082_v52 = vmax.f32 %v1670_v34, %v1703_v48  ;;  %v1704_v40 = vmul.f32 0.2, %v1674_v1  ;;  %v1676_v41 = vadd.f32 %v1675_v51, %v4002_v18 }
 0x65c   : > { %v1679_v55 = vpop.f32.mrf.mxu0 }
 0x65d   : > { %1979 = vrot.lane.b32.xlu1 %v4006_v31, %s3424_s25  ;;  %5637 = vst [vmem:[#allocation22_spill] sm:$0xff] %v4082_v52  ;;  %v4103_v49 = vmax.f32 %v1674_v1, %v1704_v40  ;;  %v1705_v53 = vmul.f32 0.2, %v1676_v41  ;;  %v1680_v57 = vadd.f32 %v1679_v55, %v4000_v28 }
 0x65e   : > { %v1681_v5 = vpop.f32.mrf.mxu0 }
 0x65f   : > { %1885 = vrot.lane.b32.xlu0 %v4004_v60, %s3425_s15  ;;  %5638 = vst [vmem:[#allocation23_spill] sm:$0xff] %v4103_v49  ;;  %v4116_v50 = vmax.f32 %v1676_v41, %v1705_v53  ;;  %v1706_v10 = vmul.f32 0.2, %v1680_v57  ;;  %v1682_v56 = vadd.f32 %v1681_v5, %v4000_v28 }
 0x660   : > { %v1685_v42 = vpop.f32.mrf.mxu0 }
 0x661   : > { %1901 = vrot.lane.b32.xlu1 %v4006_v31, %s3425_s15  ;;  %5639 = vst [vmem:[#allocation24_spill] sm:$0xff] %v4116_v50  ;;  %v4129_v4 = vmax.f32 %v1680_v57, %v1706_v10  ;;  %v1686_v62 = vadd.f32 %v1685_v42, %v3998_v16  ;;  %v1707_v6 = vmul.f32 0.2, %v1682_v56 }
 0x662   : > { %v1687_v45 = vpop.f32.mrf.mxu0 }
 0x663   : > { %1809 = vrot.lane.b32.xlu0 %v4026_v54, %s5615_s19  ;;  %5640 = vst [vmem:[#allocation25_spill] sm:$0xff] %v4129_v4  ;;  %v1708_v8 = vmul.f32 0.2, %v1686_v62  ;;  %v4157_v23 = vmax.f32 %v1682_v56, %v1707_v6  ;;  %v1688_v59 = vadd.f32 %v1687_v45, %v3998_v16 }
 0x664   : > { %v1691_v46 = vpop.f32.mrf.mxu0 }
 0x665   : > { %1825 = vrot.lane.b32.xlu1 %v4030_v38, %s5615_s19  ;;  %5641 = vst [vmem:[#allocation26_spill] sm:$0xff] %v4157_v23  ;;  %v4163_v28 = vmax.f32 %v1686_v62, %v1708_v8  ;;  %v1692_v44 = vadd.f32 %v1691_v46, %v3996_v26  ;;  %v1709_v2 = vmul.f32 0.2, %v1688_v59 }
 0x666   : > { %v1693_v36 = vpop.f32.mrf.mxu0 }
 0x667   : > { %1730 = vrot.lane.b32.xlu0 %v4026_v54, %s3422_s22  ;;  %5642 = vst [vmem:[#allocation27_spill] sm:$0xff] %v4163_v28  ;;  %v1710_v37 = vmul.f32 0.2, %v1692_v44  ;;  %v4221_v14 = vmax.f32 %v1688_v59, %v1709_v2  ;;  %v1694_v40 = vadd.f32 %v1693_v36, %v3996_v26 }
 0x669   : > { %1746 = vrot.lane.b32.xlu1 %v4030_v38, %s3422_s22  ;;  %v4207_v32 = vmax.f32 %v1692_v44, %v1710_v37  ;;  %5649 = vst [vmem:[#allocation34_spill] sm:$0xff] %v4221_v14  ;;  %v1711_v53 = vmul.f32 0.2, %v1694_v40 }
 0x66b   : > { %2072 = vrot.lane.b32.xlu0 %v4026_v54, %s3423_s24  ;;  %5647 = vst [vmem:[#allocation32_spill] sm:$0xff] %v4207_v32  ;;  %v4280_v57 = vmax.f32 %v1694_v40, %v1711_v53 }
 0x66d   : > { %2088 = vrot.lane.b32.xlu1 %v4030_v38, %s3423_s24  ;;  %5660 = vst [vmem:[#allocation45_spill] sm:$0xff] %v4280_v57 }
 0x66f   : > { %1965 = vrot.lane.b32.xlu0 %v4026_v54, %s3424_s25 }
 0x671   : > { %1981 = vrot.lane.b32.xlu1 %v4030_v38, %s3424_s25 }
 0x673   : > { %1887 = vrot.lane.b32.xlu0 %v4026_v54, %s3425_s15 }
 0x675   : > { %1903 = vrot.lane.b32.xlu1 %v4030_v38, %s3425_s15 }
 0x677   : > { %1811 = vrot.lane.b32.xlu0 %v4050_v61, %s5615_s19 }
 0x679   : > { %1827 = vrot.lane.b32.xlu1 %v4054_v21, %s5615_s19 }
 0x67b   : > { %1732 = vrot.lane.b32.xlu0 %v4050_v61, %s3422_s22 }
 0x67d   : > { %1748 = vrot.lane.b32.xlu1 %v4054_v21, %s3422_s22 }
 0x67f   : > { %2074 = vrot.lane.b32.xlu0 %v4050_v61, %s3423_s24 }
 0x681   : > { %2090 = vrot.lane.b32.xlu1 %v4054_v21, %s3423_s24 }
 0x683   : > { %1967 = vrot.lane.b32.xlu0 %v4050_v61, %s3424_s25 }
 0x685   : > { %1983 = vrot.lane.b32.xlu1 %v4054_v21, %s3424_s25 }
 0x687   : > { %1889 = vrot.lane.b32.xlu0 %v4050_v61, %s3425_s15 }
 0x689   : > { %1905 = vrot.lane.b32.xlu1 %v4054_v21, %s3425_s15 }
 0x68b   : > { %2230 = vrot.lane.b32.xlu0 %v4050_v61, %s3426_s28 }
 0x68d   : > { %1813 = vrot.lane.b32.xlu1 %v4076_v30, %s5615_s19 }
 0x68f   : > { %1734 = vrot.lane.b32.xlu0 %v4076_v30, %s3422_s22 }
 0x691   : > { %1829 = vrot.lane.b32.xlu1 %v4082_v52, %s5615_s19 }
 0x693   : > { %2076 = vrot.lane.b32.xlu0 %v4076_v30, %s3423_s24 }
 0x695   : > { %1750 = vrot.lane.b32.xlu1 %v4082_v52, %s3422_s22 }
 0x697   : > { %1969 = vrot.lane.b32.xlu0 %v4076_v30, %s3424_s25 }
 0x699   : > { %2092 = vrot.lane.b32.xlu1 %v4082_v52, %s3423_s24 }
 0x69b   : > { %1891 = vrot.lane.b32.xlu0 %v4076_v30, %s3425_s15 }
 0x69d   : > { %1985 = vrot.lane.b32.xlu1 %v4082_v52, %s3424_s25 }
 0x69f   : > { %2232 = vrot.lane.b32.xlu0 %v4076_v30, %s3426_s28 }
 0x6a1   : > { %1907 = vrot.lane.b32.xlu1 %v4082_v52, %s3425_s15 }
 0x6a3   : > { %1736 = vrot.lane.b32.xlu0 %v4103_v49, %s3422_s22 }
 0x6a5   : > { %2248 = vrot.lane.b32.xlu1 %v4082_v52, %s3426_s28 }
 0x6a7   : > { %2078 = vrot.lane.b32.xlu0 %v4103_v49, %s3423_s24 }
 0x6a9   : > { %1815 = vrot.lane.b32.xlu1 %v4103_v49, %s5615_s19 }
 0x6ab   : > { %1971 = vrot.lane.b32.xlu0 %v4103_v49, %s3424_s25 }
 0x6ad   : > { %1831 = vrot.lane.b32.xlu1 %v4116_v50, %s5615_s19 }
 0x6af   : > { %1893 = vrot.lane.b32.xlu0 %v4103_v49, %s3425_s15 }
 0x6b1   : > { %1752 = vrot.lane.b32.xlu1 %v4116_v50, %s3422_s22 }
 0x6b3   : > { %2234 = vrot.lane.b32.xlu0 %v4103_v49, %s3426_s28 }
 0x6b5   : > { %2094 = vrot.lane.b32.xlu1 %v4116_v50, %s3423_s24 }
 0x6b7   : > { %1738 = vrot.lane.b32.xlu0 %v4129_v4, %s3422_s22 }
 0x6b9   : > { %1987 = vrot.lane.b32.xlu1 %v4116_v50, %s3424_s25 }
 0x6bb   : > { %2080 = vrot.lane.b32.xlu0 %v4129_v4, %s3423_s24 }
 0x6bd   : > { %1909 = vrot.lane.b32.xlu1 %v4116_v50, %s3425_s15 }
 0x6bf   : > { %1973 = vrot.lane.b32.xlu0 %v4129_v4, %s3424_s25 }
 0x6c1   : > { %2250 = vrot.lane.b32.xlu1 %v4116_v50, %s3426_s28  ;;  %v4147_v12 = vpop.permute.xlu0 %1807 }
 0x6c3   : > { %v4149_v9 = vpop.permute.xlu1 %1823  ;;  %1895 = vrot.lane.b32.xlu0 %v4129_v4, %s3425_s15 }
 0x6c5   : > { %1817 = vrot.lane.b32.xlu1 %v4129_v4, %s5615_s19  ;;  %v4155_v17 = vpop.permute.xlu0 %1728 }
 0x6c7   : > { %v4159_v22 = vpop.permute.xlu1 %1744  ;;  %2236 = vrot.lane.b32.xlu0 %v4129_v4, %s3426_s28 }
 0x6c9   : > { %1833 = vrot.lane.b32.xlu1 %v4157_v23, %s5615_s19  ;;  %v4167_v18 = vpop.permute.xlu0 %2070 }
 0x6cb   : > { %v4169_v15 = vpop.permute.xlu1 %2086  ;;  %1740 = vrot.lane.b32.xlu0 %v4163_v28, %s3422_s22 }
 0x6cd   : > { %1754 = vrot.lane.b32.xlu1 %v4157_v23, %s3422_s22  ;;  %v4175_v58 = vpop.permute.xlu0 %1963 }
 0x6ce   : > { %5643 = vst [vmem:[#allocation28_spill] sm:$0xff] %v4175_v58 }
 0x6cf   : > { %v4177_v7 = vpop.permute.xlu1 %1979  ;;  %2082 = vrot.lane.b32.xlu0 %v4163_v28, %s3423_s24 }
 0x6d0   : > { %5644 = vst [vmem:[#allocation29_spill] sm:$0xff] %v4177_v7 }
 0x6d1   : > { %2096 = vrot.lane.b32.xlu1 %v4157_v23, %s3423_s24  ;;  %v4183_v29 = vpop.permute.xlu0 %1885 }
 0x6d2   : > { %5645 = vst [vmem:[#allocation30_spill] sm:$0xff] %v4183_v29  ;;  %v5578_v29 = vlaneseq }
 0x6d3   : > { %v4185_v11 = vpop.permute.xlu1 %1901  ;;  %1975 = vrot.lane.b32.xlu0 %v4163_v28, %s3424_s25 }
 0x6d4   : > { %5646 = vst [vmem:[#allocation31_spill] sm:$0xff] %v4185_v11 }
 0x6d5   : > { %1989 = vrot.lane.b32.xlu1 %v4157_v23, %s3424_s25  ;;  %v4192_v47 = vpop.permute.xlu0 %1809 }
 0x6d7   : > { %v4194_v35 = vpop.permute.xlu1 %1825  ;;  %1897 = vrot.lane.b32.xlu0 %v4163_v28, %s3425_s15 }
 0x6d9   : > { %1911 = vrot.lane.b32.xlu1 %v4157_v23, %s3425_s15  ;;  %v4200_v0 = vpop.permute.xlu0 %1730 }
 0x6db   : > { %v4203_v27 = vpop.permute.xlu1 %1746  ;;  %2238 = vrot.lane.b32.xlu0 %v4163_v28, %s3426_s28 }
 0x6dd   : > { %2252 = vrot.lane.b32.xlu1 %v4157_v23, %s3426_s28  ;;  %v4211_v43 = vpop.permute.xlu0 %2072 }
 0x6df   : > { %v4213_v25 = vpop.permute.xlu1 %2088  ;;  %1742 = vrot.lane.b32.xlu0 %v4207_v32, %s3422_s22 }
 0x6e1   : > { %1819 = vrot.lane.b32.xlu1 %v4163_v28, %s5615_s19  ;;  %v4219_v16 = vpop.permute.xlu0 %1965 }
 0x6e2   : > { %5648 = vst [vmem:[#allocation33_spill] sm:$0xff] %v4219_v16  ;;  %v5683_v16 = vlaneseq }
 0x6e3   : > { %v4223_v39 = vpop.permute.xlu1 %1981  ;;  %2084 = vrot.lane.b32.xlu0 %v4207_v32, %s3423_s24 }
 0x6e4   : > { %5650 = vst [vmem:[#allocation35_spill] sm:$0xff] %v4223_v39  ;;  %v1782_v39 = vshrl.u32 %v5683_v16, 7  ;;  %v2870_v16 = vld [vmem:[%s5558_s12 + $0x8] sm:$0xff] }
 0x6e5   : > { %1835 = vrot.lane.b32.xlu1 %v4221_v14, %s5615_s19  ;;  %v4229_v33 = vpop.permute.xlu0 %1887 }
 0x6e6   : > { %5651 = vst [vmem:[#allocation36_spill] sm:$0xff] %v4229_v33  ;;  %v4361_v33 = vand.u32 127, %v5578_v29 }
 0x6e7   : > { %v4231_v3 = vpop.permute.xlu1 %1903  ;;  %1977 = vrot.lane.b32.xlu0 %v4207_v32, %s3424_s25 }
 0x6e8   : > { %5652 = vst [vmem:[#allocation37_spill] sm:$0xff] %v4231_v3  ;;  %vm1995_vm14 = vcmp.lt.s32.totalorder %v4361_v33, 1  ;;  %vm1917_vm15 = vcmp.lt.s32.totalorder %v4361_v33, 15  ;;  %vm2258_vm0 = vcmp.lt.s32.totalorder %v4361_v33, 112  ;;  %vm1839_vm1 = vcmp.lt.s32.totalorder %v4361_v33, 16 }
 0x6e9   : > { %1756 = vrot.lane.b32.xlu1 %v4221_v14, %s3422_s22  ;;  %v4237_v13 = vpop.permute.xlu0 %1811  ;;  %vm1762_vm2 = vcmp.lt.s32.totalorder %v4361_v33, 17  ;;  %vm2102_vm3 = vcmp.lt.s32.totalorder %v4361_v33, 127  ;;  %vm2180_vm4 = vcmp.lt.s32.totalorder %v4361_v33, 113  ;;  %vm2336_vm5 = vcmp.lt.s32.totalorder %v4361_v33, 111  ;;  %v2384_v33 = vld [vmem:[%s5555_s9 + $0x10] sm:$0xff] }
 0x6eb   : > { %v4239_v63 = vpop.permute.xlu1 %1827  ;;  %1899 = vrot.lane.b32.xlu0 %v4207_v32, %s3425_s15 }
 0x6ed   : > { %2098 = vrot.lane.b32.xlu1 %v4221_v14, %s3423_s24  ;;  %v4245_v20 = vpop.permute.xlu0 %1732 }
 0x6ef   : > { %v4247_v24 = vpop.permute.xlu1 %1748  ;;  %2240 = vrot.lane.b32.xlu0 %v4207_v32, %s3426_s28 }
 0x6f1   : > { %1991 = vrot.lane.b32.xlu1 %v4221_v14, %s3424_s25  ;;  %v4253_v34 = vpop.permute.xlu0 %2074 }
 0x6f2   : > { %5653 = vst [vmem:[#allocation38_spill] sm:$0xff] %v4253_v34 }
 0x6f3   : > { %v4255_v48 = vpop.permute.xlu1 %2090  ;;  %2228 = vrot.lane.b32.xlu0 %v4026_v54, %s3426_s28 }
 0x6f4   : > { %5654 = vst [vmem:[#allocation39_spill] sm:$0xff] %v4255_v48 }
 0x6f5   : > { %1913 = vrot.lane.b32.xlu1 %v4221_v14, %s3425_s15  ;;  %v4261_v1 = vpop.permute.xlu0 %1967 }
 0x6f6   : > { %5655 = vst [vmem:[#allocation40_spill] sm:$0xff] %v4261_v1 }
 0x6f7   : > { %v4264_v51 = vpop.permute.xlu1 %1983  ;;  %2226 = vrot.lane.b32.xlu0 %v4004_v60, %s3426_s28 }
 0x6f8   : > { %5656 = vst [vmem:[#allocation41_spill] sm:$0xff] %v4264_v51 }
 0x6f9   : > { %2254 = vrot.lane.b32.xlu1 %v4221_v14, %s3426_s28  ;;  %v4270_v41 = vpop.permute.xlu0 %1889 }
 0x6fa   : > { %5657 = vst [vmem:[#allocation42_spill] sm:$0xff] %v4270_v41 }
 0x6fb   : > { %v4272_v55 = vpop.permute.xlu1 %1905  ;;  %2162 = vrot.lane.b32.xlu0 %v4207_v32, %s3427_s20 }
 0x6fc   : > { %5658 = vst [vmem:[#allocation43_spill] sm:$0xff] %v4272_v55 }
 0x6fd   : > { %1821 = vrot.lane.b32.xlu1 %v4207_v32, %s5615_s19  ;;  %v4278_v26 = vpop.permute.xlu0 %2230 }
 0x6fe   : > { %5659 = vst [vmem:[#allocation44_spill] sm:$0xff] %v4278_v26 }
 0x6ff   : > { %v4282_v10 = vpop.permute.xlu1 %1813  ;;  %2160 = vrot.lane.b32.xlu0 %v4163_v28, %s3427_s20 }
 0x701   : > { %1837 = vrot.lane.b32.xlu1 %v4280_v57, %s5615_s19  ;;  %v4288_v5 = vpop.permute.xlu0 %1734 }
 0x703   : > { %v4290_v42 = vpop.permute.xlu1 %1829  ;;  %2318 = vrot.lane.b32.xlu0 %v4207_v32, %s3428_s7 }
 0x705   : > { %2246 = vrot.lane.b32.xlu1 %v4054_v21, %s3426_s28  ;;  %v4296_v56 = vpop.permute.xlu0 %2076 }
 0x707   : > { %v4298_v62 = vpop.permute.xlu1 %1750  ;;  %2158 = vrot.lane.b32.xlu0 %v4129_v4, %s3427_s20 }
 0x709   : > { %2244 = vrot.lane.b32.xlu1 %v4030_v38, %s3426_s28  ;;  %v4304_v6 = vpop.permute.xlu0 %1969 }
 0x70a   : > { %5661 = vst [vmem:[#allocation46_spill] sm:$0xff] %v4304_v6 }
 0x70b   : > { %v4306_v8 = vpop.permute.xlu1 %2092  ;;  %2316 = vrot.lane.b32.xlu0 %v4163_v28, %s3428_s7  ;;  %v2869_v28 = vld [vmem:[%s5558_s12] sm:$0xff] }
 0x70d   : > { %2242 = vrot.lane.b32.xlu1 %v4006_v31, %s3426_s28  ;;  %v4312_v45 = vpop.permute.xlu0 %1891 }
 0x70e   : > { %5662 = vst [vmem:[#allocation47_spill] sm:$0xff] %v4312_v45 }
 0x70f   : > { %v4314_v46 = vpop.permute.xlu1 %1985  ;;  %2156 = vrot.lane.b32.xlu0 %v4103_v49, %s3427_s20 }
 0x710   : > { %5663 = vst [vmem:[#allocation48_spill] sm:$0xff] %v4314_v46 }
 0x711   : > { %1758 = vrot.lane.b32.xlu1 %v4280_v57, %s3422_s22  ;;  %v4320_v44 = vpop.permute.xlu0 %2232 }
 0x712   : > { %5664 = vst [vmem:[#allocation49_spill] sm:$0xff] %v4320_v44 }
 0x713   : > { %v4322_v37 = vpop.permute.xlu1 %1907  ;;  %2314 = vrot.lane.b32.xlu0 %v4129_v4, %s3428_s7  ;;  %v2423_v4 = vld [vmem:[%s5556_s10 + $0x8] sm:$0xff] }
 0x714   : > { %5665 = vst [vmem:[#allocation50_spill] sm:$0xff] %v4322_v37 }
 0x715   : > { %2176 = vrot.lane.b32.xlu1 %v4221_v14, %s3427_s20  ;;  %v4328_v59 = vpop.permute.xlu0 %1736 }
 0x717   : > { %v4330_v2 = vpop.permute.xlu1 %2248  ;;  %2154 = vrot.lane.b32.xlu0 %v4076_v30, %s3427_s20 }
 0x718   : > { %5666 = vst [vmem:[#allocation51_spill] sm:$0xff] %v4330_v2 }
 0x719   : > { %2174 = vrot.lane.b32.xlu1 %v4157_v23, %s3427_s20  ;;  %v4336_v36 = vpop.permute.xlu0 %2078 }
 0x71b   : > { %v4338_v40 = vpop.permute.xlu1 %1815  ;;  %2312 = vrot.lane.b32.xlu0 %v4103_v49, %s3428_s7 }
 0x71d   : > { %2100 = vrot.lane.b32.xlu1 %v4280_v57, %s3423_s24  ;;  %v1972_v53 = vpop.permute.xlu0 %1971 }
 0x71f   : > { %v4344_v19 = vpop.permute.xlu1 %1831  ;;  %2152 = vrot.lane.b32.xlu0 %v4050_v61, %s3427_s20 }
 0x721   : > { %1993 = vrot.lane.b32.xlu1 %v4280_v57, %s3424_s25  ;;  %v1894_v26 = vpop.permute.xlu0 %1893 }
 0x723   : > { %v4350_v2 = vpop.permute.xlu1 %1752  ;;  %2310 = vrot.lane.b32.xlu0 %v4076_v30, %s3428_s7 }
 0x725   : > { %2332 = vrot.lane.b32.xlu1 %v4221_v14, %s3428_s7  ;;  %v2235_v44 = vpop.permute.xlu0 %2234 }
 0x727   : > { %v4356_v11 = vpop.permute.xlu1 %2094  ;;  %2150 = vrot.lane.b32.xlu0 %v4026_v54, %s3427_s20 }
 0x729   : > { %2172 = vrot.lane.b32.xlu1 %v4116_v50, %s3427_s20  ;;  %v4365_v3 = vpop.permute.xlu0 %1738 }
 0x72b   : > { %v1988_v41 = vpop.permute.xlu1 %1987  ;;  %2308 = vrot.lane.b32.xlu0 %v4050_v61, %s3428_s7 }
 0x72c   : > { %v4372_v55 = vsel %vm1995_vm14, %v1972_v53, %v1988_v41  ;;  %v4376_v30 = vsel %vm1995_vm14, %v1988_v41, %v1972_v53 }
 0x72d   : > { %5667 = vst [vmem:[#allocation52_spill] sm:$0xff] %v4372_v55  ;;  %5668 = vst [vmem:[#allocation53_spill] sm:$0xff] %v4376_v30  ;;  %2330 = vrot.lane.b32.xlu1 %v4157_v23, %s3428_s7  ;;  %v4380_v29 = vpop.permute.xlu0 %2080 }
 0x72f   : > { %v1910_v45 = vpop.permute.xlu1 %1909  ;;  %2148 = vrot.lane.b32.xlu0 %v4004_v60, %s3427_s20 }
 0x730   : > { %v4387_v61 = vsel %vm1917_vm15, %v1894_v26, %v1910_v45  ;;  %v4391_v37 = vsel %vm1917_vm15, %v1910_v45, %v1894_v26  ;;  %v2383_v45 = vld [vmem:[%s5555_s9 + $0x8] sm:$0xff] }
 0x731   : > { %5669 = vst [vmem:[#allocation54_spill] sm:$0xff] %v4387_v61  ;;  %5670 = vst [vmem:[#allocation55_spill] sm:$0xff] %v4391_v37  ;;  %1915 = vrot.lane.b32.xlu1 %v4280_v57, %s3425_s15  ;;  %v4395_v41 = vpop.permute.xlu0 %1973  ;;  %2558 = vmatprep.mubr.f32.mxu1 %v2383_v45 }
 0x733   : > { %v2251_v53 = vpop.permute.xlu1 %2250  ;;  %2306 = vrot.lane.b32.xlu0 %v4026_v54, %s3428_s7  ;;  %v2425_v54 = vld [vmem:[%s5556_s10 + $0x18] sm:$0xff] }
 0x734   : > { %v4402_v49 = vsel %vm2258_vm0, %v2235_v44, %v2251_v53  ;;  %v4406_v61 = vsel %vm2258_vm0, %v2251_v53, %v2235_v44 }
 0x735   : > { %5671 = vst [vmem:[#allocation56_spill] sm:$0xff] %v4402_v49  ;;  %5672 = vst [vmem:[#allocation57_spill] sm:$0xff] %v4406_v61  ;;  %2170 = vrot.lane.b32.xlu1 %v4082_v52, %s3427_s20  ;;  %v1896_v26 = vpop.permute.xlu0 %1895  ;;  %v2429_v49 = vld [vmem:[%s5556_s10 + $0x38] sm:$0xff]  ;;  %v2427_v61 = vld [vmem:[%s5556_s10 + $0x28] sm:$0xff] }
 0x737   : > { %v4413_v37 = vpop.permute.xlu1 %1817  ;;  %2304 = vrot.lane.b32.xlu0 %v4004_v60, %s3428_s7 }
 0x739   : > { %2328 = vrot.lane.b32.xlu1 %v4116_v50, %s3428_s7  ;;  %v2237_v44 = vpop.permute.xlu0 %2236 }
 0x73b   : > { %v4422_v53 = vpop.permute.xlu1 %1833  ;;  %2467 = vperm.xlu0 %3247, %v2429_v49  }
 0x73d   : > { %2168 = vrot.lane.b32.xlu1 %v4054_v21, %s3427_s20  ;;  %v4429_v60 = vpop.permute.xlu0 %1740 }
 0x73f   : > { %v4431_v45 = vpop.permute.xlu1 %1754  ;;  %2457 = vperm.xlu0 %3247, %v2427_v61  }
 0x741   : > { %2256 = vrot.lane.b32.xlu1 %v4280_v57, %s3426_s28  ;;  %v4438_v49 = vpop.permute.xlu0 %2082  ;;  %s3429_s28 = smov [#allocation7]  }
 0x743   : > { %v4440_v50 = vpop.permute.xlu1 %2096  ;;  %2447 = vperm.xlu0 %3247, %v2425_v54  }
 0x745   : > { %2326 = vrot.lane.b32.xlu1 %v4082_v52, %s3428_s7  ;;  %v4447_v61 = vpop.permute.xlu0 %1975 }
 0x747   : > { %v4449_v14 = vpop.permute.xlu1 %1989  ;;  %2437 = vperm.xlu0 %3247, %v2423_v4   ;;  %v2871_v4 = vld [vmem:[%s5558_s12 + $0x10] sm:$0xff] }
 0x749   : > { %2166 = vrot.lane.b32.xlu1 %v4030_v38, %s3427_s20  ;;  %v4456_v54 = vpop.permute.xlu0 %1897 }
 0x74a   : > { %5673 = vst [vmem:[#allocation58_spill] sm:$0xff] %v4456_v54 }
 0x74b   : > { %v1912_v32 = vpop.permute.xlu1 %1911  ;;  %2875 = vperm.xlu0 %3247, %v2869_v28  }
 0x74c   : > { %v4460_v23 = vsel %vm1917_vm15, %v1896_v26, %v1912_v32  ;;  %v4464_v52 = vsel %vm1917_vm15, %v1912_v32, %v1896_v26 }
 0x74d   : > { %5674 = vst [vmem:[#allocation59_spill] sm:$0xff] %v4460_v23  ;;  %5675 = vst [vmem:[#allocation60_spill] sm:$0xff] %v4464_v52  ;;  %2178 = vrot.lane.b32.xlu1 %v4280_v57, %s3427_s20  ;;  %v4471_v58 = vpop.permute.xlu0 %2238  ;;  %v2428_v52 = vld [vmem:[%s5556_s10 + $0x30] sm:$0xff] }
 0x74e   : > { %5676 = vst [vmem:[#allocation61_spill] sm:$0xff] %v4471_v58 }
 0x74f   : > { %v2253_v54 = vpop.permute.xlu1 %2252  ;;  %2885 = vperm.xlu0 %3247, %v2871_v4  }
 0x750   : > { %v4475_v28 = vsel %vm2258_vm0, %v2237_v44, %v2253_v54  ;;  %v4479_v23 = vsel %vm2258_vm0, %v2253_v54, %v2237_v44  ;;  %v2385_v44 = vld [vmem:[%s5555_s9 + $0x18] sm:$0xff] }
 0x751   : > { %5677 = vst [vmem:[#allocation62_spill] sm:$0xff] %v4475_v28  ;;  %5678 = vst [vmem:[#allocation63_spill] sm:$0xff] %v4479_v23  ;;  %2334 = vrot.lane.b32.xlu1 %v4280_v57, %s3428_s7  ;;  %v4483_v32 = vpop.permute.xlu0 %1742  ;;  %2671 = vmatprep.mubr.f32.mxu0 %v2385_v44  ;;  %v2426_v44 = vld [vmem:[%s5556_s10 + $0x20] sm:$0xff] }
 0x753   : > { %v1820_v26 = vpop.permute.xlu1 %1819 }
 0x755   : > { %2324 = vrot.lane.b32.xlu1 %v4054_v21, %s3428_s7  ;;  %v4487_v58 = vpop.permute.xlu0 %2084 }
 0x757   : > { %v1836_v4 = vpop.permute.xlu1 %1835 }
 0x758   : > { %v1846_v55 = vsel %vm1839_vm1, %v1820_v26, %v1836_v4  ;;  %v1854_v6 = vsel %vm1839_vm1, %v1836_v4, %v1820_v26  ;;  %v1844_v4 = vsel %vm1839_vm1, %v4338_v40, %v4344_v19 }
 0x759   : > { %2164 = vrot.lane.b32.xlu1 %v4006_v31, %s3427_s20  ;;  %v4494_v54 = vpop.permute.xlu0 %1977  ;;  %s3173_s20 = sshll.u32 %s3527_s17, 10 }
 0x75a   : > { %s5500_s22 = scalar_lea.hbm %s5560_s14, %s3173_s20 }
 0x75b   : > { %v4496_v28 = vpop.permute.xlu1 %1756 }
 0x75d   : > { %2322 = vrot.lane.b32.xlu1 %v4030_v38, %s3428_s7  ;;  %v4502_v21 = vpop.permute.xlu0 %1899 }
 0x75e   : > { %5679 = vst [vmem:[#allocation64_spill] sm:$0xff] %v4502_v21 }
 0x75f   : > { %v4500_v23 = vpop.permute.xlu1 %2098 }
 0x761   : > { %2320 = vrot.lane.b32.xlu1 %v4006_v31, %s3428_s7  ;;  %v4514_v7 = vpop.permute.xlu0 %2240  ;;  %v2424_v31 = vld [vmem:[%s5556_s10 + $0x10] sm:$0xff]  ;;  %s488_s7 = sand.u32 1, %s3405_s30  }
 0x762   : > { %5680 = vst [vmem:[#allocation65_spill] sm:$0xff] %v4514_v7  ;;  %v4532_v7 = vsub.s32 0, %v1782_v39  ;;  %s3116_s25 = sshll.u32 %s488_s7, 6  ;;  %s5505_s17 = scalar_lea.sflag [#allocation4], %s488_s7 }
 0x763   : > { %v4509_v57 = vpop.permute.xlu1 %1991  ;;  %s5477_s15 = scalar_lea.vmem [#allocation7], %s3116_s25  ;;  %s3349_s25 = sshll.u32 %s3429_s28, 4  ;;  %s3350_s25 = int_to_ptr.vmem [resolvable:$false] %s3349_s25 }
 0x764   : > { %s3024_s26 = sshll.u32 %s5477_s15, 4  ;;  %s3351_s19 = scalar_lea.vmem %s3350_s25, 2048  ;;  %s5493_s26 = int_to_ptr.vmem [resolvable:$true] %s3024_s26 }
 0x765   : > { %2462 = vperm.xlu1 %3248, %v2428_v52   ;;  %v4524_v30 = vpop.permute.xlu0 %2228  ;;  %v2422_v52 = vld [vmem:[%s5556_s10] sm:$0xff]  ;;  %s3345_s24 = scalar_lea.vmem %s5493_s26, 1024  ;;  %p3352_p11 = scmp.lt.s32.totalorder %s5493_s26, %s3350_s25 }
 0x766   : > { %5684 = vst [vmem:[#allocation68_spill] sm:$0xff] %v4524_v30  ;;  %p3346_p10 = scmp.ne.s32.totalorder %s5493_s26, %s3345_s24  ;;  %p3353_p0 = scmp.lt.s32.totalorder %s3351_s19, %s3345_s24 }
 0x767   : > { %v4516_v38 = vpop.permute.xlu1 %1913 }
 0x768   : > { %5681 = vst [vmem:[#allocation66_spill] sm:$0xff] %v4516_v38  ;;  %v4534_v38 = vsub.s32 1, %v1782_v39  ;;  %p3347_p12 = pnand %p3346_p10, %p3544_p5  ;;  %p3354_p1 = por %p3353_p0, %p3352_p11 }
 0x769   : > { %2452 = vperm.xlu1 %3248, %v2426_v44   ;;  %v3147_v44 = vld [vmem:[%s5559_s13 + $0x2] sm:$0x3] }
 0x76a   : > { %v1866_v30 = vrot.slane %v3147_v44, %v4534_v38  ;;  %p3348_p8 = pneg %p3347_p12 }
 0x76b   : > { %v4521_v21 = vpop.permute.xlu1 %2254 }
 0x76c   : > { %5682 = vst [vmem:[#allocation67_spill] sm:$0xff] %v4521_v21  ;;  %v4542_v21 = vpop.permute.xlu0 %2226  ;;  %p3355_p3 = pnand %p3354_p1, %p3348_p8 }
 0x76d   : > { %2442 = vperm.xlu1 %3248, %v2424_v31   ;;  %v1862_v31 = vrot.slane %v3147_v44, %v4532_v7  ;;  %5685 = vst [vmem:[#allocation69_spill] sm:$0xff] %v4542_v21  ;;  %v1845_v44 = vsel %vm1839_vm1, %v4413_v37, %v4422_v53  ;;  %v2872_v21 = vld [vmem:[%s5558_s12 + $0x18] sm:$0xff] }
 0x76f   : > { %v1822_v1 = vpop.permute.xlu1 %1821 }
 0x770   : > { %v4573_v34 = vpop.permute.xlu0 %2162 }
 0x771   : > { %2432 = vperm.xlu1 %3248, %v2422_v52  }
 0x773   : > { %v1838_v51 = vpop.permute.xlu1 %1837 }
 0x774   : > { %v1847_v39 = vsel %vm1839_vm1, %v1822_v1, %v1838_v51  ;;  %v1855_v52 = vsel %vm1839_vm1, %v1838_v51, %v1822_v1  ;;  %v1853_v1 = vsel %vm1839_vm1, %v4422_v53, %v4413_v37  ;;  %v1882_v51 = vmul.f32 %v1866_v30, %v1846_v55 }
 0x775   : > { %v1883_v46 = vmul.f32 %v1862_v31, %v1855_v52  ;;  %v1884_v48 = vmul.f32 %v1866_v30, %v1847_v39  ;;  %2880 = vperm.xlu1 %3248, %v2870_v16   ;;  %v1881_v16 = vmul.f32 %v1862_v31, %v1854_v6  ;;  %v1852_v39 = vsel %vm1839_vm1, %v4344_v19, %v4338_v40 }
 0x776   : > { %v1880_v52 = vmul.f32 %v1866_v30, %v1845_v44  ;;  %v1879_v55 = vmul.f32 %v1862_v31, %v1853_v1  ;;  %v1851_v6 = vsel %vm1839_vm1, %v4290_v42, %v4282_v10  ;;  %v1878_v19 = vmul.f32 %v1866_v30, %v1844_v4  ;;  %v4601_v1 = vpop.permute.xlu0 %2160  ;;  %v1779_v4 = vld [vmem:[%s5559_s13] sm:$0x3] }
 0x777   : > { %2494 = vmatprep.subr.mxu1 %v1884_v48  ;;  %v4563_v26 = vpop.permute.xlu1 %2246  ;;  %v1843_v48 = vsel %vm1839_vm1, %v4282_v10, %v4290_v42  ;;  %v1877_v37 = vmul.f32 %v1862_v31, %v1852_v39  ;;  %v1850_v40 = vsel %vm1839_vm1, %v4239_v63, %v4237_v13  ;;  %v1841_v10 = vsel %vm1839_vm1, %v4192_v47, %v4194_v35 }
 0x778   : > { %2495 = vmatpush1.msra.mxu1 %v1883_v46  ;;  %v1876_v53 = vmul.f32 %v1866_v30, %v1843_v48  ;;  %v1875_v42 = vmul.f32 %v1862_v31, %v1851_v6  ;;  %v1849_v44 = vsel %vm1839_vm1, %v4194_v35, %v4192_v47  ;;  %v1848_v47 = vsel %vm1839_vm1, %v4149_v9, %v4147_v12 }
 0x779   : > { %2890 = vperm.xlu1 %3248, %v2872_v21   ;;  %2496 = vmatprep.subr.mxu1 %v1882_v51  ;;  %v1842_v21 = vsel %vm1839_vm1, %v4237_v13, %v4239_v63  ;;  %v1840_v63 = vsel %vm1839_vm1, %v4147_v12, %v4149_v9  ;;  %v1872_v35 = vmul.f32 %v1866_v30, %v1841_v10  ;;  %v3151_v9 = vld [vmem:[%s5559_s13 + $0xa] sm:$0x3] }
 0x77a   : > { %2497 = vmatpush1.msra.mxu1 %v1881_v16  ;;  %v1874_v13 = vmul.f32 %v1866_v30, %v1842_v21  ;;  %v1873_v16 = vmul.f32 %v1862_v31, %v1850_v40  ;;  %v1871_v39 = vmul.f32 %v1862_v31, %v1849_v44  ;;  %v4621_v48 = vrot.slane %v1779_v4, %v4534_v38 }
 0x77b   : > { %2498 = vmatprep.subr.mxu1 %v1880_v52  ;;  %v4583_v46 = vpop.permute.xlu1 %2244  ;;  %v4618_v52 = vrot.slane %v1779_v4, %v4532_v7  ;;  %v1870_v6 = vmul.f32 %v1866_v30, %v1840_v63  ;;  %v1869_v12 = vmul.f32 %v1862_v31, %v1848_v47  ;;  %v1769_v21 = vsel %vm1762_vm2, %v4429_v60, %v4496_v28  ;;  %v3149_v31 = vld [vmem:[%s5559_s13 + $0x6] sm:$0x3] }
 0x77c   : > { %2499 = vmatpush1.msra.mxu1 %v1879_v55  ;;  %v1777_v40 = vsel %vm1762_vm2, %v4496_v28, %v4429_v60  ;;  %v1768_v44 = vsel %vm1762_vm2, %v4365_v3, %v4431_v45  ;;  %v4665_v28 = vrot.slane %v3151_v9, %v4532_v7  ;;  %v1776_v63 = vsel %vm1762_vm2, %v4431_v45, %v4365_v3 }
 0x77d   : > { %2500 = vmatprep.subr.mxu1 %v1878_v19  ;;  %v3150_v19 = vld [vmem:[%s5559_s13 + $0x8] sm:$0x3]  ;;  %v1804_v4 = vmul.f32 %v4621_v48, %v1769_v21  ;;  %v4675_v47 = vrot.slane %v3149_v31, %v4532_v7  ;;  %v1775_v45 = vsel %vm1762_vm2, %v4350_v2, %v4328_v59  ;;  %v2103_v21 = vsel %vm2102_vm3, %v4167_v18, %v4169_v15 }
 0x77e   : > { %2501 = vmatpush1.msra.mxu1 %v1877_v37  ;;  %v4661_v60 = vrot.slane %v3150_v19, %v4534_v38 }
 0x77f   : > { %2502 = vmatprep.subr.mxu1 %v1876_v53  ;;  %v4603_v51 = vpop.permute.xlu1 %2242  ;;  %v4646_v53 = vpop.permute.xlu0 %2318 }
 0x780   : > { %2503 = vmatpush1.msra.mxu1 %v1875_v42 }
 0x781   : > { %2504 = vmatprep.subr.mxu1 %v1874_v13  ;;  %v4658_v13 = vrot.slane %v3150_v19, %v4532_v7  ;;  %v1802_v19 = vmul.f32 %v4621_v48, %v1768_v44 }
 0x782   : > { %2505 = vmatpush1.msra.mxu1 %v1873_v16 }
 0x783   : > { %v1759_v55 = vpop.permute.xlu1 %1758  ;;  %2506 = vmatprep.subr.mxu1 %v1872_v35  ;;  %v1767_v35 = vsel %vm1762_vm2, %v4328_v59, %v4350_v2  ;;  %v1766_v59 = vsel %vm1762_vm2, %v4288_v5, %v4298_v62  ;;  %v1801_v2 = vmul.f32 %v4618_v52, %v1776_v63  ;;  %v4749_v63 = vsel %vm2102_vm3, %v4169_v15, %v4167_v18 }
 0x784   : > { %v1770_v37 = vsel %vm1762_vm2, %v4483_v32, %v1759_v55  ;;  %v1778_v30 = vsel %vm1762_vm2, %v1759_v55, %v4483_v32  ;;  %2507 = vmatpush1.msra.mxu1 %v1871_v39  ;;  %v3148_v32 = vld [vmem:[%s5559_s13 + $0x4] sm:$0x3]  ;;  %v4682_v39 = vrot.slane %v3151_v9, %v4534_v38  ;;  %v1803_v55 = vmul.f32 %v4618_v52, %v1777_v40 }
 0x785   : > { %v1805_v10 = vmul.f32 %v4618_v52, %v1778_v30  ;;  %v1806_v42 = vmul.f32 %v4621_v48, %v1770_v37  ;;  %2508 = vmatprep.subr.mxu1 %v1870_v6  ;;  %v4686_v3 = vrot.slane %v3148_v32, %v4532_v7  ;;  %v4693_v6 = vrot.slane %v3149_v31, %v4534_v38 }
 0x786   : > { %2509 = vmatpush1.msra.mxu1 %v1869_v12  ;;  %v1763_v12 = vsel %vm1762_vm2, %v4155_v17, %v4159_v22  ;;  %v1771_v9 = vsel %vm1762_vm2, %v4159_v22, %v4155_v17  ;;  %v1772_v37 = vsel %vm1762_vm2, %v4203_v27, %v4200_v0  ;;  %v1774_v17 = vsel %vm1762_vm2, %v4298_v62, %v4288_v5  ;;  %v4721_v22 = vpop.permute.xlu0 %2158 }
 0x787   : > { %v4672_v16 = vpop.permute.xlu1 %2176  ;;  %2510 = vmatprep.subr.mxu1 %v1806_v42  ;;  %v1800_v31 = vmul.f32 %v4621_v48, %v1767_v35  ;;  %v1764_v40 = vsel %vm1762_vm2, %v4200_v0, %v4203_v27  ;;  %v1773_v5 = vsel %vm1762_vm2, %v4247_v24, %v4245_v20  ;;  %v1799_v62 = vmul.f32 %v4618_v52, %v1775_v45 }
 0x788   : > { %2511 = vmatpush1.msra.mxu1 %v1805_v10  ;;  %v1765_v10 = vsel %vm1762_vm2, %v4245_v20, %v4247_v24  ;;  %v1791_v42 = vmul.f32 %v4618_v52, %v1771_v9  ;;  %v4741_v44 = vrot.slane %v3148_v32, %v4534_v38  ;;  %v1798_v0 = vmul.f32 %v4621_v48, %v1766_v59 }
 0x789   : > { %2512 = vmatprep.subr.mxu1 %v1804_v4  ;;  %v1792_v27 = vmul.f32 %v4621_v48, %v1763_v12  ;;  %v4752_v20 = vmul.f32 %v4665_v28, %v2103_v21  ;;  %v1793_v24 = vmul.f32 %v4618_v52, %v1772_v37  ;;  %v1797_v4 = vmul.f32 %v4618_v52, %v1774_v17 }
 0x78a   : > { %2513 = vmatpush1.msra.mxu1 %v1803_v55  ;;  %v1795_v32 = vmul.f32 %v4618_v52, %v1773_v5  ;;  %v2116_v35 = vsel %vm2102_vm3, %v4440_v50, %v4380_v29  ;;  %v1796_v18 = vmul.f32 %v4621_v48, %v1765_v10  ;;  %v1794_v15 = vmul.f32 %v4621_v48, %v1764_v40 }
 0x78b   : > { %v4723_v30 = vpop.permute.xlu1 %2174  ;;  %2514 = vmatprep.subr.mxu1 %v1802_v19  ;;  %v2109_v45 = vsel %vm2102_vm3, %v4438_v49, %v4500_v23  ;;  %v2117_v52 = vsel %vm2102_vm3, %v4500_v23, %v4438_v49  ;;  %v4781_v48 = vsel %vm2102_vm3, %v4211_v43, %v4213_v25  ;;  %v4787_v23 = vsel %vm2102_vm3, %v4213_v25, %v4211_v43  ;;  %v4789_v49 = vpop.permute.xlu0 %2316 }
 0x78c   : > { %2515 = vmatpush1.msra.mxu1 %v1801_v2  ;;  %v2107_v2 = vsel %vm2102_vm3, %v4336_v36, %v4356_v11  ;;  %v2115_v43 = vsel %vm2102_vm3, %v4356_v11, %v4336_v36  ;;  %v2108_v25 = vsel %vm2102_vm3, %v4380_v29, %v4440_v50  ;;  %v2143_v21 = vmul.f32 %v4682_v39, %v2116_v35 }
 0x78d   : > { %2516 = vmatprep.subr.mxu1 %v1800_v31  ;;  %v2144_v37 = vmul.f32 %v4665_v28, %v2109_v45  ;;  %v2145_v17 = vmul.f32 %v4682_v39, %v2117_v52  ;;  %v2002_v11 = vsel %vm1995_vm14, %v4447_v61, %v4509_v57  ;;  %v2010_v29 = vsel %vm1995_vm14, %v4509_v57, %v4447_v61 }
 0x78e   : > { %2517 = vmatpush1.msra.mxu1 %v1799_v62  ;;  %v2114_v5 = vsel %vm2102_vm3, %v4306_v8, %v4296_v56  ;;  %v2001_v62 = vsel %vm1995_vm14, %v4395_v41, %v4449_v14  ;;  %v2009_v57 = vsel %vm1995_vm14, %v4449_v14, %v4395_v41  ;;  %v2038_v61 = vmul.f32 %v4693_v6, %v2002_v11 }
 0x78f   : > { %v2101_v55 = vpop.permute.xlu1 %2100  ;;  %2518 = vmatprep.subr.mxu1 %v1798_v0  ;;  %v4842_v0 = vpop.permute.xlu0 %2156  ;;  %v2036_v41 = vmul.f32 %v4693_v6, %v2001_v62  ;;  %v2139_v35 = vmul.f32 %v4682_v39, %v2114_v5  ;;  %v2035_v52 = vmul.f32 %v4675_v47, %v2009_v57 }
 0x790   : > { %v2110_v19 = vsel %vm2102_vm3, %v4487_v58, %v2101_v55  ;;  %v2118_v12 = vsel %vm2102_vm3, %v2101_v55, %v4487_v58  ;;  %2519 = vmatpush1.msra.mxu1 %v1797_v4  ;;  %v2106_v58 = vsel %vm2102_vm3, %v4296_v56, %v4306_v8  ;;  %v2141_v56 = vmul.f32 %v4682_v39, %v2115_v43  ;;  %v5686_v8 = vld [vmem:[#allocation38_spill] sm:$0xff]  ;;  %v5691_v43 = vld [vmem:[#allocation41_spill] sm:$0xff] }
 0x791   : > { %v2146_v9 = vmul.f32 %v4665_v28, %v2110_v19  ;;  %v2147_v59 = vmul.f32 %v4682_v39, %v2118_v12  ;;  %2520 = vmatprep.subr.mxu1 %v1796_v18  ;;  %v2140_v4 = vmul.f32 %v4665_v28, %v2107_v2  ;;  %v2138_v55 = vmul.f32 %v4665_v28, %v2106_v58  ;;  %v5688_v18 = vld [vmem:[#allocation48_spill] sm:$0xff] }
 0x792   : > { %2521 = vmatpush1.msra.mxu1 %v1795_v32  ;;  %v2037_v32 = vmul.f32 %v4675_v47, %v2010_v29  ;;  %v5690_v12 = vld [vmem:[#allocation52_spill] sm:$0xff]  ;;  %v2134_v29 = vmul.f32 %v4665_v28, %v4781_v48  ;;  %v2133_v48 = vmul.f32 %v4682_v39, %v4749_v63  ;;  %v5699_v63 = vld [vmem:[#allocation26_spill] sm:$0xff] }
 0x793   : > { %v1994_v31 = vpop.permute.xlu1 %1993  ;;  %2522 = vmatprep.subr.mxu1 %v1794_v15  ;;  %2607 = vmatprep.subr.mxu0 %v2147_v59  ;;  %v5689_v15 = vld [vmem:[#allocation46_spill] sm:$0xff]  ;;  %v4885_v11 = vpop.permute.xlu0 %2314 }
 0x794   : > { %v2003_v36 = vsel %vm1995_vm14, %v4494_v54, %v1994_v31  ;;  %v2011_v50 = vsel %vm1995_vm14, %v1994_v31, %v4494_v54  ;;  %2523 = vmatpush1.msra.mxu1 %v1793_v24  ;;  %2608 = vmatpush1.msra.mxu0 %v2146_v9  ;;  %v2142_v54 = vmul.f32 %v4665_v28, %v2108_v25  ;;  %v5687_v24 = vld [vmem:[#allocation39_spill] sm:$0xff]  ;;  %v5692_v25 = vld [vmem:[#allocation40_spill] sm:$0xff] }
 0x795   : > { %v2039_v40 = vmul.f32 %v4675_v47, %v2011_v50  ;;  %v2040_v10 = vmul.f32 %v4693_v6, %v2003_v36  ;;  %2524 = vmatprep.subr.mxu1 %v1792_v27  ;;  %2609 = vmatprep.subr.mxu0 %v2145_v17  ;;  %v2105_v14 = vsel %vm2102_vm3, %v5686_v8, %v5687_v24 }
 0x796   : > { %2525 = vmatpush1.msra.mxu1 %v1791_v42  ;;  %2610 = vmatpush1.msra.mxu0 %v2144_v37  ;;  %v2113_v42 = vsel %vm2102_vm3, %v5687_v24, %v5686_v8  ;;  %v1999_v45 = vsel %vm1995_vm14, %v5689_v15, %v5688_v18  ;;  %v2007_v19 = vsel %vm1995_vm14, %v5688_v18, %v5689_v15  ;;  %v5693_v37 = vld [vmem:[#allocation53_spill] sm:$0xff] }
 0x797   : > { %v4844_v27 = vpop.permute.xlu1 %2332  ;;  %2526 = vmatprep.subr.mxu1 %v2040_v10  ;;  %2611 = vmatprep.subr.mxu0 %v2143_v21  ;;  %v2034_v9 = vmul.f32 %v4693_v6, %v5690_v12  ;;  %v2137_v58 = vmul.f32 %v4682_v39, %v2113_v42  ;;  %v2136_v2 = vmul.f32 %v4665_v28, %v2105_v14  ;;  %v5695_v10 = vld [vmem:[#allocation33_spill] sm:$0xff]  ;;  %v5702_v12 = vld [vmem:[#allocation34_spill] sm:$0xff] }
 0x798   : > { %2527 = vmatpush2.msra.mxu1 %v2039_v40  ;;  %2612 = vmatpush1.msra.mxu0 %v2142_v54  ;;  %v1998_v21 = vsel %vm1995_vm14, %v5692_v25, %v5691_v43  ;;  %v2033_v17 = vmul.f32 %v4675_v47, %v5693_v37  ;;  %v2006_v31 = vsel %vm1995_vm14, %v5691_v43, %v5692_v25  ;;  %v5694_v40 = vld [vmem:[#allocation35_spill] sm:$0xff]  ;;  %v5705_v43 = vld [vmem:[#allocation64_spill] sm:$0xff] }
 0x799   : > { %2528 = vmatprep.subr.mxu1 %v2038_v61  ;;  %2613 = vmatprep.subr.mxu0 %v2141_v56  ;;  %v2032_v36 = vmul.f32 %v4693_v6, %v1999_v45  ;;  %v2135_v50 = vmul.f32 %v4682_v39, %v4787_v23  ;;  %v1997_v5 = vsel %vm1995_vm14, %v5695_v10, %v5694_v40  ;;  %v5696_v23 = vld [vmem:[#allocation29_spill] sm:$0xff]  ;;  %v5697_v61 = vld [vmem:[#allocation28_spill] sm:$0xff]  ;;  %v4927_v45 = vpop.permute.xlu0 %2154 }
 0x79a   : > { %2529 = vmatpush2.msra.mxu1 %v2037_v32  ;;  %2614 = vmatpush1.msra.mxu0 %v2140_v4  ;;  %v2031_v54 = vmul.f32 %v4675_v47, %v2007_v19  ;;  %v2005_v62 = vsel %vm1995_vm14, %v5694_v40, %v5695_v10  ;;  %v2030_v28 = vmul.f32 %v4693_v6, %v1998_v21  ;;  %v5698_v4 = vld [vmem:[#allocation45_spill] sm:$0xff] }
 0x79b   : > { %v4871_v59 = vpop.permute.xlu1 %2172  ;;  %2530 = vmatprep.subr.mxu1 %v2036_v41  ;;  %2615 = vmatprep.subr.mxu0 %v2139_v35  ;;  %v1996_v56 = vsel %vm1995_vm14, %v5697_v61, %v5696_v23  ;;  %v2004_v8 = vsel %vm1995_vm14, %v5696_v23, %v5697_v61  ;;  %v2029_v24 = vmul.f32 %v4675_v47, %v2006_v31  ;;  %v5700_v41 = vld [vmem:[#allocation32_spill] sm:$0xff]  ;;  %v5710_v23 = vld [vmem:[#allocation22_spill] sm:$0xff] }
 0x79c   : > { %2531 = vmatpush2.msra.mxu1 %v2035_v52  ;;  %2616 = vmatpush1.msra.mxu0 %v2138_v55  ;;  %v2028_v42 = vmul.f32 %v4693_v6, %v1997_v5  ;;  %v2069_v39 = vmul.f32 %v4661_v60, %v5698_v4  ;;  %v2065_v32 = vmul.f32 %v4661_v60, %v5699_v63  ;;  %v5701_v55 = vld [vmem:[#allocation27_spill] sm:$0xff] }
 0x79d   : > { %2532 = vmatprep.subr.mxu1 %v2034_v9  ;;  %2617 = vmatprep.subr.mxu0 %v2137_v58  ;;  %v2027_v14 = vmul.f32 %v4675_v47, %v2005_v62  ;;  %v2068_v35 = vmul.f32 %v4658_v13, %v5700_v41  ;;  %v2066_v18 = vmul.f32 %v4658_v13, %v5701_v55  ;;  %v5703_v58 = vld [vmem:[#allocation66_spill] sm:$0xff]  ;;  %v5708_v5 = vld [vmem:[#allocation23_spill] sm:$0xff]  ;;  %v5716_v55 = vld [vmem:[#allocation20_spill] sm:$0xff] }
 0x79e   : > { %2533 = vmatpush2.msra.mxu1 %v2033_v17  ;;  %2618 = vmatpush1.msra.mxu0 %v2136_v2  ;;  %v2025_v15 = vmul.f32 %v4675_v47, %v2004_v8  ;;  %v2026_v19 = vmul.f32 %v4693_v6, %v1996_v56  ;;  %v2067_v9 = vmul.f32 %v4661_v60, %v5702_v12  ;;  %v5706_v17 = vld [vmem:[#allocation25_spill] sm:$0xff]  ;;  %v5709_v62 = vld [vmem:[#allocation59_spill] sm:$0xff]  ;;  %v5711_v56 = vld [vmem:[#allocation50_spill] sm:$0xff] }
 0x79f   : > { %v4901_v57 = vpop.permute.xlu1 %2330  ;;  %2534 = vmatprep.subr.mxu1 %v2032_v36  ;;  %2619 = vmatprep.subr.mxu0 %v2135_v50  ;;  %v2064_v31 = vmul.f32 %v4658_v13, %v5706_v17  ;;  %v2061_v61 = vmul.f32 %v4661_v60, %v5710_v23  ;;  %v5712_v8 = vld [vmem:[#allocation47_spill] sm:$0xff]  ;;  %v5727_v23 = vld [vmem:[#allocation30_spill] sm:$0xff] }
 0x7a0   : > { %2535 = vmatpush2.msra.mxu1 %v2031_v54  ;;  %2620 = vmatpush1.msra.mxu0 %v2134_v29  ;;  %v5707_v29 = vld [vmem:[#allocation24_spill] sm:$0xff]  ;;  %v2062_v54 = vmul.f32 %v4658_v13, %v5708_v5  ;;  %v5719_v12 = vld [vmem:[#allocation55_spill] sm:$0xff] }
 0x7a1   : > { %2536 = vmatprep.subr.mxu1 %v2030_v28  ;;  %2621 = vmatprep.subr.mxu0 %v2133_v48  ;;  %v2063_v40 = vmul.f32 %v4661_v60, %v5707_v29  ;;  %v1958_v28 = vmul.f32 %v4741_v44, %v5709_v62  ;;  %v4960_v48 = vpop.permute.xlu0 %2312 }
 0x7a2   : > { %2537 = vmatpush2.msra.mxu1 %v2029_v24  ;;  %2622 = vmatpush1.msra.mxu0 %v4752_v20  ;;  %v5704_v20 = vld [vmem:[#allocation58_spill] sm:$0xff]  ;;  %v1921_v24 = vsel %vm1917_vm15, %v5712_v8, %v5711_v56 }
 0x7a3   : > { %v1916_v52 = vpop.permute.xlu1 %1915  ;;  %2538 = vmatprep.subr.mxu1 %v2028_v42  ;;  %2623 = vmatprep.subr.mxu0 %v2069_v39  ;;  %v1924_v2 = vsel %vm1917_vm15, %v5704_v20, %v5703_v58  ;;  %v1932_v6 = vsel %vm1917_vm15, %v5703_v58, %v5704_v20  ;;  %v5713_v42 = vld [vmem:[#allocation60_spill] sm:$0xff]  ;;  %v5714_v39 = vld [vmem:[#allocation21_spill] sm:$0xff]  ;;  %v5720_v58 = vld [vmem:[#allocation19_spill] sm:$0xff] }
 0x7a4   : > { %v1925_v25 = vsel %vm1917_vm15, %v5705_v43, %v1916_v52  ;;  %v1933_v47 = vsel %vm1917_vm15, %v1916_v52, %v5705_v43  ;;  %2539 = vmatpush2.msra.mxu1 %v2027_v14  ;;  %2624 = vmatpush1.msra.mxu0 %v2068_v35  ;;  %v1960_v36 = vmul.f32 %v4741_v44, %v1924_v2  ;;  %v5715_v14 = vld [vmem:[#allocation54_spill] sm:$0xff] }
 0x7a5   : > { %v1961_v21 = vmul.f32 %v4686_v3, %v1933_v47  ;;  %v1962_v37 = vmul.f32 %v4741_v44, %v1925_v25  ;;  %2540 = vmatprep.subr.mxu1 %v2026_v19  ;;  %2625 = vmatprep.subr.mxu0 %v2067_v9  ;;  %v1959_v10 = vmul.f32 %v4686_v3, %v1932_v6  ;;  %v5718_v52 = vld [vmem:[#allocation42_spill] sm:$0xff]  ;;  %v5722_v6 = vld [vmem:[#allocation37_spill] sm:$0xff] }
 0x7a6   : > { %2541 = vmatpush2.msra.mxu1 %v2025_v15  ;;  %2626 = vmatpush1.msra.mxu0 %v2066_v18  ;;  %v1957_v4 = vmul.f32 %v4686_v3, %v5713_v42  ;;  %v2060_v63 = vmul.f32 %v4658_v13, %v5714_v39  ;;  %v1956_v41 = vmul.f32 %v4741_v44, %v5715_v14  ;;  %v5717_v15 = vld [vmem:[#allocation43_spill] sm:$0xff]  ;;  %v5721_v25 = vld [vmem:[#allocation18_spill] sm:$0xff] }
 0x7a7   : > { %v4951_v50 = vpop.permute.xlu1 %2170  ;;  %2542 = vmatprep.subr.mxu1 %v1962_v37  ;;  %2627 = vmatprep.subr.mxu0 %v2065_v32  ;;  %v1929_v32 = vsel %vm1917_vm15, %v5711_v56, %v5712_v8  ;;  %v2059_v18 = vmul.f32 %v4661_v60, %v5716_v55  ;;  %v1920_v19 = vsel %vm1917_vm15, %v5718_v52, %v5717_v15  ;;  %v3153_v8 = vld [vmem:[%s5559_s13 + $0xe] sm:$0x3]  ;;  %v5729_v55 = vld [vmem:[#allocation61_spill] sm:$0xff] }
 0x7a8   : > { %2543 = vmatpush2.msra.mxu1 %v1961_v21  ;;  %2628 = vmatpush1.msra.mxu0 %v2064_v31  ;;  %v1955_v9 = vmul.f32 %v4686_v3, %v5719_v12  ;;  %v2058_v20 = vmul.f32 %v4658_v13, %v5720_v58  ;;  %v1928_v2 = vsel %vm1917_vm15, %v5717_v15, %v5718_v52  ;;  %v5723_v21 = vld [vmem:[#allocation36_spill] sm:$0xff]  ;;  %v5724_v31 = vld [vmem:[#allocation17_spill] sm:$0xff] }
 0x7a9   : > { %2544 = vmatprep.subr.mxu1 %v1960_v36  ;;  %2629 = vmatprep.subr.mxu0 %v2063_v40  ;;  %v1954_v43 = vmul.f32 %v4741_v44, %v1921_v24  ;;  %v2057_v47 = vmul.f32 %v4661_v60, %v5721_v25  ;;  %v1919_v37 = vsel %vm1917_vm15, %v5723_v21, %v5722_v6  ;;  %v5008_v40 = vpop.permute.xlu0 %2152  ;;  %v5728_v24 = vld [vmem:[#allocation15_spill] sm:$0xff]  ;;  %v5731_v52 = vld [vmem:[#allocation65_spill] sm:$0xff] }
 0x7aa   : > { %2545 = vmatpush2.msra.mxu1 %v1959_v10  ;;  %2630 = vmatpush1.msra.mxu0 %v2062_v54  ;;  %v1953_v17 = vmul.f32 %v4686_v3, %v1929_v32  ;;  %v2056_v36 = vmul.f32 %v4658_v13, %v5724_v31  ;;  %v1927_v29 = vsel %vm1917_vm15, %v5722_v6, %v5723_v21  ;;  %v5725_v54 = vld [vmem:[#allocation16_spill] sm:$0xff]  ;;  %v5732_v21 = vld [vmem:[#allocation63_spill] sm:$0xff]  ;;  %v5733_v31 = vld [vmem:[#allocation49_spill] sm:$0xff] }
 0x7ab   : > { %v4978_v35 = vpop.permute.xlu1 %2328  ;;  %2546 = vmatprep.subr.mxu1 %v1958_v28  ;;  %2631 = vmatprep.subr.mxu0 %v2061_v61  ;;  %v1952_v5 = vmul.f32 %v4741_v44, %v1920_v19  ;;  %v2055_v62 = vmul.f32 %v4661_v60, %v5725_v54  ;;  %v5726_v28 = vld [vmem:[#allocation31_spill] sm:$0xff]  ;;  %v1951_v56 = vmul.f32 %v4686_v3, %v1928_v2  ;;  %v2388_v2 = vld [vmem:[%s5555_s9 + $0x30] sm:$0xff]  ;;  %v2387_v6 = vld [vmem:[%s5555_s9 + $0x28] sm:$0xff] }
 0x7ac   : > { %2547 = vmatpush2.msra.mxu1 %v1957_v4  ;;  %2632 = vmatpush1.msra.mxu0 %v2060_v63  ;;  %v1918_v61 = vsel %vm1917_vm15, %v5727_v23, %v5726_v28  ;;  %v2054_v42 = vmul.f32 %v4658_v13, %v5728_v24  ;;  %v1926_v60 = vsel %vm1917_vm15, %v5726_v28, %v5727_v23  ;;  %v5736_v28 = vld [vmem:[#allocation57_spill] sm:$0xff] }
 0x7ad   : > { %2548 = vmatprep.subr.mxu1 %v1956_v41  ;;  %2633 = vmatprep.subr.mxu0 %v2059_v18  ;;  %v1950_v4 = vmul.f32 %v4741_v44, %v1919_v37  ;;  %v1949_v39 = vmul.f32 %v4686_v3, %v1927_v29  ;;  %v5032_v63 = vrot.slane %v3153_v8, %v4532_v7  ;;  %v5730_v18 = vld [vmem:[#allocation67_spill] sm:$0xff] }
 0x7ae   : > { %2549 = vmatpush2.msra.mxu1 %v1955_v9  ;;  %2634 = vmatpush1.msra.mxu0 %v2058_v20  ;;  %v5035_v32 = vrot.slane %v3153_v8, %v4534_v38  ;;  %v1948_v14 = vmul.f32 %v4741_v44, %v1918_v61  ;;  %v1947_v41 = vmul.f32 %v4686_v3, %v1926_v60  ;;  %v2382_v44 = vld [vmem:[%s5555_s9] sm:$0xff]  ;;  %v5056_v9 = vpop.permute.xlu0 %2310  ;;  %v5737_v8 = vld [vmem:[#allocation56_spill] sm:$0xff] }
 0x7af   : > { %v5010_v10 = vpop.permute.xlu1 %2168  ;;  %2550 = vmatprep.subr.mxu1 %v1954_v43  ;;  %2635 = vmatprep.subr.mxu0 %v2057_v47  ;;  %v2273_v15 = vsel %vm2258_vm0, %v5730_v18, %v5729_v55  ;;  %v2265_v3 = vsel %vm2258_vm0, %v5729_v55, %v5730_v18  ;;  %v2296_v24 = vmul.f32 %v5032_v63, %v5737_v8  ;;  %v2398_v55 = vld [vmem:[%s5555_s9 + $0x80] sm:$0xff] }
 0x7b0   : > { %2551 = vmatpush2.msra.mxu1 %v1953_v17  ;;  %2636 = vmatpush1.msra.mxu0 %v2056_v36  ;;  %v2301_v43 = vmul.f32 %v5035_v32, %v2273_v15  ;;  %v2300_v47 = vmul.f32 %v5032_v63, %v2265_v3  ;;  %v2299_v37 = vmul.f32 %v5035_v32, %v5732_v21  ;;  %v2393_v17 = vld [vmem:[%s5555_s9 + $0x58] sm:$0xff]  ;;  %v5734_v36 = vld [vmem:[#allocation51_spill] sm:$0xff]  ;;  %v5739_v15 = vld [vmem:[#allocation68_spill] sm:$0xff] }
 0x7b1   : > { %2552 = vmatprep.subr.mxu1 %v1952_v5  ;;  %2637 = vmatprep.subr.mxu0 %v2055_v62  ;;  %v2270_v29 = vsel %vm2258_vm0, %v5734_v36, %v5733_v31  ;;  %v5735_v5 = vld [vmem:[#allocation62_spill] sm:$0xff]  ;;  %v2262_v62 = vsel %vm2258_vm0, %v5733_v31, %v5734_v36  ;;  %v2297_v23 = vmul.f32 %v5035_v32, %v5736_v28 }
 0x7b2   : > { %2553 = vmatpush2.msra.mxu1 %v1951_v56  ;;  %2638 = vmatpush1.msra.mxu0 %v2054_v42  ;;  %v2298_v54 = vmul.f32 %v5032_v63, %v5735_v5  ;;  %v5087_v61 = vpop.permute.xlu0 %2150  ;;  %v5738_v42 = vld [vmem:[#allocation44_spill] sm:$0xff]  ;;  %v2294_v18 = vmul.f32 %v5032_v63, %v2262_v62  ;;  %v2187_v36 = vsel %vm2180_vm4, %v4601_v1, %v4672_v16 }
 0x7b3   : > { %v2257_v13 = vpop.permute.xlu1 %2256  ;;  %2554 = vmatprep.subr.mxu1 %v1950_v4  ;;  %v2269_v60 = vsel %vm2258_vm0, %v4563_v26, %v5738_v42  ;;  %v3152_v4 = vld [vmem:[%s5559_s13 + $0xc] sm:$0x3] }
 0x7b4   : > { %v2266_v19 = vsel %vm2258_vm0, %v5731_v52, %v2257_v13  ;;  %v2274_v12 = vsel %vm2258_vm0, %v2257_v13, %v5731_v52  ;;  %2555 = vmatpush2.msra.mxu1 %v1949_v39  ;;  %v2392_v39 = vld [vmem:[%s5555_s9 + $0x50] sm:$0xff]  ;;  %v2261_v13 = vsel %vm2258_vm0, %v5738_v42, %v4563_v26  ;;  %v2260_v52 = vsel %vm2258_vm0, %v5739_v15, %v4583_v46 }
 0x7b5   : > { %v2302_v58 = vmul.f32 %v5032_v63, %v2266_v19  ;;  %v2303_v20 = vmul.f32 %v5035_v32, %v2274_v12  ;;  %2556 = vmatprep.subr.mxu1 %v1948_v14  ;;  %v3154_v14 = vld [vmem:[%s5559_s13 + $0x10] sm:$0x3]  ;;  %v2268_v26 = vsel %vm2258_vm0, %v4583_v46, %v5739_v15  ;;  %v2292_v46 = vmul.f32 %v5032_v63, %v2261_v13  ;;  %v2407_v15 = vld [vmem:[%s5555_s9 + $0xc8] sm:$0xff] }
 0x7b6   : > { %2557 = vmatpush2.msra.mxu1 %v1947_v41  ;;  %v2295_v41 = vmul.f32 %v5035_v32, %v2270_v29  ;;  %v5740_v19 = vld [vmem:[#allocation69_spill] sm:$0xff]  ;;  %v2194_v29 = vsel %vm2180_vm4, %v4723_v30, %v4721_v22 }
 0x7b7   : > { %v5064_v25 = vpop.permute.xlu1 %2326  ;;  %2559 = vmatmul.mubr.f32.vlgmr.msra.gmra.mxu1 %v2382_v44  ;;  %2639 = vmatprep.subr.mxu0 %v2303_v20  ;;  %v2259_v12 = vsel %vm2258_vm0, %v5740_v19, %v4603_v51  ;;  %v2293_v44 = vmul.f32 %v5035_v32, %v2269_v60  ;;  %v2267_v3 = vsel %vm2258_vm0, %v4603_v51, %v5740_v19  ;;  %v2397_v51 = vld [vmem:[%s5555_s9 + $0x78] sm:$0xff]  ;;  %v2408_v13 = vld [vmem:[%s5555_s9 + $0xd0] sm:$0xff] }
 0x7b8   : > { %2640 = vmatpush2.msra.mxu0 %v2302_v58  ;;  %2564 = vmatprep.mubr.f32.mxu1 %v2388_v2  ;;  %v5134_v58 = vrot.slane %v3152_v4, %v4532_v7  ;;  %v5138_v2 = vrot.slane %v3152_v4, %v4534_v38  ;;  %v2288_v21 = vmul.f32 %v5032_v63, %v2259_v12 }
 0x7b9   : > { %2641 = vmatprep.subr.mxu0 %v2301_v43  ;;  %v5142_v43 = vrot.slane %v3154_v14, %v4532_v7  ;;  %v2403_v7 = vld [vmem:[%s5555_s9 + $0xa8] sm:$0xff]  ;;  %v2289_v31 = vmul.f32 %v5035_v32, %v2267_v3 }
 0x7ba   : > { %2642 = vmatpush2.msra.mxu0 %v2300_v47  ;;  %v2290_v47 = vmul.f32 %v5032_v63, %v2260_v52  ;;  %v2221_v60 = vmul.f32 %v5138_v2, %v2194_v29  ;;  %v2418_v29 = vld [vmem:[%s5555_s9 + $0x120] sm:$0xff] }
 0x7bb   : > { %v5089_v56 = vpop.permute.xlu1 %2166  ;;  %2565 = vmatmul.mubr.f32.gmra.mxu1 %v2387_v6  ;;  %2643 = vmatprep.subr.mxu0 %v2299_v37  ;;  %v2291_v6 = vmul.f32 %v5035_v32, %v2268_v26  ;;  %v5151_v37 = vrot.slane %v3154_v14, %v4534_v38  ;;  %v2195_v38 = vsel %vm2180_vm4, %v4672_v16, %v4601_v1 }
 0x7bc   : > { %2644 = vmatpush2.msra.mxu0 %v2298_v54  ;;  %2570 = vmatprep.mubr.f32.mxu1 %v2393_v17  ;;  %v5153_v17 = vpop.permute.xlu0 %2308  ;;  %v2186_v32 = vsel %vm2180_vm4, %v4721_v22, %v4723_v30  ;;  %v2343_v16 = vsel %vm2336_vm5, %v4789_v49, %v4844_v27  ;;  %v2351_v30 = vsel %vm2336_vm5, %v4844_v27, %v4789_v49 }
 0x7bd   : > { %2645 = vmatprep.subr.mxu0 %v2297_v23  ;;  %v2223_v8 = vmul.f32 %v5138_v2, %v2195_v38  ;;  %v2185_v49 = vsel %vm2180_vm4, %v4842_v0, %v4871_v59  ;;  %v2193_v27 = vsel %vm2180_vm4, %v4871_v59, %v4842_v0  ;;  %v2378_v14 = vmul.f32 %v5142_v43, %v2343_v16 }
 0x7be   : > { %2646 = vmatpush2.msra.mxu0 %v2296_v24  ;;  %v2220_v24 = vmul.f32 %v5134_v58, %v2186_v32  ;;  %v2342_v0 = vsel %vm2336_vm5, %v4885_v11, %v4901_v57  ;;  %v2184_v59 = vsel %vm2180_vm4, %v4927_v45, %v4951_v50  ;;  %v2218_v52 = vmul.f32 %v5134_v58, %v2185_v49  ;;  %v2395_v49 = vld [vmem:[%s5555_s9 + $0x68] sm:$0xff] }
 0x7bf   : > { %v2179_v20 = vpop.permute.xlu1 %2178  ;;  %2571 = vmatmul.mubr.f32.gmra.mxu1 %v2392_v39  ;;  %2647 = vmatprep.subr.mxu0 %v2295_v41  ;;  %v2379_v41 = vmul.f32 %v5151_v37, %v2351_v30  ;;  %v2376_v12 = vmul.f32 %v5142_v43, %v2342_v0  ;;  %v2182_v32 = vsel %vm2180_vm4, %v5087_v61, %v5089_v56  ;;  %v2417_v30 = vld [vmem:[%s5555_s9 + $0x118] sm:$0xff]  ;;  %v2404_v0 = vld [vmem:[%s5555_s9 + $0xb0] sm:$0xff] }
 0x7c0   : > { %2648 = vmatpush2.msra.mxu0 %v2294_v18  ;;  %2576 = vmatprep.mubr.f32.mxu1 %v2398_v55  ;;  %v2196_v63 = vsel %vm2180_vm4, %v2179_v20, %v4573_v34  ;;  %v2188_v5 = vsel %vm2180_vm4, %v4573_v34, %v2179_v20  ;;  %v2402_v34 = vld [vmem:[%s5555_s9 + $0xa0] sm:$0xff]  ;;  %v5214_v4 = vpop.permute.xlu0 %2148  ;;  %v2350_v55 = vsel %vm2336_vm5, %v4901_v57, %v4885_v11 }
 0x7c1   : > { %2649 = vmatprep.subr.mxu0 %v2293_v44  ;;  %v2225_v62 = vmul.f32 %v5138_v2, %v2196_v63  ;;  %v2224_v42 = vmul.f32 %v5134_v58, %v2188_v5  ;;  %v2192_v18 = vsel %vm2180_vm4, %v4951_v50, %v4927_v45  ;;  %v2219_v11 = vmul.f32 %v5138_v2, %v2193_v27  ;;  %v2391_v27 = vld [vmem:[%s5555_s9 + $0x48] sm:$0xff] }
 0x7c2   : > { %2650 = vmatpush2.msra.mxu0 %v2292_v46  ;;  %v2349_v57 = vsel %vm2336_vm5, %v4978_v35, %v4960_v48  ;;  %v2377_v26 = vmul.f32 %v5151_v37, %v2350_v55  ;;  %v2341_v45 = vsel %vm2336_vm5, %v4960_v48, %v4978_v35  ;;  %v2183_v50 = vsel %vm2180_vm4, %v5008_v40, %v5010_v10  ;;  %v2413_v48 = vld [vmem:[%s5555_s9 + $0xf8] sm:$0xff] }
 0x7c3   : > { %v2335_v1 = vpop.permute.xlu1 %2334  ;;  %2577 = vmatmul.mubr.f32.gmra.mxu1 %v2397_v51  ;;  %2651 = vmatprep.subr.mxu0 %v2291_v6  ;;  %v2216_v44 = vmul.f32 %v5134_v58, %v2184_v59  ;;  %v2217_v3 = vmul.f32 %v5138_v2, %v2192_v18  ;;  %v2375_v20 = vmul.f32 %v5151_v37, %v2349_v57  ;;  %v2401_v55 = vld [vmem:[%s5555_s9 + $0x98] sm:$0xff]  ;;  %v2410_v59 = vld [vmem:[%s5555_s9 + $0xe0] sm:$0xff] }
 0x7c4   : > { %v2344_v54 = vsel %vm2336_vm5, %v4646_v53, %v2335_v1  ;;  %v2352_v22 = vsel %vm2336_vm5, %v2335_v1, %v4646_v53  ;;  %2652 = vmatpush2.msra.mxu0 %v2290_v47  ;;  %2582 = vmatprep.mubr.f32.mxu1 %v2403_v7  ;;  %v2222_v53 = vmul.f32 %v5134_v58, %v2187_v36  ;;  %v2307_v35 = vpop.permute.xlu0 %2306  ;;  %v2406_v18 = vld [vmem:[%s5555_s9 + $0xc0] sm:$0xff] }
 0x7c5   : > { %v2380_v28 = vmul.f32 %v5142_v43, %v2344_v54  ;;  %v2381_v23 = vmul.f32 %v5151_v37, %v2352_v22  ;;  %2653 = vmatprep.subr.mxu0 %v2289_v31  ;;  %v2191_v46 = vsel %vm2180_vm4, %v5010_v10, %v5008_v40  ;;  %v2348_v51 = vsel %vm2336_vm5, %v5064_v25, %v5056_v9  ;;  %v2412_v40 = vld [vmem:[%s5555_s9 + $0xf0] sm:$0xff]  ;;  %v2414_v57 = vld [vmem:[%s5555_s9 + $0x100] sm:$0xff] }
 0x7c6   : > { %2654 = vmatpush2.msra.mxu0 %v2288_v21  ;;  %v2374_v47 = vmul.f32 %v5142_v43, %v2341_v45  ;;  %v2214_v6 = vmul.f32 %v5134_v58, %v2183_v50  ;;  %v2340_v21 = vsel %vm2336_vm5, %v5056_v9, %v5064_v25  ;;  %v2190_v10 = vsel %vm2180_vm4, %v5089_v56, %v5087_v61  ;;  %v2416_v45 = vld [vmem:[%s5555_s9 + $0x110] sm:$0xff]  ;;  %v2419_v50 = vld [vmem:[%s5555_s9 + $0x128] sm:$0xff] }
 0x7c7   : > { %v2325_v39 = vpop.permute.xlu1 %2324  ;;  %2583 = vmatmul.mubr.f32.gmra.mxu1 %v2402_v34  ;;  %2655 = vmatprep.subr.mxu0 %v2225_v62  ;;  %v2215_v25 = vmul.f32 %v5138_v2, %v2191_v46  ;;  %v2373_v36 = vmul.f32 %v5151_v37, %v2348_v51  ;;  %v2372_v63 = vmul.f32 %v5142_v43, %v2340_v21 }
 0x7c8   : > { %2736 = vmatprep.subr.mxu1 %v2381_v23  ;;  %2656 = vmatpush2.msra.mxu0 %v2224_v42  ;;  %v2339_v7 = vsel %vm2336_vm5, %v5153_v17, %v2325_v39  ;;  %v2347_v31 = vsel %vm2336_vm5, %v2325_v39, %v5153_v17  ;;  %v2213_v5 = vmul.f32 %v5138_v2, %v2190_v10  ;;  %v2305_v54 = vpop.permute.xlu0 %2304  ;;  %v2400_v39 = vld [vmem:[%s5555_s9 + $0x90] sm:$0xff] }
 0x7c9   : > { %2737 = vmatpush1.msra.mxu1 %v2380_v28  ;;  %2657 = vmatprep.subr.mxu0 %v2223_v8  ;;  %v2370_v1 = vmul.f32 %v5142_v43, %v2339_v7  ;;  %v2371_v16 = vmul.f32 %v5151_v37, %v2347_v31 }
 0x7ca   : > { %2738 = vmatprep.subr.mxu1 %v2379_v41  ;;  %2588 = vmatprep.mubr.f32.mxu1 %v2408_v13  ;;  %v2396_v13 = vld [vmem:[%s5555_s9 + $0x70] sm:$0xff]  ;;  %v2405_v41 = vld [vmem:[%s5555_s9 + $0xb8] sm:$0xff] }
 0x7cb   : > { %2739 = vmatpush1.msra.mxu1 %v2378_v14  ;;  %2658 = vmatpush2.msra.mxu0 %v2222_v53  ;;  %v2165_v19 = vpop.permute.xlu1 %2164  ;;  %v2212_v53 = vmul.f32 %v5134_v58, %v2182_v32  ;;  %v2399_v14 = vld [vmem:[%s5555_s9 + $0x88] sm:$0xff] }
 0x7cc   : > { %2589 = vmatmul.mubr.f32.gmra.mxu1 %v2407_v15  ;;  %2659 = vmatprep.subr.mxu0 %v2221_v60  ;;  %v2181_v61 = vsel %vm2180_vm4, %v5214_v4, %v2165_v19  ;;  %v2189_v56 = vsel %vm2180_vm4, %v2165_v19, %v5214_v4  ;;  %v2394_v4 = vld [vmem:[%s5555_s9 + $0x60] sm:$0xff]  ;;  %v2409_v15 = vld [vmem:[%s5555_s9 + $0xd8] sm:$0xff] }
 0x7cd   : > { %2740 = vmatprep.subr.mxu1 %v2377_v26  ;;  %2660 = vmatpush2.msra.mxu0 %v2220_v24  ;;  %v2211_v24 = vmul.f32 %v5138_v2, %v2189_v56  ;;  %v2210_v60 = vmul.f32 %v5134_v58, %v2181_v61  ;;  %v2386_v2 = vld [vmem:[%s5555_s9 + $0x20] sm:$0xff]  ;;  %v5741_v58 = vmov 0.0   ;;  %v2420_v26 = vld [vmem:[%s5555_s9 + $0x130] sm:$0xff]  ;;  %v2421_v19 = vld [vmem:[%s5555_s9 + $0x138] sm:$0xff] }
 0x7ce   : > { %2741 = vmatpush1.msra.mxu1 %v2376_v12  ;;  %2661 = vmatprep.subr.mxu0 %v2219_v11  ;;  %v2411_v11 = vld [vmem:[%s5555_s9 + $0xe8] sm:$0xff] }
 0x7cf   : > { %2742 = vmatprep.subr.mxu1 %v2375_v20  ;;  %2594 = vmatprep.mubr.f32.mxu1 %v2413_v48  ;;  %v2323_v9 = vpop.permute.xlu1 %2322 }
 0x7d0   : > { %2662 = vmatpush2.msra.mxu0 %v2218_v52  ;;  %2743 = vmatpush1.msra.mxu1 %v2374_v47  ;;  %v2346_v38 = vsel %vm2336_vm5, %v2323_v9, %v2307_v35  ;;  %v2338_v17 = vsel %vm2336_vm5, %v2307_v35, %v2323_v9  ;;  %v2415_v52 = vld [vmem:[%s5555_s9 + $0x108] sm:$0xff] }
 0x7d1   : > { %2595 = vmatmul.mubr.f32.gmra.mxu1 %v2412_v40  ;;  %2663 = vmatprep.subr.mxu0 %v2217_v3  ;;  %v2369_v22 = vmul.f32 %v5151_v37, %v2346_v38  ;;  %v2368_v62 = vmul.f32 %v5142_v43, %v2338_v17 }
 0x7d2   : > { %2744 = vmatprep.subr.mxu1 %v2373_v36  ;;  %2664 = vmatpush2.msra.mxu0 %v2216_v44 }
 0x7d3   : > { %2745 = vmatpush1.msra.mxu1 %v2372_v63  ;;  %2665 = vmatprep.subr.mxu0 %v2215_v25  ;;  %v2321_v34 = vpop.permute.xlu1 %2320 }
 0x7d4   : > { %2746 = vmatprep.subr.mxu1 %v2371_v16  ;;  %2600 = vmatprep.mubr.f32.mxu1 %v2418_v29  ;;  %v2337_v28 = vsel %vm2336_vm5, %v2305_v54, %v2321_v34  ;;  %v2345_v23 = vsel %vm2336_vm5, %v2321_v34, %v2305_v54  ;;  %v2468_v34 = vpop.permute.xlu0 %2467 }
 0x7d5   : > { %2666 = vmatpush2.msra.mxu0 %v2214_v6  ;;  %2747 = vmatpush1.msra.mxu1 %v2370_v1  ;;  %v2367_v8 = vmul.f32 %v5151_v37, %v2345_v23  ;;  %v2366_v42 = vmul.f32 %v5142_v43, %v2337_v28  ;;  %v2390_v37 = vld [vmem:[%s5555_s9 + $0x40] sm:$0xff]  ;;  %v2389_v43 = vld [vmem:[%s5555_s9 + $0x38] sm:$0xff] }
 0x7d6   : > { %2601 = vmatmul.mubr.f32.gmra.mxu1 %v2417_v30  ;;  %2667 = vmatprep.subr.mxu0 %v2213_v5 }
 0x7d7   : > { %2748 = vmatprep.subr.mxu1 %v2369_v22  ;;  %2668 = vmatpush2.msra.mxu0 %v2212_v53 }
 0x7d8   : > { %2749 = vmatpush1.msra.mxu1 %v2368_v62  ;;  %2669 = vmatprep.subr.mxu0 %v2211_v24 }
 0x7d9   : > { %2670 = vmatpush2.msra.mxu0 %v2210_v60  ;;  %2750 = vmatprep.subr.mxu1 %v2367_v8 }
 0x7da   : > { %2672 = vmatmul.mubr.f32.vlgmr.msra.gmra.mxu0 %v2384_v33  ;;  %2751 = vmatpush1.msra.mxu1 %v2366_v42  ;;  %v2458_v42 = vpop.permute.xlu0 %2457 }
 0x7db   : > { %2784 = vmatprep.mubr.f32.mxu1 %v5741_v58  ;;  %2677 = vmatprep.mubr.f32.mxu0 %v2390_v37 }
 0x7dc   : > { %3155 = vmatmul.mubr.msk.f32.vlgmr.msra.gmra.mxu1 %vm1558_vm13, %v2386_v2 }
 0x7dd   : > { %2790 = vmatprep.mubr.f32.mxu1 %v5741_v58 }
 0x7de   : > { %2678 = vmatmul.mubr.f32.gmra.mxu0 %v2389_v43 }
 0x7df   : > { %2683 = vmatprep.mubr.f32.mxu0 %v2395_v49 }
 0x7e0   : > { %3156 = vmatmul.mubr.msk.f32.gmra.mxu1 %vm1558_vm13, %v2391_v27  ;;  %v2463_v16 = vpop.permute.xlu1 %2462 }
 0x7e1   : > { %2796 = vmatprep.mubr.f32.mxu1 %v5741_v58 }
 0x7e2   : > { %2684 = vmatmul.mubr.f32.gmra.mxu0 %v2394_v4  ;;  %v2448_v4 = vpop.permute.xlu0 %2447 }
 0x7e3   : > { %2689 = vmatprep.mubr.f32.mxu0 %v2400_v39 }
 0x7e4   : > { %3157 = vmatmul.mubr.msk.f32.gmra.mxu1 %vm1558_vm13, %v2396_v13  ;;  %v2453_v28 = vpop.permute.xlu1 %2452 }
 0x7e5   : > { %2802 = vmatprep.mubr.f32.mxu1 %v5741_v58 }
 0x7e6   : > { %2690 = vmatmul.mubr.f32.gmra.mxu0 %v2399_v14 }
 0x7e7   : > { %2695 = vmatprep.mubr.f32.mxu0 %v2405_v41 }
 0x7e8   : > { %3158 = vmatmul.mubr.msk.f32.gmra.mxu1 %vm1558_vm13, %v2401_v55  ;;  %v2443_v37 = vpop.permute.xlu1 %2442 }
 0x7e9   : > { %2808 = vmatprep.mubr.f32.mxu1 %v5741_v58 }
 0x7ea   : > { %2696 = vmatmul.mubr.f32.gmra.mxu0 %v2404_v0 }
 0x7eb   : > { %2701 = vmatprep.mubr.f32.mxu0 %v2410_v59 }
 0x7ec   : > { %3159 = vmatmul.mubr.msk.f32.gmra.mxu1 %vm1558_vm13, %v2406_v18  ;;  %v2433_v55 = vpop.permute.xlu1 %2432 }
 0x7ed   : > { %2814 = vmatprep.mubr.f32.mxu1 %v5741_v58 }
 0x7ee   : > { %2702 = vmatmul.mubr.f32.gmra.mxu0 %v2409_v15 }
 0x7ef   : > { %2707 = vmatprep.mubr.f32.mxu0 %v2415_v52 }
 0x7f0   : > { %3160 = vmatmul.mubr.msk.f32.gmra.mxu1 %vm1558_vm13, %v2411_v11 }
 0x7f1   : > { %2820 = vmatprep.mubr.f32.mxu1 %v5741_v58 }
 0x7f2   : > { %2708 = vmatmul.mubr.f32.gmra.mxu0 %v2414_v57 }
 0x7f3   : > { %2713 = vmatprep.mubr.f32.mxu0 %v2420_v26 }
 0x7f4   : > { %3161 = vmatmul.mubr.msk.f32.gmra.mxu1 %vm1558_vm13, %v2416_v45 }
 0x7f5   : > { %2826 = vmatprep.mubr.f32.mxu1 %v5741_v58 }
 0x7f6   : > { %2714 = vmatmul.mubr.f32.gmra.mxu0 %v2419_v50 }
 0x7f7   : > { %2969 = vmatprep.mubr.f32.mxu0 %v5741_v58 }
 0x7f8   : > { %3162 = vmatmul.mubr.msk.f32.gmra.mxu1 %vm1558_vm13, %v2421_v19 }
 0x877   : > { %v2560_v12 = vpop.f32.mrf.mxu1 }
 0x878   : > { %v2561_v15 = vadd.f32 %v2560_v12, %v2433_v55 }
 0x879   : > { %v5412_v44 = vpop.f32.mrf.mxu1 }
 0x87b   : > { %v5414_v3 = vpop.f32.mrf.mxu1 }
 0x87d   : > { %v5416_v48 = vpop.f32.mrf.mxu1 }
 0x87f   : > { %v5418_v35 = vpop.f32.mrf.mxu1 }
 0x881   : > { %v5420_v20 = vpop.f32.mrf.mxu1 }
 0x883   : > { %v5422_v46 = vpop.f32.mrf.mxu1 }
 0x885   : > { %v2580_v51 = vpop.f32.mrf.mxu1 }
 0x887   : > { %v2584_v47 = vpop.f32.mrf.mxu1 }
 0x889   : > { %v2586_v6 = vpop.f32.mrf.mxu1 }
 0x88a   : > { %v2587_v45 = vadd.f32 %v2586_v6, %v2453_v28 }
 0x88c   : > { %v2590_v21 = vpop.f32.mrf.mxu1 }
 0x88d   : > { %v2591_v52 = vadd.f32 %v2590_v21, %v2458_v42 }
 0x88e   : > { %v2592_v40 = vpop.f32.mrf.mxu1 }
 0x88f   : > { %v2593_v0 = vadd.f32 %v2592_v40, %v2458_v42  ;;  %v2579_v42 = vadd.f32 %v5422_v46, %v2448_v4 }
 0x891   : > { %v2596_v10 = vpop.f32.mrf.mxu1 }
 0x892   : > { %v2597_v13 = vadd.f32 %v2596_v10, %v2463_v16 }
 0x893   : > { %v2598_v7 = vpop.f32.mrf.mxu1 }
 0x894   : > { %v2599_v39 = vadd.f32 %v2598_v7, %v2463_v16  ;;  %v2585_v7 = vadd.f32 %v2584_v47, %v2453_v28  ;;  %v2573_v28 = vadd.f32 %v5418_v35, %v2443_v37 }
 0x896   : > { %v2602_v31 = vpop.f32.mrf.mxu1 }
 0x897   : > { %v2603_v59 = vadd.f32 %v2602_v31, %v2468_v34 }
 0x898   : > { %v2604_v9 = vpop.f32.mrf.mxu1 }
 0x899   : > { %v2605_v50 = vadd.f32 %v2604_v9, %v2468_v34 }
 0x89a   : > { %v5424_v25 = vpop.f32.mrf.mxu0 }
 0x89c   : > { %v5426_v36 = vpop.f32.mrf.mxu0  ;;  %v5428_v38 = vpop.f32.mrf.mxu1 }
 0x89d   : > { %5742 = vst [vmem:[#allocation38_spill] sm:$0xff] %v5428_v38  ;;  %v2563_v38 = vadd.f32 %v5412_v44, %v2433_v55 }
 0x89e   : > { %v5430_v63 = vpop.f32.mrf.mxu0  ;;  %v5432_v32 = vpop.f32.mrf.mxu1 }
 0x89f   : > { %5743 = vst [vmem:[#allocation39_spill] sm:$0xff] %v5432_v32  ;;  %v2581_v32 = vadd.f32 %v2580_v51, %v2448_v4 }
 0x8a0   : > { %v5434_v17 = vpop.f32.mrf.mxu0  ;;  %v5436_v29 = vpop.f32.mrf.mxu1 }
 0x8a1   : > { %5744 = vst [vmem:[#allocation48_spill] sm:$0xff] %v5436_v29 }
 0x8a2   : > { %v5438_v5 = vpop.f32.mrf.mxu0  ;;  %v5440_v1 = vpop.f32.mrf.mxu1 }
 0x8a3   : > { %5745 = vst [vmem:[#allocation46_spill] sm:$0xff] %v5440_v1  ;;  %v2438_v1 = vpop.permute.xlu0 %2437  ;;  %v2686_v46 = vadd.f32 %v5438_v5, %v2573_v28  ;;  %v2674_v5 = vadd.f32 %v5424_v25, %v2561_v15 }
 0x8a4   : > { %v2687_v54 = vpop.f32.mrf.mxu0  ;;  %v5442_v61 = vpop.f32.mrf.mxu1  ;;  %v2569_v21 = vadd.f32 %v5416_v48, %v2438_v1  ;;  %v2567_v48 = vadd.f32 %v5414_v3, %v2438_v1  ;;  %v5749_v25 = vld [vmem:[#allocation38_spill] sm:$0xff] }
 0x8a6   : > { %v2691_v56 = vpop.f32.mrf.mxu0  ;;  %v5444_v22 = vpop.f32.mrf.mxu1  ;;  %v2680_v35 = vadd.f32 %v5430_v63, %v2567_v48 }
 0x8a8   : > { %v2693_v30 = vpop.f32.mrf.mxu0  ;;  %v5446_v62 = vpop.f32.mrf.mxu1 }
 0x8a9   : > { %v2694_v44 = vadd.f32 %v2693_v30, %v2581_v32 }
 0x8aa   : > { %v2697_v23 = vpop.f32.mrf.mxu0  ;;  %v2806_v53 = vpop.f32.mrf.mxu1 }
 0x8ab   : > { %v2698_v6 = vadd.f32 %v2697_v23, %v2585_v7  ;;  %v2807_v32 = vadd.f32 %v2806_v53, %v2694_v44  ;;  %v2876_v44 = vpop.permute.xlu0 %2875 }
 0x8ac   : > { %v2699_v8 = vpop.f32.mrf.mxu0  ;;  %v2810_v24 = vpop.f32.mrf.mxu1 }
 0x8ad   : > { %v2700_v40 = vadd.f32 %v2699_v8, %v2587_v45  ;;  %v2811_v23 = vadd.f32 %v2810_v24, %v2698_v6  ;;  %v2840_v55 = vmul.f32 0.2, %v2807_v32  ;;  %v5750_v6 = vmov 0.0  }
 0x8ae   : > { %v2703_v60 = vpop.f32.mrf.mxu0  ;;  %v2812_v33 = vpop.f32.mrf.mxu1 }
 0x8af   : > { %v2704_v10 = vadd.f32 %v2703_v60, %v2591_v52  ;;  %v2692_v60 = vadd.f32 %v2691_v56, %v2579_v42  ;;  %v2841_v53 = vmul.f32 0.2, %v2811_v23  ;;  %v2856_v45 = vmax.f32 %v2807_v32, %v2840_v55  ;;  %v2865_v42 = vld [vmem:[#allocation5] sm:$0xff]  ;;  %v2886_v32 = vpop.permute.xlu0 %2885 }
 0x8b0   : > { %v2705_v2 = vpop.f32.mrf.mxu0  ;;  %v2816_v43 = vpop.f32.mrf.mxu1 }
 0x8b1   : > { %v2706_v19 = vadd.f32 %v2705_v2, %v2593_v0  ;;  %v2575_v2 = vadd.f32 %v5420_v20, %v2443_v37  ;;  %v2682_v20 = vadd.f32 %v5434_v17, %v2569_v21  ;;  %v2805_v56 = vadd.f32 %v5446_v62, %v2692_v60  ;;  %v5747_v0 = vld [vmem:[#allocation48_spill] sm:$0xff]  ;;  %v3285_v60 = vld [vmem:[%s3618_s27] sm:$0xff] }
 0x8b2   : > { %v2709_v49 = vpop.f32.mrf.mxu0  ;;  %v2818_v27 = vpop.f32.mrf.mxu1  ;;  %v2799_v17 = vadd.f32 %v5442_v61, %v2686_v46  ;;  %v2787_v61 = vadd.f32 %v5749_v25, %v2674_v5  ;;  %v3290_v5 = vld [vmem:[%s3618_s27 + $0x28] sm:$0xff] }
 0x8b3   : > { %v2710_v11 = vadd.f32 %v2709_v49, %v2597_v13  ;;  %v2819_v51 = vadd.f32 %v2818_v27, %v2706_v19  ;;  %v2817_v49 = vadd.f32 %v2816_v43, %v2704_v10  ;;  %v2688_v13 = vadd.f32 %v2687_v54, %v2575_v2  ;;  %v2868_v2 = vld [vmem:[#allocation5 + $0x18] sm:$0xff] }
 0x8b4   : > { %v2711_v14 = vpop.f32.mrf.mxu0  ;;  %v2822_v41 = vpop.f32.mrf.mxu1  ;;  %v2837_v15 = vmul.f32 0.2, %v2799_v17 }
 0x8b5   : > { %v2712_v18 = vadd.f32 %v2711_v14, %v2599_v39  ;;  %v2823_v9 = vadd.f32 %v2822_v41, %v2710_v11  ;;  %v2813_v14 = vadd.f32 %v2812_v33, %v2700_v40  ;;  %v2844_v30 = vmul.f32 0.2, %v2819_v51  ;;  %v5746_v41 = vld [vmem:[#allocation46_spill] sm:$0xff] }
 0x8b6   : > { %v2715_v57 = vpop.f32.mrf.mxu0  ;;  %v2824_v26 = vpop.f32.mrf.mxu1  ;;  %v2843_v37 = vmul.f32 0.2, %v2817_v49  ;;  %v2676_v33 = vadd.f32 %v5426_v36, %v2563_v38  ;;  %v2801_v43 = vadd.f32 %v5444_v22, %v2688_v13  ;;  %v2795_v63 = vadd.f32 %v5746_v41, %v2682_v20  ;;  %v5748_v22 = vld [vmem:[#allocation39_spill] sm:$0xff]  ;;  %v3291_v41 = vld [vmem:[%s3618_s27 + $0x30] sm:$0xff] }
 0x8b7   : > { %v2716_v58 = vadd.f32 %v2715_v57, %v2603_v59  ;;  %v2825_v31 = vadd.f32 %v2824_v26, %v2712_v18  ;;  %v2845_v4 = vmul.f32 0.2, %v2823_v9  ;;  %v2842_v3 = vmul.f32 0.2, %v2813_v14  ;;  %v2881_v13 = vpop.permute.xlu1 %2880 }
 0x8b8   : > { %v2717_v16 = vpop.f32.mrf.mxu0  ;;  %v2828_v29 = vpop.f32.mrf.mxu1  ;;  %v2860_v62 = vmax.f32 %v2819_v51, %v2844_v30  ;;  %v2793_v59 = vadd.f32 %v5747_v0, %v2680_v35  ;;  %v2839_v36 = vmul.f32 0.2, %v2805_v56  ;;  %v2859_v38 = vmax.f32 %v2817_v49, %v2843_v37 }
 0x8b9   : > { %v2718_v39 = vadd.f32 %v2717_v16, %v2605_v50  ;;  %v2829_v12 = vadd.f32 %v2828_v29, %v2716_v58  ;;  %v2846_v58 = vmul.f32 0.2, %v2825_v31  ;;  %v2861_v24 = vmax.f32 %v2823_v9, %v2845_v4  ;;  %v2866_v9 = vld [vmem:[#allocation5 + $0x8] sm:$0xff] }
 0x8ba   : > { %v2830_v34 = vpop.f32.mrf.mxu1  ;;  %v2789_v18 = vadd.f32 %v5748_v22, %v2676_v33  ;;  %v2838_v52 = vmul.f32 0.2, %v2801_v43  ;;  %v2858_v11 = vmax.f32 %v2813_v14, %v2842_v3  ;;  %v2857_v57 = vmax.f32 %v2811_v23, %v2841_v53  ;;  %v3287_v23 = vld [vmem:[%s3618_s27 + $0x10] sm:$0xff] }
 0x8bb   : > { %v2831_v47 = vadd.f32 %v2830_v34, %v2718_v39  ;;  %v2847_v8 = vmul.f32 0.2, %v2829_v12  ;;  %v2862_v1 = vmax.f32 %v2825_v31, %v2846_v58  ;;  %v2836_v26 = vmul.f32 0.2, %v2795_v63  ;;  %v2867_v34 = vld [vmem:[#allocation5 + $0x10] sm:$0xff]  ;;  %v3286_v58 = vld [vmem:[%s3618_s27 + $0x8] sm:$0xff]  ;;  %v2891_v3 = vpop.permute.xlu1 %2890 }
 0x8bc   : > { %v2835_v50 = vmul.f32 0.2, %v2793_v59  ;;  %v2855_v19 = vmax.f32 %v2805_v56, %v2839_v36  ;;  %v2834_v7 = vmul.f32 0.2, %v2789_v18  ;;  %v2854_v10 = vmax.f32 %v2801_v43, %v2838_v52 }
 0x8bd   : > { %v2848_v29 = vmul.f32 0.2, %v2831_v47  ;;  %v2863_v54 = vmax.f32 %v2829_v12, %v2847_v8  ;;  %v2833_v16 = vmul.f32 0.2, %v2787_v61  ;;  %v2853_v40 = vmax.f32 %v2799_v17, %v2837_v15 }
 0x8be   : > { %v2852_v31 = vmax.f32 %v2795_v63, %v2836_v26  ;;  %v2851_v39 = vmax.f32 %v2793_v59, %v2835_v50  ;;  %v2850_v12 = vmax.f32 %v2789_v18, %v2834_v7 }
 0x8bf   : > { %v2864_v27 = vmax.f32 %v2831_v47, %v2848_v29  ;;  %v2849_v21 = vmax.f32 %v2787_v61, %v2833_v16 }
 0x8c1   : > { %2921 = vmatprep.subr.mxu0 %v2864_v27  ;;  %v3288_v27 = vld [vmem:[%s3618_s27 + $0x18] sm:$0xff] }
 0x8c2   : > { %2922 = vmatpush1.msra.mxu0 %v2863_v54  ;;  %v3289_v54 = vld [vmem:[%s3618_s27 + $0x20] sm:$0xff] }
 0x8c3   : > { %2923 = vmatprep.subr.mxu0 %v2862_v1 }
 0x8c4   : > { %2924 = vmatpush1.msra.mxu0 %v2861_v24 }
 0x8c5   : > { %2925 = vmatprep.subr.mxu0 %v2860_v62  ;;  %v3292_v62 = vld [vmem:[%s3618_s27 + $0x38] sm:$0xff] }
 0x8c6   : > { %2926 = vmatpush1.msra.mxu0 %v2859_v38 }
 0x8c7   : > { %2927 = vmatprep.subr.mxu0 %v2858_v11 }
 0x8c8   : > { %2928 = vmatpush1.msra.mxu0 %v2857_v57 }
 0x8c9   : > { %2929 = vmatprep.subr.mxu0 %v2856_v45 }
 0x8ca   : > { %2930 = vmatpush1.msra.mxu0 %v2855_v19 }
 0x8cb   : > { %2931 = vmatprep.subr.mxu0 %v2854_v10 }
 0x8cc   : > { %2932 = vmatpush1.msra.mxu0 %v2853_v40 }
 0x8cd   : > { %2933 = vmatprep.subr.mxu0 %v2852_v31 }
 0x8ce   : > { %2934 = vmatpush1.msra.mxu0 %v2851_v39 }
 0x8cf   : > { %2935 = vmatprep.subr.mxu0 %v2850_v12 }
 0x8d0   : > { %2936 = vmatpush1.msra.mxu0 %v2849_v21 }
 0x8d1   : > { %3163 = vmatmul.mubr.msk.f32.vlgmr.msra.gmra.mxu0 %vm1558_vm13, %v2865_v42 }
 0x8d2   : > { %2975 = vmatprep.mubr.f32.mxu0 %v5750_v6 }
 0x8d5   : > { %3164 = vmatmul.mubr.msk.f32.gmra.mxu0 %vm1558_vm13, %v2866_v9 }
 0x8d6   : > { %2981 = vmatprep.mubr.f32.mxu0 %v5750_v6 }
 0x8d9   : > { %3165 = vmatmul.mubr.msk.f32.gmra.mxu0 %vm1558_vm13, %v2867_v34 }
 0x8da   : > { %2987 = vmatprep.mubr.f32.mxu0 %v5750_v6 }
 0x8dd   : > { %3166 = vmatmul.mubr.msk.f32.gmra.mxu0 %vm1558_vm13, %v2868_v2 }
 0x991   : > { %v2971_v51 = vpop.f32.mrf.mxu0 }
 0x992   : > { %v2972_v47 = vadd.f32 %v2971_v51, %v2876_v44 }
 0x993   : > { %v2973_v28 = vpop.f32.mrf.mxu0 }
 0x994   : > { %v2994_v49 = vadd.f32 %v3285_v60, %v2972_v47  ;;  %v2974_v8 = vadd.f32 %v2973_v28, %v2876_v44 }
 0x995   : > { %v2977_v14 = vpop.f32.mrf.mxu0 }
 0x996   : > { %3002 = vst [vmem:[%s5477_s15] sm:$0xff] %v2994_v49  ;;  %v2995_v29 = vadd.f32 %v3286_v58, %v2974_v8  ;;  %v2978_v48 = vadd.f32 %v2977_v14, %v2881_v13 }
 0x997   : > { %v2979_v46 = vpop.f32.mrf.mxu0 }
 0x998   : > { %3003 = vst [vmem:[%s5477_s15 + $0x8] sm:$0xff] %v2995_v29  ;;  %v2996_v4 = vadd.f32 %v3287_v23, %v2978_v48  ;;  %v2980_v20 = vadd.f32 %v2979_v46, %v2881_v13 }
 0x999   : > { %v2983_v30 = vpop.f32.mrf.mxu0 }
 0x99a   : > { %3004 = vst [vmem:[%s5477_s15 + $0x10] sm:$0xff] %v2996_v4  ;;  %v2997_v35 = vadd.f32 %v3288_v27, %v2980_v20  ;;  %v2984_v56 = vadd.f32 %v2983_v30, %v2886_v32 }
 0x99b   : > { %v2985_v37 = vpop.f32.mrf.mxu0 }
 0x99c   : > { %3005 = vst [vmem:[%s5477_s15 + $0x18] sm:$0xff] %v2997_v35  ;;  %v2998_v33 = vadd.f32 %v3289_v54, %v2984_v56  ;;  %v2986_v43 = vadd.f32 %v2985_v37, %v2886_v32 }
 0x99d   : > { %v2989_v1 = vpop.f32.mrf.mxu0 }
 0x99e   : > { %3006 = vst [vmem:[%s5477_s15 + $0x20] sm:$0xff] %v2998_v33  ;;  %v2999_v17 = vadd.f32 %v3290_v5, %v2986_v43  ;;  %v2990_v53 = vadd.f32 %v2989_v1, %v2891_v3 }
 0x99f   : > { %v2991_v24 = vpop.f32.mrf.mxu0 }
 0x9a0   : > { %3007 = vst [vmem:[%s5477_s15 + $0x28] sm:$0xff] %v2999_v17  ;;  %v3000_v63 = vadd.f32 %v3291_v41, %v2990_v53  ;;  %v2992_v55 = vadd.f32 %v2991_v24, %v2891_v3 }
 0x9a2   : > { %3008 = vst [vmem:[%s5477_s15 + $0x30] sm:$0xff] %v3000_v63  ;;  %v3001_v0 = vadd.f32 %v3292_v62, %v2992_v55 }
 0x9a4   : > { %3009 = vst [vmem:[%s5477_s15 + $0x38] sm:$0xff] %v3001_v0 }
 0x9a5   : > { %3358 = shalt.err (!%p3355_p3)
}
 0x9a6   : > { %s3359_s27 = scalar_lea.hbm %s5500_s22, 1024  ;;  %s3363_s20 = scalar_lea.hbm %s5560_s14, 2048 }
 0x9a7   : > { %p3360_p2 = scmp.ne.s32.totalorder %s5500_s22, %s3359_s27  ;;  %p3364_p7 = scmp.lt.s32.totalorder %s5500_s22, %s5560_s14 }
 0x9a8   : > { %p3365_p6 = scmp.lt.s32.totalorder %s3363_s20, %s3359_s27 }
 0x9a9   : > { %p3361_p4 = pnand %p3360_p2, %p3544_p5 }
 0x9aa   : > { %p3366_p9 = por %p3365_p6, %p3364_p7 }
 0x9ab   : > { %p3362_p13 = pneg %p3361_p4 }
 0x9ad   : > { %p3367_p10 = pnand %p3366_p9, %p3362_p13 }
 0x9af   : > { %3370 = shalt.err (!%p3367_p10)
}
 0x9b0   : > { %s3430_s19 = smov 256   ;;  %s5751_s24 = smov 16  }
 0x9b1   : > { %3182 = dma.vmem_to_hbm [thread:$0]  (%p3544_p5), %s5493_s26, 1024, %s5500_s22, %s5505_s17, %s3430_s19, %s3430_s19, %s5751_s24  }
 0x9b2 PF: > { %s5752_s28 = sld [smem:[#allocation14_spill]]  ;;  %p3199_p12 = scmp.ge.s32.totalorder %s3413_s16, 2 }
 0x9b3   : > { %s3039_s25 = sand.u32 1, %s3401_s29  }
 0x9b4   : > { %s3040_s27 = scalar_lea.sflag [#allocation4], %s3039_s25 }
 0x9b8   : > { %p5753_p8 = scmp.ne.s32.totalorder %s5752_s28, 0 }
 0x9ba   : > { %p3192_p11 = pnand %p3199_p12, %p5753_p8 }
 0x9bc   : > { %p3193_p0 = pneg %p3192_p11 }
 0x9be   : > { %3396 = dma.done.wait (%p3193_p0), %s3040_s27, 1024  }
 0x9bf   : > { %3398 = vsyncadd (%p3193_p0), %s3040_s27, 4294966272  ;;  %s5754_s16 = sld [smem:[#allocation12_spill]]  ;;  %s5757_s29 = smov %s3405_s30 }
 0x9c0   : > { %s5755_s23 = sld [smem:[#allocation11_spill]] }
 0x9c1   : > { %s5756_s15 = sld [smem:[#allocation13_spill]] }
 0x9c5   : > { %p26_p1 = scmp.ge.s32.totalorder %s5754_s16, 4  }
 0x9c6   : > { %s5758_s30 = smov %s5755_s23 }
 0x9c7   :  { %28 = sbr.rel (!%p26_p1) target bundleno = 7 (0x7), region = 128 }
 0x9cc   :  { %3045 = vsyncpa [#allocation3], 1 }
 0x9cd   :  { %3047 = vsyncpa [#allocation3 + $0x1], 1 }
 0x9ce   :  { %3048 = vsyncpa [#allocation6], 1 }
 0x9cf   :  { %3049 = vsyncpa [#allocation4], 1 }
 0x9d0   :  { %3051 = vsyncpa [#allocation4 + $0x1], 1 }

</bundles_post_ra>
